<compile_context>
chip_gen: v5e
topology: v5e:2x2
jax: 0.10.0
libtpu: 0.0.40
codegen_flags: <defaults>
</compile_context>

<pallas_src>
import jax
import jax.numpy as jnp
from jax import lax
from jax.experimental import pallas as pl
from jax.experimental.pallas import tpu as pltpu

HIDDEN = 256
LN_EPS = 1e-5          # PyTorch nn.LayerNorm default
_TILE_B_MAX = 1024     # fits comfortably in scoped VMEM on v5e/v6e/v7x


def _ln_relu(h, gamma, beta):
    """Fused LayerNorm (one-pass stats) + ReLU, all in f32."""
    inv_n = 1.0 / h.shape[-1]
    mu = jnp.sum(h, axis=-1, keepdims=True) * inv_n
    var = jnp.sum(h * h, axis=-1, keepdims=True) * inv_n - mu * mu
    inv = lax.rsqrt(var + LN_EPS)                      # EUP rsqrt
    return jnp.maximum((h - mu) * inv * gamma + beta, 0.0)


def critic_kernel(
    s_ref, a_ref,
    w1s_ref, w1a_ref, b1_ref, g1_ref, be1_ref,
    w2_ref, b2_ref, g2_ref, be2_ref,
    w3_ref, b3_ref, g3_ref, be3_ref,
    w4t_ref, b4_ref,
    out_ref,
):
    # Layer 1: split-concat Linear -> LayerNorm -> ReLU
    h = (
        jnp.dot(s_ref[...], w1s_ref[...], preferred_element_type=jnp.float32)
        + jnp.dot(a_ref[...], w1a_ref[...], preferred_element_type=jnp.float32)
        + b1_ref[...]
    )
    h = _ln_relu(h, g1_ref[...], be1_ref[...])

    # Layer 2
    h = jnp.dot(h, w2_ref[...], preferred_element_type=jnp.float32) + b2_ref[...]
    h = _ln_relu(h, g2_ref[...], be2_ref[...])

    # Layer 3
    h = jnp.dot(h, w3_ref[...], preferred_element_type=jnp.float32) + b3_ref[...]
    h = _ln_relu(h, g3_ref[...], be3_ref[...])

    # Output head: (1, 256) x (TILE_B, 256)^T -> (1, TILE_B)  (lane-dense store)
    q = lax.dot_general(
        w4t_ref[...], h,
        dimension_numbers=(((1,), (1,)), ((), ())),
        preferred_element_type=jnp.float32,
    )
    out_ref[...] = q + b4_ref[...]


def critic_forward(state, action, params, *, tile_b=None):
    B, state_dim = state.shape
    _, action_dim = action.shape
    d_in = state_dim + action_dim

    if tile_b is None:
        tile_b = B if B <= _TILE_B_MAX else _TILE_B_MAX
    nb = pl.cdiv(B, tile_b)

    # Split layer-1 weight so the concat never materializes; transpose the head.
    w1 = params["w1"]
    w1s, w1a = w1[:state_dim], w1[state_dim:]
    w4t = params["w4"].T                                   # (1, 256)

    flat_params = [
        w1s, w1a, params["b1"], params["g1"], params["be1"],
        params["w2"], params["b2"], params["g2"], params["be2"],
        params["w3"], params["b3"], params["g3"], params["be3"],
        w4t, params["b4"],
    ]

    def resident(arr):
        # Full-shape block, constant index_map -> stays in VMEM across steps.
        nd = arr.ndim
        return pl.BlockSpec(arr.shape, lambda i: (0,) * nd)

    in_specs = [
        pl.BlockSpec((tile_b, state_dim), lambda i: (i, 0)),
        pl.BlockSpec((tile_b, action_dim), lambda i: (i, 0)),
    ] + [resident(a) for a in flat_params]

    out_specs = pl.BlockSpec((1, tile_b), lambda i: (0, i))

    param_bytes = sum(int(a.size) for a in flat_params) * 4
    cost = pl.CostEstimate(
        flops=2 * B * (d_in * HIDDEN + 2 * HIDDEN * HIDDEN + HIDDEN)
        + 10 * 3 * B * HIDDEN,                # LN/ReLU elementwise
        transcendentals=3 * B,                # one rsqrt per row per LN
        bytes_accessed=B * (d_in + 1) * 4 + param_bytes,
    )

    out = pl.pallas_call(
        critic_kernel,
        out_shape=jax.ShapeDtypeStruct((1, B), jnp.float32),
        grid=(nb,),
        in_specs=in_specs,
        out_specs=out_specs,
        compiler_params=pltpu.CompilerParams(
            dimension_semantics=("parallel",),
            vmem_limit_bytes=32 * 1024 * 1024,
        ),
        cost_estimate=cost,
    )(state, action, *flat_params)

    return out.reshape(B, 1)


def init_params(key, state_dim, action_dim):
    """Deterministic synthetic init (matches shapes of the PyTorch module)."""
    d_in = state_dim + action_dim
    keys = jax.random.split(key, 8)

    def lin(kw, kb, fan_in, fan_out):
        bound = 1.0 / jnp.sqrt(fan_in)
        w = jax.random.uniform(kw, (fan_in, fan_out), jnp.float32, -bound, bound)
        b = jax.random.uniform(kb, (1, fan_out), jnp.float32, -bound, bound)
        return w, b

    w1, b1 = lin(keys[0], keys[1], d_in, HIDDEN)
    w2, b2 = lin(keys[2], keys[3], HIDDEN, HIDDEN)
    w3, b3 = lin(keys[4], keys[5], HIDDEN, HIDDEN)
    w4, b4 = lin(keys[6], keys[7], HIDDEN, 1)

    ones = jnp.ones((1, HIDDEN), jnp.float32)
    zeros = jnp.zeros((1, HIDDEN), jnp.float32)

    return {
        "w1": w1, "b1": b1, "g1": ones, "be1": zeros,
        "w2": w2, "b2": b2, "g2": ones, "be2": zeros,
        "w3": w3, "b3": b3, "g3": ones, "be3": zeros,
        "w4": w4, "b4": b4,
    }


def critic_ref(state, action, p):
    """Pure-JAX reference (mirrors the PyTorch module exactly)."""
    h = jnp.concatenate([state, action], axis=1)
    for i in (1, 2, 3):
        h = h @ p[f"w{i}"] + p[f"b{i}"]
        mu = jnp.mean(h, axis=-1, keepdims=True)
        var = jnp.mean((h - mu) ** 2, axis=-1, keepdims=True)
        h = (h - mu) * lax.rsqrt(var + LN_EPS) * p[f"g{i}"] + p[f"be{i}"]
        h = jnp.maximum(h, 0.0)
    return h @ p["w4"] + p["b4"]


if __name__ == "__main__":
    STATE_DIM, ACTION_DIM = 17, 6

    key = jax.random.PRNGKey(0)
    k_state, k_action, k_params, k_state2, k_action2 = jax.random.split(key, 5)
    params = init_params(k_params, STATE_DIM, ACTION_DIM)

    # Case 1: multi-step grid (B=256, tile_b=128 -> 2 pipelined tiles).
    B1 = 256
    state1 = jax.random.normal(k_state, (B1, STATE_DIM), jnp.float32)
    action1 = jax.random.normal(k_action, (B1, ACTION_DIM), jnp.float32)
    out1 = jax.block_until_ready(critic_forward(state1, action1, params, tile_b=128))
    ref1 = critic_ref(state1, action1, params)
    assert out1.shape == (B1, 1), out1.shape
    assert jnp.allclose(out1, ref1, atol=1e-4, rtol=1e-4), "mismatch vs reference (case 1)"

    # Case 2: small, lane-unaligned batch handled as a single full block.
    B2 = 40
    state2 = jax.random.normal(k_state2, (B2, STATE_DIM), jnp.float32)
    action2 = jax.random.normal(k_action2, (B2, ACTION_DIM), jnp.float32)
    out2 = jax.block_until_ready(critic_forward(state2, action2, params))
    ref2 = critic_ref(state2, action2, params)
    assert out2.shape == (B2, 1), out2.shape
    assert jnp.allclose(out2, ref2, atol=1e-4, rtol=1e-4), "mismatch vs reference (case 2)"

    print("KERNEL_OK")
</pallas_src>

<mosaic_0001>
module attributes {stable_mosaic.version = 11 : i64} {
  func.func @critic_kernel(%arg0: i32, %arg1: memref<128x17xf32, #tpu.memory_space<vmem>>, %arg2: memref<128x6xf32, #tpu.memory_space<vmem>>, %arg3: memref<17x256xf32, #tpu.memory_space<vmem>>, %arg4: memref<6x256xf32, #tpu.memory_space<vmem>>, %arg5: memref<1x256xf32, #tpu.memory_space<vmem>>, %arg6: memref<1x256xf32, #tpu.memory_space<vmem>>, %arg7: memref<1x256xf32, #tpu.memory_space<vmem>>, %arg8: memref<256x256xf32, #tpu.memory_space<vmem>>, %arg9: memref<1x256xf32, #tpu.memory_space<vmem>>, %arg10: memref<1x256xf32, #tpu.memory_space<vmem>>, %arg11: memref<1x256xf32, #tpu.memory_space<vmem>>, %arg12: memref<256x256xf32, #tpu.memory_space<vmem>>, %arg13: memref<1x256xf32, #tpu.memory_space<vmem>>, %arg14: memref<1x256xf32, #tpu.memory_space<vmem>>, %arg15: memref<1x256xf32, #tpu.memory_space<vmem>>, %arg16: memref<1x256xf32, #tpu.memory_space<vmem>>, %arg17: memref<1x1xf32, #tpu.memory_space<vmem>>, %arg18: memref<1x128xf32, #tpu.memory_space<vmem>>) attributes {dimension_semantics = [#tpu.dimension_semantics<parallel>], iteration_bounds = array<i64: 2>, scalar_prefetch = 0 : i64, scratch_operands = 0 : i64, tpu.core_type = #tpu.core_type<tc>, window_params = [{transform_indices = @transform_0, window_bounds = array<i64: 128, 17>}, {transform_indices = @transform_1, window_bounds = array<i64: 128, 6>}, {pipeline_mode = #tpu.pipeline_mode<synchronous>, transform_indices = @transform_2, window_bounds = array<i64: 17, 256>}, {pipeline_mode = #tpu.pipeline_mode<synchronous>, transform_indices = @transform_3, window_bounds = array<i64: 6, 256>}, {pipeline_mode = #tpu.pipeline_mode<synchronous>, transform_indices = @transform_4, window_bounds = array<i64: 1, 256>}, {pipeline_mode = #tpu.pipeline_mode<synchronous>, transform_indices = @transform_5, window_bounds = array<i64: 1, 256>}, {pipeline_mode = #tpu.pipeline_mode<synchronous>, transform_indices = @transform_6, window_bounds = array<i64: 1, 256>}, {pipeline_mode = #tpu.pipeline_mode<synchronous>, transform_indices = @transform_7, window_bounds = array<i64: 256, 256>}, {pipeline_mode = #tpu.pipeline_mode<synchronous>, transform_indices = @transform_8, window_bounds = array<i64: 1, 256>}, {pipeline_mode = #tpu.pipeline_mode<synchronous>, transform_indices = @transform_9, window_bounds = array<i64: 1, 256>}, {pipeline_mode = #tpu.pipeline_mode<synchronous>, transform_indices = @transform_10, window_bounds = array<i64: 1, 256>}, {pipeline_mode = #tpu.pipeline_mode<synchronous>, transform_indices = @transform_11, window_bounds = array<i64: 256, 256>}, {pipeline_mode = #tpu.pipeline_mode<synchronous>, transform_indices = @transform_12, window_bounds = array<i64: 1, 256>}, {pipeline_mode = #tpu.pipeline_mode<synchronous>, transform_indices = @transform_13, window_bounds = array<i64: 1, 256>}, {pipeline_mode = #tpu.pipeline_mode<synchronous>, transform_indices = @transform_14, window_bounds = array<i64: 1, 256>}, {pipeline_mode = #tpu.pipeline_mode<synchronous>, transform_indices = @transform_15, window_bounds = array<i64: 1, 256>}, {pipeline_mode = #tpu.pipeline_mode<synchronous>, transform_indices = @transform_16, window_bounds = array<i64: 1, 1>}, {transform_indices = @transform_17, window_bounds = array<i64: 1, 128>}]} {
    %c0 = arith.constant 0 : index
    %c0_0 = arith.constant 0 : index
    %0 = vector.load %arg1[%c0, %c0_0] : memref<128x17xf32, #tpu.memory_space<vmem>>, vector<128x17xf32>
    %c0_1 = arith.constant 0 : index
    %c0_2 = arith.constant 0 : index
    %1 = vector.load %arg3[%c0_1, %c0_2] : memref<17x256xf32, #tpu.memory_space<vmem>>, vector<17x256xf32>
    %cst = arith.constant dense<0.000000e+00> : vector<128x256xf32>
    %2 = tpu.matmul %0, %1, %cst {dimension_numbers = #tpu.dot_dimension_numbers<[1], [0], [0], [1], [0, 0, 1, 1], [], []>} : vector<128x17xf32>, vector<17x256xf32>, vector<128x256xf32> -> vector<128x256xf32>
    %c0_3 = arith.constant 0 : index
    %c0_4 = arith.constant 0 : index
    %3 = vector.load %arg2[%c0_3, %c0_4] : memref<128x6xf32, #tpu.memory_space<vmem>>, vector<128x6xf32>
    %c0_5 = arith.constant 0 : index
    %c0_6 = arith.constant 0 : index
    %4 = vector.load %arg4[%c0_5, %c0_6] : memref<6x256xf32, #tpu.memory_space<vmem>>, vector<6x256xf32>
    %cst_7 = arith.constant dense<0.000000e+00> : vector<128x256xf32>
    %5 = tpu.matmul %3, %4, %cst_7 {dimension_numbers = #tpu.dot_dimension_numbers<[1], [0], [0], [1], [0, 0, 1, 1], [], []>} : vector<128x6xf32>, vector<6x256xf32>, vector<128x256xf32> -> vector<128x256xf32>
    %6 = arith.addf %2, %5 : vector<128x256xf32>
    %c0_8 = arith.constant 0 : index
    %c0_9 = arith.constant 0 : index
    %7 = vector.load %arg5[%c0_8, %c0_9] : memref<1x256xf32, #tpu.memory_space<vmem>>, vector<1x256xf32>
    %8 = vector.broadcast %7 : vector<1x256xf32> to vector<128x256xf32>
    %9 = arith.addf %6, %8 : vector<128x256xf32>
    %c0_10 = arith.constant 0 : index
    %c0_11 = arith.constant 0 : index
    %10 = vector.load %arg6[%c0_10, %c0_11] : memref<1x256xf32, #tpu.memory_space<vmem>>, vector<1x256xf32>
    %c0_12 = arith.constant 0 : index
    %c0_13 = arith.constant 0 : index
    %11 = vector.load %arg7[%c0_12, %c0_13] : memref<1x256xf32, #tpu.memory_space<vmem>>, vector<1x256xf32>
    %cst_14 = arith.constant dense<0.000000e+00> : vector<128xf32>
    %12 = vector.multi_reduction <add>, %9, %cst_14 [1] : vector<128x256xf32> to vector<128xf32>
    %13 = vector.shape_cast %12 : vector<128xf32> to vector<128x1xf32>
    %cst_15 = arith.constant 3.906250e-03 : f32
    %14 = vector.broadcast %cst_15 : f32 to vector<128x1xf32>
    %15 = arith.mulf %13, %14 : vector<128x1xf32>
    %16 = arith.mulf %9, %9 : vector<128x256xf32>
    %cst_16 = arith.constant dense<0.000000e+00> : vector<128xf32>
    %17 = vector.multi_reduction <add>, %16, %cst_16 [1] : vector<128x256xf32> to vector<128xf32>
    %18 = vector.shape_cast %17 : vector<128xf32> to vector<128x1xf32>
    %cst_17 = arith.constant 3.906250e-03 : f32
    %19 = vector.broadcast %cst_17 : f32 to vector<128x1xf32>
    %20 = arith.mulf %18, %19 : vector<128x1xf32>
    %21 = arith.mulf %15, %15 : vector<128x1xf32>
    %22 = arith.subf %20, %21 : vector<128x1xf32>
    %cst_18 = arith.constant 9.99999974E-6 : f32
    %23 = vector.broadcast %cst_18 : f32 to vector<128x1xf32>
    %24 = arith.addf %22, %23 : vector<128x1xf32>
    %25 = math.rsqrt %24 : vector<128x1xf32>
    %26 = vector.broadcast %15 : vector<128x1xf32> to vector<128x256xf32>
    %27 = arith.subf %9, %26 : vector<128x256xf32>
    %28 = vector.broadcast %25 : vector<128x1xf32> to vector<128x256xf32>
    %29 = arith.mulf %27, %28 : vector<128x256xf32>
    %30 = vector.broadcast %10 : vector<1x256xf32> to vector<128x256xf32>
    %31 = arith.mulf %29, %30 : vector<128x256xf32>
    %32 = vector.broadcast %11 : vector<1x256xf32> to vector<128x256xf32>
    %33 = arith.addf %31, %32 : vector<128x256xf32>
    %cst_19 = arith.constant 0.000000e+00 : f32
    %34 = vector.broadcast %cst_19 : f32 to vector<128x256xf32>
    %35 = arith.maximumf %33, %34 : vector<128x256xf32>
    %c0_20 = arith.constant 0 : index
    %c0_21 = arith.constant 0 : index
    %36 = vector.load %arg8[%c0_20, %c0_21] : memref<256x256xf32, #tpu.memory_space<vmem>>, vector<256x256xf32>
    %cst_22 = arith.constant dense<0.000000e+00> : vector<128x256xf32>
    %37 = tpu.matmul %35, %36, %cst_22 {dimension_numbers = #tpu.dot_dimension_numbers<[1], [0], [0], [1], [0, 0, 1, 1], [], []>} : vector<128x256xf32>, vector<256x256xf32>, vector<128x256xf32> -> vector<128x256xf32>
    %c0_23 = arith.constant 0 : index
    %c0_24 = arith.constant 0 : index
    %38 = vector.load %arg9[%c0_23, %c0_24] : memref<1x256xf32, #tpu.memory_space<vmem>>, vector<1x256xf32>
    %39 = vector.broadcast %38 : vector<1x256xf32> to vector<128x256xf32>
    %40 = arith.addf %37, %39 : vector<128x256xf32>
    %c0_25 = arith.constant 0 : index
    %c0_26 = arith.constant 0 : index
    %41 = vector.load %arg10[%c0_25, %c0_26] : memref<1x256xf32, #tpu.memory_space<vmem>>, vector<1x256xf32>
    %c0_27 = arith.constant 0 : index
    %c0_28 = arith.constant 0 : index
    %42 = vector.load %arg11[%c0_27, %c0_28] : memref<1x256xf32, #tpu.memory_space<vmem>>, vector<1x256xf32>
    %cst_29 = arith.constant dense<0.000000e+00> : vector<128xf32>
    %43 = vector.multi_reduction <add>, %40, %cst_29 [1] : vector<128x256xf32> to vector<128xf32>
    %44 = vector.shape_cast %43 : vector<128xf32> to vector<128x1xf32>
    %cst_30 = arith.constant 3.906250e-03 : f32
    %45 = vector.broadcast %cst_30 : f32 to vector<128x1xf32>
    %46 = arith.mulf %44, %45 : vector<128x1xf32>
    %47 = arith.mulf %40, %40 : vector<128x256xf32>
    %cst_31 = arith.constant dense<0.000000e+00> : vector<128xf32>
    %48 = vector.multi_reduction <add>, %47, %cst_31 [1] : vector<128x256xf32> to vector<128xf32>
    %49 = vector.shape_cast %48 : vector<128xf32> to vector<128x1xf32>
    %cst_32 = arith.constant 3.906250e-03 : f32
    %50 = vector.broadcast %cst_32 : f32 to vector<128x1xf32>
    %51 = arith.mulf %49, %50 : vector<128x1xf32>
    %52 = arith.mulf %46, %46 : vector<128x1xf32>
    %53 = arith.subf %51, %52 : vector<128x1xf32>
    %cst_33 = arith.constant 9.99999974E-6 : f32
    %54 = vector.broadcast %cst_33 : f32 to vector<128x1xf32>
    %55 = arith.addf %53, %54 : vector<128x1xf32>
    %56 = math.rsqrt %55 : vector<128x1xf32>
    %57 = vector.broadcast %46 : vector<128x1xf32> to vector<128x256xf32>
    %58 = arith.subf %40, %57 : vector<128x256xf32>
    %59 = vector.broadcast %56 : vector<128x1xf32> to vector<128x256xf32>
    %60 = arith.mulf %58, %59 : vector<128x256xf32>
    %61 = vector.broadcast %41 : vector<1x256xf32> to vector<128x256xf32>
    %62 = arith.mulf %60, %61 : vector<128x256xf32>
    %63 = vector.broadcast %42 : vector<1x256xf32> to vector<128x256xf32>
    %64 = arith.addf %62, %63 : vector<128x256xf32>
    %cst_34 = arith.constant 0.000000e+00 : f32
    %65 = vector.broadcast %cst_34 : f32 to vector<128x256xf32>
    %66 = arith.maximumf %64, %65 : vector<128x256xf32>
    %c0_35 = arith.constant 0 : index
    %c0_36 = arith.constant 0 : index
    %67 = vector.load %arg12[%c0_35, %c0_36] : memref<256x256xf32, #tpu.memory_space<vmem>>, vector<256x256xf32>
    %cst_37 = arith.constant dense<0.000000e+00> : vector<128x256xf32>
    %68 = tpu.matmul %66, %67, %cst_37 {dimension_numbers = #tpu.dot_dimension_numbers<[1], [0], [0], [1], [0, 0, 1, 1], [], []>} : vector<128x256xf32>, vector<256x256xf32>, vector<128x256xf32> -> vector<128x256xf32>
    %c0_38 = arith.constant 0 : index
    %c0_39 = arith.constant 0 : index
    %69 = vector.load %arg13[%c0_38, %c0_39] : memref<1x256xf32, #tpu.memory_space<vmem>>, vector<1x256xf32>
    %70 = vector.broadcast %69 : vector<1x256xf32> to vector<128x256xf32>
    %71 = arith.addf %68, %70 : vector<128x256xf32>
    %c0_40 = arith.constant 0 : index
    %c0_41 = arith.constant 0 : index
    %72 = vector.load %arg14[%c0_40, %c0_41] : memref<1x256xf32, #tpu.memory_space<vmem>>, vector<1x256xf32>
    %c0_42 = arith.constant 0 : index
    %c0_43 = arith.constant 0 : index
    %73 = vector.load %arg15[%c0_42, %c0_43] : memref<1x256xf32, #tpu.memory_space<vmem>>, vector<1x256xf32>
    %cst_44 = arith.constant dense<0.000000e+00> : vector<128xf32>
    %74 = vector.multi_reduction <add>, %71, %cst_44 [1] : vector<128x256xf32> to vector<128xf32>
    %75 = vector.shape_cast %74 : vector<128xf32> to vector<128x1xf32>
    %cst_45 = arith.constant 3.906250e-03 : f32
    %76 = vector.broadcast %cst_45 : f32 to vector<128x1xf32>
    %77 = arith.mulf %75, %76 : vector<128x1xf32>
    %78 = arith.mulf %71, %71 : vector<128x256xf32>
    %cst_46 = arith.constant dense<0.000000e+00> : vector<128xf32>
    %79 = vector.multi_reduction <add>, %78, %cst_46 [1] : vector<128x256xf32> to vector<128xf32>
    %80 = vector.shape_cast %79 : vector<128xf32> to vector<128x1xf32>
    %cst_47 = arith.constant 3.906250e-03 : f32
    %81 = vector.broadcast %cst_47 : f32 to vector<128x1xf32>
    %82 = arith.mulf %80, %81 : vector<128x1xf32>
    %83 = arith.mulf %77, %77 : vector<128x1xf32>
    %84 = arith.subf %82, %83 : vector<128x1xf32>
    %cst_48 = arith.constant 9.99999974E-6 : f32
    %85 = vector.broadcast %cst_48 : f32 to vector<128x1xf32>
    %86 = arith.addf %84, %85 : vector<128x1xf32>
    %87 = math.rsqrt %86 : vector<128x1xf32>
    %88 = vector.broadcast %77 : vector<128x1xf32> to vector<128x256xf32>
    %89 = arith.subf %71, %88 : vector<128x256xf32>
    %90 = vector.broadcast %87 : vector<128x1xf32> to vector<128x256xf32>
    %91 = arith.mulf %89, %90 : vector<128x256xf32>
    %92 = vector.broadcast %72 : vector<1x256xf32> to vector<128x256xf32>
    %93 = arith.mulf %91, %92 : vector<128x256xf32>
    %94 = vector.broadcast %73 : vector<1x256xf32> to vector<128x256xf32>
    %95 = arith.addf %93, %94 : vector<128x256xf32>
    %cst_49 = arith.constant 0.000000e+00 : f32
    %96 = vector.broadcast %cst_49 : f32 to vector<128x256xf32>
    %97 = arith.maximumf %95, %96 : vector<128x256xf32>
    %c0_50 = arith.constant 0 : index
    %c0_51 = arith.constant 0 : index
    %98 = vector.load %arg16[%c0_50, %c0_51] : memref<1x256xf32, #tpu.memory_space<vmem>>, vector<1x256xf32>
    %cst_52 = arith.constant dense<0.000000e+00> : vector<1x128xf32>
    %99 = tpu.matmul %98, %97, %cst_52 {dimension_numbers = #tpu.dot_dimension_numbers<[1], [1], [0], [0], [0, 0, 1, 0], [], []>} : vector<1x256xf32>, vector<128x256xf32>, vector<1x128xf32> -> vector<1x128xf32>
    %c0_53 = arith.constant 0 : index
    %c0_54 = arith.constant 0 : index
    %100 = vector.load %arg17[%c0_53, %c0_54] : memref<1x1xf32, #tpu.memory_space<vmem>>, vector<1x1xf32>
    %101 = vector.broadcast %100 : vector<1x1xf32> to vector<1x128xf32>
    %102 = arith.addf %99, %101 : vector<1x128xf32>
    %c0_55 = arith.constant 0 : index
    %c0_56 = arith.constant 0 : index
    %103 = vector.load %arg18[%c0_55, %c0_56] : memref<1x128xf32, #tpu.memory_space<vmem>>, vector<1x128xf32>
    tpu.vector_store %arg18[%c0_55, %c0_56], %102 {strides = array<i32>} : memref<1x128xf32, #tpu.memory_space<vmem>>, vector<1x128xf32>,
    return
  }
  func.func @transform_0(%arg0: i32) -> (i32, i32) {
    %c0_i32 = arith.constant 0 : i32
    %c0_i32_0 = arith.constant 0 : i32
    return %arg0, %c0_i32 : i32, i32
  }
  func.func @transform_1(%arg0: i32) -> (i32, i32) {
    %c0_i32 = arith.constant 0 : i32
    %c0_i32_0 = arith.constant 0 : i32
    return %arg0, %c0_i32 : i32, i32
  }
  func.func @transform_2(%arg0: i32) -> (i32, i32) {
    %c0_i32 = arith.constant 0 : i32
    %c0_i32_0 = arith.constant 0 : i32
    %c0_i32_1 = arith.constant 0 : i32
    return %c0_i32, %c0_i32_0 : i32, i32
  }
  func.func @transform_3(%arg0: i32) -> (i32, i32) {
    %c0_i32 = arith.constant 0 : i32
    %c0_i32_0 = arith.constant 0 : i32
    %c0_i32_1 = arith.constant 0 : i32
    return %c0_i32, %c0_i32_0 : i32, i32
  }
  func.func @transform_4(%arg0: i32) -> (i32, i32) {
    %c0_i32 = arith.constant 0 : i32
    %c0_i32_0 = arith.constant 0 : i32
    %c0_i32_1 = arith.constant 0 : i32
    return %c0_i32, %c0_i32_0 : i32, i32
  }
  func.func @transform_5(%arg0: i32) -> (i32, i32) {
    %c0_i32 = arith.constant 0 : i32
    %c0_i32_0 = arith.constant 0 : i32
    %c0_i32_1 = arith.constant 0 : i32
    return %c0_i32, %c0_i32_0 : i32, i32
  }
  func.func @transform_6(%arg0: i32) -> (i32, i32) {
    %c0_i32 = arith.constant 0 : i32
    %c0_i32_0 = arith.constant 0 : i32
    %c0_i32_1 = arith.constant 0 : i32
    return %c0_i32, %c0_i32_0 : i32, i32
  }
  func.func @transform_7(%arg0: i32) -> (i32, i32) {
    %c0_i32 = arith.constant 0 : i32
    %c0_i32_0 = arith.constant 0 : i32
    %c0_i32_1 = arith.constant 0 : i32
    return %c0_i32, %c0_i32_0 : i32, i32
  }
  func.func @transform_8(%arg0: i32) -> (i32, i32) {
    %c0_i32 = arith.constant 0 : i32
    %c0_i32_0 = arith.constant 0 : i32
    %c0_i32_1 = arith.constant 0 : i32
    return %c0_i32, %c0_i32_0 : i32, i32
  }
  func.func @transform_9(%arg0: i32) -> (i32, i32) {
    %c0_i32 = arith.constant 0 : i32
    %c0_i32_0 = arith.constant 0 : i32
    %c0_i32_1 = arith.constant 0 : i32
    return %c0_i32, %c0_i32_0 : i32, i32
  }
  func.func @transform_10(%arg0: i32) -> (i32, i32) {
    %c0_i32 = arith.constant 0 : i32
    %c0_i32_0 = arith.constant 0 : i32
    %c0_i32_1 = arith.constant 0 : i32
    return %c0_i32, %c0_i32_0 : i32, i32
  }
  func.func @transform_11(%arg0: i32) -> (i32, i32) {
    %c0_i32 = arith.constant 0 : i32
    %c0_i32_0 = arith.constant 0 : i32
    %c0_i32_1 = arith.constant 0 : i32
    return %c0_i32, %c0_i32_0 : i32, i32
  }
  func.func @transform_12(%arg0: i32) -> (i32, i32) {
    %c0_i32 = arith.constant 0 : i32
    %c0_i32_0 = arith.constant 0 : i32
    %c0_i32_1 = arith.constant 0 : i32
    return %c0_i32, %c0_i32_0 : i32, i32
  }
  func.func @transform_13(%arg0: i32) -> (i32, i32) {
    %c0_i32 = arith.constant 0 : i32
    %c0_i32_0 = arith.constant 0 : i32
    %c0_i32_1 = arith.constant 0 : i32
    return %c0_i32, %c0_i32_0 : i32, i32
  }
  func.func @transform_14(%arg0: i32) -> (i32, i32) {
    %c0_i32 = arith.constant 0 : i32
    %c0_i32_0 = arith.constant 0 : i32
    %c0_i32_1 = arith.constant 0 : i32
    return %c0_i32, %c0_i32_0 : i32, i32
  }
  func.func @transform_15(%arg0: i32) -> (i32, i32) {
    %c0_i32 = arith.constant 0 : i32
    %c0_i32_0 = arith.constant 0 : i32
    %c0_i32_1 = arith.constant 0 : i32
    return %c0_i32, %c0_i32_0 : i32, i32
  }
  func.func @transform_16(%arg0: i32) -> (i32, i32) {
    %c0_i32 = arith.constant 0 : i32
    %c0_i32_0 = arith.constant 0 : i32
    %c0_i32_1 = arith.constant 0 : i32
    return %c0_i32, %c0_i32_0 : i32, i32
  }
  func.func @transform_17(%arg0: i32) -> (i32, i32) {
    %c0_i32 = arith.constant 0 : i32
    %c0_i32_0 = arith.constant 0 : i32
    return %c0_i32, %arg0 : i32, i32
  }
}

</mosaic_0001>

<bundles_post_ra>
// kernel: tpu_custom_call.1
= control target key start
LH: loop header
LB: loop body
LE: loop exit
PB: predicated region body
PF: predicated region fallthrough
CT: control target
= control target key end

     0   :  { %s6243_s0 = inlined_call_operand.vmem [shape: f32[256,17], index: 0, kind: input, shape index: {}]   ;;  %s6244_s1 = inlined_call_operand.vmem [shape: f32[256,6], index: 1, kind: input, shape index: {}]   ;;  %s6245_s2 = inlined_call_operand.vmem [shape: f32[17,256], index: 2, kind: input, shape index: {}]   ;;  %s6246_s3 = inlined_call_operand.vmem [shape: f32[6,256], index: 3, kind: input, shape index: {}]   ;;  %s6247_s4 = inlined_call_operand.vmem [shape: f32[1,256], index: 4, kind: input, shape index: {}]   ;;  %s6248_s5 = inlined_call_operand.vmem [shape: f32[1,256], index: 5, kind: input, shape index: {}]   ;;  %s6249_s6 = inlined_call_operand.vmem [shape: f32[1,256], index: 6, kind: input, shape index: {}]   ;;  %s6250_s7 = inlined_call_operand.vmem [shape: f32[256,256], index: 7, kind: input, shape index: {}]   ;;  %s6251_s8 = inlined_call_operand.vmem [shape: f32[1,256], index: 8, kind: input, shape index: {}]   ;;  %s6252_s9 = inlined_call_operand.hbm [shape: f32[1,256], index: 9, kind: input, shape index: {}]   ;;  %s6253_s10 = inlined_call_operand.hbm [shape: f32[1,256], index: 10, kind: input, shape index: {}]   ;;  %s6254_s11 = inlined_call_operand.hbm [shape: f32[256,256], index: 11, kind: input, shape index: {}]   ;;  %s6255_s12 = inlined_call_operand.vmem [shape: f32[1,256], index: 12, kind: input, shape index: {}]   ;;  %s6256_s13 = inlined_call_operand.vmem [shape: f32[1,256], index: 13, kind: input, shape index: {}]   ;;  %s6257_s14 = inlined_call_operand.hbm [shape: f32[1,256], index: 14, kind: input, shape index: {}]   ;;  %s6258_s15 = inlined_call_operand.hbm [shape: f32[1,256], index: 15, kind: input, shape index: {}]   ;;  %s6259_s16 = inlined_call_operand.<no memory space> [shape: f32[1,1], index: 16, kind: input, shape index: {}]   ;;  %s6260_s17 = inlined_call_operand.hbm [shape: f32[1,256], index: 17, kind: output, shape index: {}]  }
   0x1   :  { %6271 = sst [smem:[#allocation27_spill]] %s6243_s0  ;;  %v22_v0 = vstv %s6259_s16 }
   0x2   :  { %6272 = sst [smem:[#allocation28_spill]] %s6244_s1  ;;  %23 = vst [vmem:[#allocation2] sm:$0x1] %v22_v0 }
   0x3   :  { %6273 = sst [smem:[#allocation29_spill]] %s6253_s10 }
   0x4   :  { %6274 = sst [smem:[#allocation30_spill]] %s6257_s14 }
   0x5   :  { %24 = vsyncpa [#allocation4], 0 }
   0x6   :  { %25 = vsyncpa [#allocation7], 0 }
   0x7   :  { %26 = vsyncpa [#allocation10], 0 }
   0x8   :  { %27 = vsyncpa [#allocation5], 0 }
   0x9   :  { %29 = vsyncpa [#allocation5 + $0x1], 0  ;;  %s4166_s26 = smov 0   ;;  %s4168_s27 = smov 0  }
   0xa   :  { %s4170_s28 = smov 0   ;;  %s4172_s29 = smov 0  }
   0xb LB: > { %6275 = sst [smem:[#allocation17_spill]] %s4051_s26  ;;  %s4187_s16 = sadd.s32 4294967295, %s4063_s29   ;;  %s4063_s29 = sphi %s4172_s29, %s6310_s29   ;;  %s4059_s28 = sphi %s4170_s28, %s6312_s28   ;;  %s4055_s27 = sphi %s4168_s27, %s6314_s27   ;;  %s4051_s26 = sphi %s4166_s26, %s6313_s26  }
   0xc   : > { %6276 = sst [smem:[#allocation18_spill]] %s4059_s28  ;;  %s3561_s0 = sadd.s32 4294967294, %s4063_s29  }
   0xd   : > { %6277 = sst [smem:[#allocation19_spill]] %s4063_s29  ;;  %s4191_s30 = sadd.s32 1, %s4063_s29  }
   0xe   : > { %6278 = sst [smem:[#allocation20_spill]] %s4191_s30  ;;  %s409_s18 = sadd.s32 1, %s4059_s28 }
   0xf   : > { %s406_s19 = ssub.s32 %s4063_s29, %s4191_s30  ;;  %p419_p0 = scmp.ne.s32.totalorder %s4059_s28, %s4055_s27 }
  0x10   : > { %p407_p1 = scmp.eq.s32.totalorder %s406_s19, 0  ;;  %p420_p2 = scmp.eq.s32.totalorder %s4187_s16, 1 }
  0x11   : > { %p425_p3 = scmp.ne.s32.totalorder %s4055_s27, %s4051_s26  ;;  %p426_p4 = scmp.eq.s32.totalorder %s3561_s0, 1 }
  0x12   : > { %s4202_s1 = scalar_select %p407_p1, %s4059_s28, %s409_s18  }
  0x13   : > { %p4204_p5 = por %p420_p2, %p419_p0  ;;  %p4208_p6 = por %p426_p4, %p425_p3 }
  0x14   : > { %6279 = sst [smem:[#allocation21_spill]] %s4202_s1  ;;  %p3562_p7 = scmp.ge.s32.totalorder %s4063_s29, 1 }
  0x15   : > { %s6281_s21 = scalar_select %p4208_p6, 1, 0 }
  0x16   : > { %p433_p8 = scmp.lt.s32.totalorder %s4063_s29, 3  ;;  %p3691_p9 = scmp.eq.s32.totalorder %s4187_s16, 0 }
  0x17   : > { %6282 = sst [smem:[#allocation22_spill]] %s6281_s21  ;;  %s4065_s0 = smov [#allocation6]  }
  0x18   : > { %p4215_p10 = pnand %p3562_p7, %p433_p8  ;;  %s6284_s10 = sld [smem:[#allocation29_spill]] }
  0x19   : > { %s480_s18 = sshll.u32 %s4065_s0, 4  ;;  %s6285_s14 = sld [smem:[#allocation30_spill]]  ;;  %s481_s18 = int_to_ptr.vmem [resolvable:$true] %s480_s18 }
  0x1a   : > { %p3671_p11 = pneg %p4215_p10  ;;  %s4066_s21 = smov [#allocation9]  }
  0x1b   : > { %s512_s0 = sshll.u32 %s4066_s21, 4  ;;  %s4067_s26 = smov [#allocation3]   ;;  %s513_s0 = int_to_ptr.vmem [resolvable:$true] %s512_s0 }
  0x1c   : > { %p4229_p12 = pnand %p3691_p9, %p3671_p11  ;;  %s468_s29 = sshll.u32 %s4067_s26, 4  ;;  %s469_s29 = int_to_ptr.vmem [resolvable:$true] %s468_s29 }
  0x1d   : > { %s4068_s23 = smov [#allocation8]   ;;  %s4069_s24 = smov 256  }
  0x1e   : > { %s478_s25 = sshll.u32 %s6284_s10, 4  ;;  %s466_s10 = sshll.u32 %s6252_s9, 4  ;;  %s479_s25 = int_to_ptr.hbm [resolvable:$true] %s478_s25  ;;  %s467_s10 = int_to_ptr.hbm [resolvable:$true] %s466_s10 }
  0x1f   : > { %s510_s28 = sshll.u32 %s6285_s14, 4  ;;  %s489_s14 = sshll.u32 %s6254_s11, 4  ;;  %s511_s28 = int_to_ptr.hbm [resolvable:$true] %s510_s28  ;;  %s490_s14 = int_to_ptr.hbm [resolvable:$true] %s489_s14 }
  0x20   : > { %3677 = dma.hbm_to_vmem [thread:$0]  (!%p4229_p12), %s479_s25, 32, %s481_s18, [#allocation7]  }
  0x21   : > { %3683 = dma.hbm_to_vmem [thread:$0]  (!%p4229_p12), %s511_s28, 32, %s513_s0, [#allocation10]  }
  0x22   : > { %3674 = dma.hbm_to_vmem [thread:$0]  (!%p4229_p12), %s467_s10, 32, %s469_s29, [#allocation4]  }
  0x23   : > { %s491_s21 = sshll.u32 %s4068_s23, 4  ;;  %s4070_s25 = smov 16   ;;  %s492_s21 = int_to_ptr.vmem [resolvable:$true] %s491_s21 }
  0x24   : > { %3680 = dma.hbm_to_vmem [thread:$0]  (!%p4229_p12), %s490_s14, 8192, %s492_s21, [#allocation7], %s4069_s24, %s4069_s24, %s4070_s25  }
  0x25   : > { %s522_s0 = sshll.u32 %s6258_s15, 4  ;;  %s4071_s1 = smov [#allocation11]   ;;  %s523_s0 = int_to_ptr.hbm [resolvable:$true] %s522_s0 }
  0x26   : > { %s524_s19 = sshll.u32 %s4071_s1, 4  ;;  %558 = sbr.rel (%p4215_p10) target bundleno = 1258 (0x4ea), region = 88  ;;  %s525_s19 = int_to_ptr.vmem [resolvable:$true] %s524_s19 }
  0x27   : > { %3686 = dma.hbm_to_vmem [thread:$0]  (!%p4229_p12), %s523_s0, 32, %s525_s19, [#allocation10]  }
  0x2b   : > { %4034 = dma.done.wait (%p3691_p9), [#allocation4], 32  }
  0x2c   : > { %4036 = vsyncadd (%p3691_p9), [#allocation4], 4294967264 }
  0x2d   : > { %4038 = dma.done.wait (%p3691_p9), [#allocation7], 8224  }
  0x2e   : > { %4040 = vsyncadd (%p3691_p9), [#allocation7], 4294959072 }
  0x2f   : > { %4042 = dma.done.wait (%p3691_p9), [#allocation10], 64  }
  0x30   : > { %4044 = vsyncadd (%p3691_p9), [#allocation10], 4294967232  ;;  %s3575_s10 = sshll.u32 %s4187_s16, 4  ;;  %vm922_vm0 = vcmask 1040384   ;;  %v667_v1 = vld [vmem:[%s6245_s2 + $0x20] sm:$0x1] }
  0x31   : > { %p636_p13 = scmp.lt.s32.totalorder %s3575_s10, 31  ;;  %v668_v2 = vld [vmem:[%s6245_s2 + $0x28] sm:$0x1]  ;;  %v665_v3 = vld [vmem:[%s6245_s2 + $0x10] sm:$0xff]  ;;  %s6287_s18 = sld [smem:[#allocation27_spill]]  ;;  %3613 = vmatpush.msk.msra.mxu2 %vm922_vm0, %v667_v1  ;;  %v666_v4 = vld [vmem:[%s6245_s2 + $0x18] sm:$0xff] }
  0x32   : > { %3630 = vmatpush.msk.msra.mxu3 %vm922_vm0, %v668_v2  ;;  %v663_v5 = vld [vmem:[%s6245_s2] sm:$0xff]  ;;  %vm736_vm1 = vcmask 1045504   ;;  %s6288_s30 = sld [smem:[#allocation28_spill]]  ;;  %v664_v6 = vld [vmem:[%s6245_s2 + $0x8] sm:$0xff]  ;;  %vm873_vm2 = vcmask 138240   ;;  %vm687_vm3 = vcmask 48128  }
  0x33   : > { %s6316_s10 = smov (!%p636_p13, %s3575_s10), 31  ;;  %v685_v7 = vld [vmem:[%s6246_s3] sm:$0x3f]  ;;  %v686_v8 = vld [vmem:[%s6246_s3 + $0x8] sm:$0x3f]  ;;  %943 = vmatpush.msra.mxu2 %v665_v3  ;;  %s633_s26 = sand.u32 1, %s4055_s27  }
  0x34   : > { %s3576_s14 = sshll.u32 %s6316_s10, 3  ;;  %1008 = vmatpush.msra.mxu3 %v666_v4  ;;  %3579 = vmatpush.msk.msra.mxu0 %vm736_vm1, %v685_v7  ;;  %v1059_v43 = vld [vmem:[%s6247_s4] sm:$0x3]  ;;  %s634_s23 = scalar_lea.vmem [#allocation12], %s633_s26 }
  0x35   : > { %3596 = vmatpush.msk.msra.mxu1 %vm736_vm1, %v686_v8  ;;  %944 = vmatpush.msra.mxu2 %v663_v5  ;;  %v4400_v44 = vperm.slane %v1059_v43, 0  ;;  %v4402_v45 = vperm.slane %v1059_v43, 1  ;;  %s3442_s21 = sshll.u32 %s634_s23, 4  ;;  %s3432_s25 = scalar_lea.sflag [#allocation5], %s633_s26  ;;  %s3443_s21 = int_to_ptr.vmem [resolvable:$true] %s3442_s21 }
  0x36   : > { %1009 = vmatpush.msra.mxu3 %v664_v6  ;;  %s4009_s1 = scalar_lea.hbm %s6260_s17, 2 }
  0x37   : > { %s4279_s28 = scalar_lea.vmem %s6287_s18, %s3576_s14 }
  0x38   : > { %s4290_s22 = scalar_lea.vmem %s6288_s30, %s3576_s14  ;;  %v647_v9 = vld [vmem:[%s4279_s28] sm:$0xff]  ;;  %v648_v11 = vld [vmem:[%s4279_s28 + $0x8] sm:$0xff]  ;;  %v649_v13 = vld [vmem:[%s4279_s28 + $0x10] sm:$0xff] }
  0x39   : > { %v669_v10 = vld [vmem:[%s4290_s22] sm:$0xff]  ;;  %3614 = vmatmul.msk.f32.vlgmr.msra.gmra.mxu2 %vm873_vm2, %v647_v9  ;;  %3631 = vmatmul.msk.f32.vlgmr.msra.gmra.mxu3 %vm873_vm2, %v647_v9  ;;  %v670_v12 = vld [vmem:[%s4290_s22 + $0x8] sm:$0xff]  ;;  %v671_v14 = vld [vmem:[%s4290_s22 + $0x10] sm:$0xff] }
  0x3a   : > { %3580 = vmatmul.msk.f32.vlgmr.msra.gmra.mxu0 %vm687_vm3, %v669_v10  ;;  %3597 = vmatmul.msk.f32.vlgmr.msra.gmra.mxu1 %vm687_vm3, %v669_v10  ;;  %v650_v15 = vld [vmem:[%s4279_s28 + $0x18] sm:$0xff]  ;;  %v651_v17 = vld [vmem:[%s4279_s28 + $0x20] sm:$0xff]  ;;  %v652_v19 = vld [vmem:[%s4279_s28 + $0x28] sm:$0xff] }
  0x3b   : > { %v672_v16 = vld [vmem:[%s4290_s22 + $0x18] sm:$0xff]  ;;  %v673_v18 = vld [vmem:[%s4290_s22 + $0x20] sm:$0xff]  ;;  %v674_v20 = vld [vmem:[%s4290_s22 + $0x28] sm:$0xff] }
  0x3c   : > { %v653_v21 = vld [vmem:[%s4279_s28 + $0x30] sm:$0xff]  ;;  %v654_v23 = vld [vmem:[%s4279_s28 + $0x38] sm:$0xff]  ;;  %v655_v25 = vld [vmem:[%s4279_s28 + $0x40] sm:$0xff] }
  0x3d   : > { %v675_v22 = vld [vmem:[%s4290_s22 + $0x30] sm:$0xff]  ;;  %v676_v24 = vld [vmem:[%s4290_s22 + $0x38] sm:$0xff]  ;;  %v677_v26 = vld [vmem:[%s4290_s22 + $0x40] sm:$0xff] }
  0x3e   : > { %v656_v27 = vld [vmem:[%s4279_s28 + $0x48] sm:$0xff]  ;;  %v657_v29 = vld [vmem:[%s4279_s28 + $0x50] sm:$0xff]  ;;  %v658_v31 = vld [vmem:[%s4279_s28 + $0x58] sm:$0xff] }
  0x3f   : > { %v678_v28 = vld [vmem:[%s4290_s22 + $0x48] sm:$0xff]  ;;  %v679_v30 = vld [vmem:[%s4290_s22 + $0x50] sm:$0xff]  ;;  %v680_v32 = vld [vmem:[%s4290_s22 + $0x58] sm:$0xff] }
  0x40   : > { %v659_v33 = vld [vmem:[%s4279_s28 + $0x60] sm:$0xff]  ;;  %v660_v35 = vld [vmem:[%s4279_s28 + $0x68] sm:$0xff]  ;;  %v661_v37 = vld [vmem:[%s4279_s28 + $0x70] sm:$0xff] }
  0x41   : > { %3615 = vmatmul.msk.f32.gmra.mxu2 %vm873_vm2, %v648_v11  ;;  %3632 = vmatmul.msk.f32.gmra.mxu3 %vm873_vm2, %v648_v11  ;;  %v681_v34 = vld [vmem:[%s4290_s22 + $0x60] sm:$0xff]  ;;  %v682_v36 = vld [vmem:[%s4290_s22 + $0x68] sm:$0xff]  ;;  %v683_v38 = vld [vmem:[%s4290_s22 + $0x70] sm:$0xff] }
  0x42   : > { %3581 = vmatmul.msk.f32.gmra.mxu0 %vm687_vm3, %v670_v12  ;;  %3598 = vmatmul.msk.f32.gmra.mxu1 %vm687_vm3, %v670_v12  ;;  %v662_v39 = vld [vmem:[%s4279_s28 + $0x78] sm:$0xff] }
  0x43   : > { %v684_v40 = vld [vmem:[%s4290_s22 + $0x78] sm:$0xff]  ;;  %s3440_s22 = scalar_lea.hbm %s6260_s17, %s4187_s16 }
  0x44   : > { %s3444_s24 = sshll.u32 %s3440_s22, 4  ;;  %s3445_s24 = int_to_ptr.hbm [resolvable:$true] %s3444_s24 }
  0x45   : > { %s4003_s18 = sshra.s32 %s3445_s24, 4  ;;  %s4004_s18 = int_to_ptr.hbm [resolvable:$true] %s4003_s18 }
  0x46   : > { %s4005_s0 = scalar_lea.hbm %s4004_s18, 1  ;;  %p4010_p3 = scmp.lt.s32.totalorder %s4004_s18, %s6260_s17 }
  0x47   : > { %p4006_p0 = scmp.ne.s32.totalorder %s4004_s18, %s4005_s0  ;;  %p4011_p4 = scmp.lt.s32.totalorder %s4009_s1, %s4005_s0 }
  0x49   : > { %3616 = vmatmul.msk.f32.gmra.mxu2 %vm873_vm2, %v649_v13  ;;  %3633 = vmatmul.msk.f32.gmra.mxu3 %vm873_vm2, %v649_v13  ;;  %p4007_p1 = pnand %p4006_p0, %p4204_p5  ;;  %p4012_p7 = por %p4011_p4, %p4010_p3 }
  0x4a   : > { %3582 = vmatmul.msk.f32.gmra.mxu0 %vm687_vm3, %v671_v14  ;;  %3599 = vmatmul.msk.f32.gmra.mxu1 %vm687_vm3, %v671_v14 }
  0x4b   : > { %p4008_p2 = pneg %p4007_p1 }
  0x4d   : > { %p4013_p8 = pnand %p4012_p7, %p4008_p2 }
  0x51   : > { %3617 = vmatmul.msk.f32.gmra.mxu2 %vm873_vm2, %v650_v15  ;;  %3634 = vmatmul.msk.f32.gmra.mxu3 %vm873_vm2, %v650_v15 }
  0x52   : > { %3583 = vmatmul.msk.f32.gmra.mxu0 %vm687_vm3, %v672_v16  ;;  %3600 = vmatmul.msk.f32.gmra.mxu1 %vm687_vm3, %v672_v16 }
  0x59   : > { %3618 = vmatmul.msk.f32.gmra.mxu2 %vm873_vm2, %v651_v17  ;;  %3635 = vmatmul.msk.f32.gmra.mxu3 %vm873_vm2, %v651_v17 }
  0x5a   : > { %3584 = vmatmul.msk.f32.gmra.mxu0 %vm687_vm3, %v673_v18  ;;  %3601 = vmatmul.msk.f32.gmra.mxu1 %vm687_vm3, %v673_v18 }
  0x61   : > { %3619 = vmatmul.msk.f32.gmra.mxu2 %vm873_vm2, %v652_v19  ;;  %3636 = vmatmul.msk.f32.gmra.mxu3 %vm873_vm2, %v652_v19 }
  0x62   : > { %3585 = vmatmul.msk.f32.gmra.mxu0 %vm687_vm3, %v674_v20  ;;  %3602 = vmatmul.msk.f32.gmra.mxu1 %vm687_vm3, %v674_v20 }
  0x69   : > { %3620 = vmatmul.msk.f32.gmra.mxu2 %vm873_vm2, %v653_v21  ;;  %3637 = vmatmul.msk.f32.gmra.mxu3 %vm873_vm2, %v653_v21 }
  0x6a   : > { %3586 = vmatmul.msk.f32.gmra.mxu0 %vm687_vm3, %v675_v22  ;;  %3603 = vmatmul.msk.f32.gmra.mxu1 %vm687_vm3, %v675_v22 }
  0x71   : > { %3621 = vmatmul.msk.f32.gmra.mxu2 %vm873_vm2, %v654_v23  ;;  %3638 = vmatmul.msk.f32.gmra.mxu3 %vm873_vm2, %v654_v23 }
  0x72   : > { %3587 = vmatmul.msk.f32.gmra.mxu0 %vm687_vm3, %v676_v24  ;;  %3604 = vmatmul.msk.f32.gmra.mxu1 %vm687_vm3, %v676_v24 }
  0x79   : > { %3622 = vmatmul.msk.f32.gmra.mxu2 %vm873_vm2, %v655_v25  ;;  %3639 = vmatmul.msk.f32.gmra.mxu3 %vm873_vm2, %v655_v25 }
  0x7a   : > { %3588 = vmatmul.msk.f32.gmra.mxu0 %vm687_vm3, %v677_v26  ;;  %3605 = vmatmul.msk.f32.gmra.mxu1 %vm687_vm3, %v677_v26 }
  0x81   : > { %3623 = vmatmul.msk.f32.gmra.mxu2 %vm873_vm2, %v656_v27  ;;  %3640 = vmatmul.msk.f32.gmra.mxu3 %vm873_vm2, %v656_v27 }
  0x82   : > { %3589 = vmatmul.msk.f32.gmra.mxu0 %vm687_vm3, %v678_v28  ;;  %3606 = vmatmul.msk.f32.gmra.mxu1 %vm687_vm3, %v678_v28 }
  0x89   : > { %3624 = vmatmul.msk.f32.gmra.mxu2 %vm873_vm2, %v657_v29  ;;  %3641 = vmatmul.msk.f32.gmra.mxu3 %vm873_vm2, %v657_v29 }
  0x8a   : > { %3590 = vmatmul.msk.f32.gmra.mxu0 %vm687_vm3, %v679_v30  ;;  %3607 = vmatmul.msk.f32.gmra.mxu1 %vm687_vm3, %v679_v30 }
  0x91   : > { %3625 = vmatmul.msk.f32.gmra.mxu2 %vm873_vm2, %v658_v31  ;;  %3642 = vmatmul.msk.f32.gmra.mxu3 %vm873_vm2, %v658_v31 }
  0x92   : > { %3591 = vmatmul.msk.f32.gmra.mxu0 %vm687_vm3, %v680_v32  ;;  %3608 = vmatmul.msk.f32.gmra.mxu1 %vm687_vm3, %v680_v32 }
  0x99   : > { %3626 = vmatmul.msk.f32.gmra.mxu2 %vm873_vm2, %v659_v33  ;;  %3643 = vmatmul.msk.f32.gmra.mxu3 %vm873_vm2, %v659_v33 }
  0x9a   : > { %3592 = vmatmul.msk.f32.gmra.mxu0 %vm687_vm3, %v681_v34  ;;  %3609 = vmatmul.msk.f32.gmra.mxu1 %vm687_vm3, %v681_v34 }
  0xa1   : > { %3627 = vmatmul.msk.f32.gmra.mxu2 %vm873_vm2, %v660_v35  ;;  %3644 = vmatmul.msk.f32.gmra.mxu3 %vm873_vm2, %v660_v35 }
  0xa2   : > { %3593 = vmatmul.msk.f32.gmra.mxu0 %vm687_vm3, %v682_v36  ;;  %3610 = vmatmul.msk.f32.gmra.mxu1 %vm687_vm3, %v682_v36 }
  0xa9   : > { %3628 = vmatmul.msk.f32.gmra.mxu2 %vm873_vm2, %v661_v37  ;;  %3645 = vmatmul.msk.f32.gmra.mxu3 %vm873_vm2, %v661_v37 }
  0xaa   : > { %3594 = vmatmul.msk.f32.gmra.mxu0 %vm687_vm3, %v683_v38  ;;  %3611 = vmatmul.msk.f32.gmra.mxu1 %vm687_vm3, %v683_v38 }
  0xb1   : > { %3629 = vmatmul.msk.f32.gmra.mxu2 %vm873_vm2, %v662_v39  ;;  %3646 = vmatmul.msk.f32.gmra.mxu3 %vm873_vm2, %v662_v39 }
  0xb2   : > { %3595 = vmatmul.msk.f32.gmra.mxu0 %vm687_vm3, %v684_v40  ;;  %3612 = vmatmul.msk.f32.gmra.mxu1 %vm687_vm3, %v684_v40 }
  0xb7   : > { %v760_v41 = vpop.f32.mrf.mxu0  ;;  %v825_v42 = vpop.f32.mrf.mxu1 }
  0xbc   : > { %v946_v46 = vpop.f32.mrf.mxu2  ;;  %v1011_v47 = vpop.f32.mrf.mxu3 }
  0xbd   : > { %v947_v48 = vadd.f32 %v946_v46, %v760_v41  ;;  %v1012_v49 = vadd.f32 %v1011_v47, %v825_v42 }
  0xbf   : > { %v4405_v50 = vadd.f32 %v4400_v44, %v947_v48  ;;  %v4408_v51 = vadd.f32 %v4402_v45, %v1012_v49  ;;  %v763_v52 = vpop.f32.mrf.mxu0  ;;  %v828_v53 = vpop.f32.mrf.mxu1 }
  0xc1   : > { %v1099_v54 = vadd.f32 %v4408_v51, %v4405_v50  ;;  %v1163_v59 = vmul.f32 %v4405_v50, %v4405_v50  ;;  %v1164_v60 = vmul.f32 %v4408_v51, %v4408_v51 }
  0xc3   : > { %1100 = vadd.xlane.f32.xlu0 %v1099_v54  ;;  %v1195_v2 = vadd.f32 %v1164_v60, %v1163_v59 }
  0xc4   : > { %v949_v55 = vpop.f32.mrf.mxu2  ;;  %v1014_v56 = vpop.f32.mrf.mxu3 }
  0xc5   : > { %v950_v57 = vadd.f32 %v949_v55, %v763_v52  ;;  %v1015_v58 = vadd.f32 %v1014_v56, %v828_v53 }
  0xc7   : > { %v4417_v61 = vadd.f32 %v4400_v44, %v950_v57  ;;  %v4420_v62 = vadd.f32 %v4402_v45, %v1015_v58  ;;  %v766_v63 = vpop.f32.mrf.mxu0  ;;  %v831_v0 = vpop.f32.mrf.mxu1 }
  0xc9   : > { %v1102_v1 = vadd.f32 %v4420_v62, %v4417_v61  ;;  %v1165_v7 = vmul.f32 %v4417_v61, %v4417_v61  ;;  %v1166_v8 = vmul.f32 %v4420_v62, %v4420_v62 }
  0xcb   : > { %1103 = vadd.xlane.f32.xlu1 %v1102_v1  ;;  %1196 = vadd.xlane.f32.xlu0 %v1195_v2  ;;  %v1198_v14 = vadd.f32 %v1166_v8, %v1165_v7 }
  0xcc   : > { %v952_v3 = vpop.f32.mrf.mxu2  ;;  %v1017_v4 = vpop.f32.mrf.mxu3 }
  0xcd   : > { %v953_v5 = vadd.f32 %v952_v3, %v766_v63  ;;  %v1018_v6 = vadd.f32 %v1017_v4, %v831_v0 }
  0xcf   : > { %v4429_v9 = vadd.f32 %v4400_v44, %v953_v5  ;;  %v4432_v10 = vadd.f32 %v4402_v45, %v1018_v6  ;;  %v769_v11 = vpop.f32.mrf.mxu0  ;;  %v834_v12 = vpop.f32.mrf.mxu1 }
  0xd1   : > { %v1105_v13 = vadd.f32 %v4432_v10, %v4429_v9  ;;  %v1167_v19 = vmul.f32 %v4429_v9, %v4429_v9  ;;  %v1168_v20 = vmul.f32 %v4432_v10, %v4432_v10 }
  0xd3   : > { %1106 = vadd.xlane.f32.xlu2 %v1105_v13  ;;  %1199 = vadd.xlane.f32.xlu1 %v1198_v14  ;;  %v1201_v25 = vadd.f32 %v1168_v20, %v1167_v19 }
  0xd4   : > { %v955_v15 = vpop.f32.mrf.mxu2  ;;  %v1020_v16 = vpop.f32.mrf.mxu3 }
  0xd5   : > { %v956_v17 = vadd.f32 %v955_v15, %v769_v11  ;;  %v1021_v18 = vadd.f32 %v1020_v16, %v834_v12 }
  0xd7   : > { %v4441_v21 = vadd.f32 %v4400_v44, %v956_v17  ;;  %v4444_v22 = vadd.f32 %v4402_v45, %v1021_v18  ;;  %v772_v23 = vpop.f32.mrf.mxu0  ;;  %v837_v24 = vpop.f32.mrf.mxu1 }
  0xd9   : > { %v1108_v26 = vadd.f32 %v4444_v22, %v4441_v21  ;;  %v1169_v27 = vmul.f32 %v4441_v21, %v4441_v21  ;;  %v1170_v28 = vmul.f32 %v4444_v22, %v4444_v22 }
  0xdb   : > { %1202 = vadd.xlane.f32.xlu2 %v1201_v25  ;;  %1109 = vadd.xlane.f32.xlu0 %v1108_v26  ;;  %v1204_v29 = vadd.f32 %v1170_v28, %v1169_v27 }
  0xdc   : > { %v958_v30 = vpop.f32.mrf.mxu2  ;;  %v1023_v31 = vpop.f32.mrf.mxu3 }
  0xdd   : > { %v959_v32 = vadd.f32 %v958_v30, %v772_v23  ;;  %v1024_v33 = vadd.f32 %v1023_v31, %v837_v24  ;;  %1205 = vadd.xlane.f32.xlu1 %v1204_v29 }
  0xdf   : > { %v4453_v34 = vadd.f32 %v4400_v44, %v959_v32  ;;  %v4456_v35 = vadd.f32 %v4402_v45, %v1024_v33  ;;  %v775_v36 = vpop.f32.mrf.mxu0  ;;  %v840_v37 = vpop.f32.mrf.mxu1  ;;  %v1668_v32 = vld [vmem:[%s6250_s7 + $0xf8] sm:$0xff] }
  0xe0   : > { %v1700_v33 = vld [vmem:[%s6250_s7 + $0x1f8] sm:$0xff]  ;;  %1837 = vmatpush.msrb.mxu2 %v1668_v32 }
  0xe1   : > { %v1111_v38 = vadd.f32 %v4456_v35, %v4453_v34  ;;  %v1171_v39 = vmul.f32 %v4453_v34, %v4453_v34  ;;  %v1172_v40 = vmul.f32 %v4456_v35, %v4456_v35  ;;  %1902 = vmatpush.msrb.mxu3 %v1700_v33 }
  0xe3   : > { %1112 = vadd.xlane.f32.xlu2 %v1111_v38  ;;  %v1207_v41 = vadd.f32 %v1172_v40, %v1171_v39 }
  0xe4   : > { %v961_v42 = vpop.f32.mrf.mxu2  ;;  %v1026_v43 = vpop.f32.mrf.mxu3 }
  0xe5   : > { %v962_v46 = vadd.f32 %v961_v42, %v775_v36  ;;  %v1027_v47 = vadd.f32 %v1026_v43, %v840_v37  ;;  %1208 = vadd.xlane.f32.xlu0 %v1207_v41  ;;  %v1667_v36 = vld [vmem:[%s6250_s7 + $0xf0] sm:$0xff] }
  0xe6   : > { %1707 = vmatpush.msrb.mxu0 %v1667_v36 }
  0xe7   : > { %v4465_v48 = vadd.f32 %v4400_v44, %v962_v46  ;;  %v4468_v49 = vadd.f32 %v4402_v45, %v1027_v47  ;;  %v778_v52 = vpop.f32.mrf.mxu0  ;;  %v843_v53 = vpop.f32.mrf.mxu1 }
  0xe9   : > { %v1114_v54 = vadd.f32 %v4468_v49, %v4465_v48  ;;  %v1173_v55 = vmul.f32 %v4465_v48, %v4465_v48  ;;  %v1174_v56 = vmul.f32 %v4468_v49, %v4468_v49 }
  0xeb   : > { %1115 = vadd.xlane.f32.xlu1 %v1114_v54  ;;  %v1210_v57 = vadd.f32 %v1174_v56, %v1173_v55  ;;  %v1699_v55 = vld [vmem:[%s6250_s7 + $0x1f0] sm:$0xff]  ;;  %v1666_v56 = vld [vmem:[%s6250_s7 + $0xe8] sm:$0xff] }
  0xec   : > { %v964_v58 = vpop.f32.mrf.mxu2  ;;  %v1029_v59 = vpop.f32.mrf.mxu3  ;;  %1772 = vmatpush.msrb.mxu1 %v1699_v55  ;;  %1838 = vmatpush.msrb.mxu2 %v1666_v56 }
  0xed   : > { %v965_v60 = vadd.f32 %v964_v58, %v778_v52  ;;  %v1030_v63 = vadd.f32 %v1029_v59, %v843_v53  ;;  %1211 = vadd.xlane.f32.xlu2 %v1210_v57  ;;  %v1698_v57 = vld [vmem:[%s6250_s7 + $0x1e8] sm:$0xff]  ;;  %v1665_v58 = vld [vmem:[%s6250_s7 + $0xe0] sm:$0xff] }
  0xee   : > { %1903 = vmatpush.msrb.mxu3 %v1698_v57  ;;  %1708 = vmatpush.msrb.mxu0 %v1665_v58 }
  0xef   : > { %v4477_v0 = vadd.f32 %v4400_v44, %v965_v60  ;;  %v4480_v1 = vadd.f32 %v4402_v45, %v1030_v63  ;;  %v781_v2 = vpop.f32.mrf.mxu0  ;;  %v846_v3 = vpop.f32.mrf.mxu1 }
  0xf1   : > { %v1117_v4 = vadd.f32 %v4480_v1, %v4477_v0  ;;  %v1175_v5 = vmul.f32 %v4477_v0, %v4477_v0  ;;  %v1176_v6 = vmul.f32 %v4480_v1, %v4480_v1 }
  0xf3   : > { %1118 = vadd.xlane.f32.xlu0 %v1117_v4  ;;  %v1213_v7 = vadd.f32 %v1176_v6, %v1175_v5 }
  0xf4   : > { %v967_v8 = vpop.f32.mrf.mxu2  ;;  %v1032_v11 = vpop.f32.mrf.mxu3 }
  0xf5   : > { %v968_v12 = vadd.f32 %v967_v8, %v781_v2  ;;  %v1033_v13 = vadd.f32 %v1032_v11, %v846_v3  ;;  %1214 = vadd.xlane.f32.xlu1 %v1213_v7 }
  0xf7   : > { %v4489_v14 = vadd.f32 %v4400_v44, %v968_v12  ;;  %v4492_v15 = vadd.f32 %v4402_v45, %v1033_v13  ;;  %v784_v16 = vpop.f32.mrf.mxu0  ;;  %v849_v17 = vpop.f32.mrf.mxu1  ;;  %v1697_v13 = vld [vmem:[%s6250_s7 + $0x1e0] sm:$0xff] }
  0xf8   : > { %1773 = vmatpush.msrb.mxu1 %v1697_v13 }
  0xf9   : > { %v1120_v18 = vadd.f32 %v4492_v15, %v4489_v14  ;;  %v1177_v19 = vmul.f32 %v4489_v14, %v4489_v14  ;;  %v1178_v20 = vmul.f32 %v4492_v15, %v4492_v15 }
  0xfb   : > { %1121 = vadd.xlane.f32.xlu2 %v1120_v18  ;;  %v1216_v23 = vadd.f32 %v1178_v20, %v1177_v19  ;;  %v1663_v18 = vld [vmem:[%s6250_s7 + $0xd0] sm:$0xff] }
  0xfc   : > { %v970_v24 = vpop.f32.mrf.mxu2  ;;  %v1035_v25 = vpop.f32.mrf.mxu3  ;;  %1709 = vmatpush.msrb.mxu0 %v1663_v18 }
  0xfd   : > { %v971_v26 = vadd.f32 %v970_v24, %v784_v16  ;;  %v1036_v27 = vadd.f32 %v1035_v25, %v849_v17  ;;  %1217 = vadd.xlane.f32.xlu0 %v1216_v23  ;;  %v1664_v16 = vld [vmem:[%s6250_s7 + $0xd8] sm:$0xff] }
  0xfe   : > { %v1696_v17 = vld [vmem:[%s6250_s7 + $0x1d8] sm:$0xff]  ;;  %1839 = vmatpush.msrb.mxu2 %v1664_v16 }
  0xff   : > { %v4501_v28 = vadd.f32 %v4400_v44, %v971_v26  ;;  %v4504_v29 = vadd.f32 %v4402_v45, %v1036_v27  ;;  %v787_v30 = vpop.f32.mrf.mxu0  ;;  %v852_v31 = vpop.f32.mrf.mxu1  ;;  %1904 = vmatpush.msrb.mxu3 %v1696_v17 }
 0x101   : > { %v1123_v37 = vadd.f32 %v4504_v29, %v4501_v28  ;;  %v1179_v38 = vmul.f32 %v4501_v28, %v4501_v28  ;;  %v1180_v39 = vmul.f32 %v4504_v29, %v4504_v29 }
 0x103   : > { %1124 = vadd.xlane.f32.xlu1 %v1123_v37  ;;  %v1219_v40 = vadd.f32 %v1180_v39, %v1179_v38  ;;  %v1695_v37 = vld [vmem:[%s6250_s7 + $0x1d0] sm:$0xff]  ;;  %v1662_v38 = vld [vmem:[%s6250_s7 + $0xc8] sm:$0xff] }
 0x104   : > { %v973_v41 = vpop.f32.mrf.mxu2  ;;  %v1038_v42 = vpop.f32.mrf.mxu3  ;;  %v1694_v39 = vld [vmem:[%s6250_s7 + $0x1c8] sm:$0xff]  ;;  %1774 = vmatpush.msrb.mxu1 %v1695_v37  ;;  %1840 = vmatpush.msrb.mxu2 %v1662_v38  ;;  %v1657_v37 = vld [vmem:[%s6250_s7 + $0xa0] sm:$0xff] }
 0x105   : > { %v974_v43 = vadd.f32 %v973_v41, %v787_v30  ;;  %v1039_v46 = vadd.f32 %v1038_v42, %v852_v31  ;;  %1220 = vadd.xlane.f32.xlu2 %v1219_v40  ;;  %1905 = vmatpush.msrb.mxu3 %v1694_v39  ;;  %v1689_v39 = vld [vmem:[%s6250_s7 + $0x1a0] sm:$0xff] }
 0x107   : > { %v4522_v47 = vadd.f32 %v4400_v44, %v974_v43  ;;  %v4525_v52 = vadd.f32 %v4402_v45, %v1039_v46  ;;  %v790_v53 = vpop.f32.mrf.mxu0  ;;  %v855_v54 = vpop.f32.mrf.mxu1  ;;  %v1661_v43 = vld [vmem:[%s6250_s7 + $0xc0] sm:$0xff] }
 0x108   : > { %1710 = vmatpush.msrb.mxu0 %v1661_v43  ;;  %v1687_v43 = vld [vmem:[%s6250_s7 + $0x190] sm:$0xff] }
 0x109   : > { %v1126_v59 = vadd.f32 %v4525_v52, %v4522_v47  ;;  %v1181_v60 = vmul.f32 %v4522_v47, %v4522_v47  ;;  %v1182_v63 = vmul.f32 %v4525_v52, %v4525_v52 }
 0x10b   : > { %1127 = vadd.xlane.f32.xlu0 %v1126_v59  ;;  %v1222_v2 = vadd.f32 %v1182_v63, %v1181_v60  ;;  %v1692_v59 = vld [vmem:[%s6250_s7 + $0x1b8] sm:$0xff] }
 0x10c   : > { %v976_v3 = vpop.f32.mrf.mxu2  ;;  %v1041_v4 = vpop.f32.mrf.mxu3  ;;  %1906 = vmatpush.msrb.mxu3 %v1692_v59 }
 0x10d   : > { %v977_v5 = vadd.f32 %v976_v3, %v790_v53  ;;  %v1042_v6 = vadd.f32 %v1041_v4, %v855_v54  ;;  %1223 = vadd.xlane.f32.xlu1 %v1222_v2  ;;  %v1693_v53 = vld [vmem:[%s6250_s7 + $0x1c0] sm:$0xff]  ;;  %v1660_v54 = vld [vmem:[%s6250_s7 + $0xb8] sm:$0xff] }
 0x10e   : > { %1775 = vmatpush.msrb.mxu1 %v1693_v53  ;;  %1841 = vmatpush.msrb.mxu2 %v1660_v54 }
 0x10f   : > { %v4546_v7 = vadd.f32 %v4400_v44, %v977_v5  ;;  %v4549_v8 = vadd.f32 %v4402_v45, %v1042_v6  ;;  %v793_v11 = vpop.f32.mrf.mxu0  ;;  %v858_v12 = vpop.f32.mrf.mxu1 }
 0x111   : > { %v1129_v19 = vadd.f32 %v4549_v8, %v4546_v7  ;;  %v1183_v20 = vmul.f32 %v4546_v7, %v4546_v7  ;;  %v1184_v23 = vmul.f32 %v4549_v8, %v4549_v8 }
 0x113   : > { %1130 = vadd.xlane.f32.xlu2 %v1129_v19  ;;  %v1225_v24 = vadd.f32 %v1184_v23, %v1183_v20 }
 0x114   : > { %v979_v25 = vpop.f32.mrf.mxu2  ;;  %v1044_v26 = vpop.f32.mrf.mxu3 }
 0x115   : > { %v980_v27 = vadd.f32 %v979_v25, %v793_v11  ;;  %v1045_v30 = vadd.f32 %v1044_v26, %v858_v12  ;;  %1226 = vadd.xlane.f32.xlu0 %v1225_v24  ;;  %v1659_v24 = vld [vmem:[%s6250_s7 + $0xb0] sm:$0xff] }
 0x116   : > { %v1691_v25 = vld [vmem:[%s6250_s7 + $0x1b0] sm:$0xff]  ;;  %1711 = vmatpush.msrb.mxu0 %v1659_v24  ;;  %v1681_v24 = vld [vmem:[%s6250_s7 + $0x160] sm:$0xff] }
 0x117   : > { %v4570_v31 = vadd.f32 %v4400_v44, %v980_v27  ;;  %v4573_v32 = vadd.f32 %v4402_v45, %v1045_v30  ;;  %v796_v33 = vpop.f32.mrf.mxu0  ;;  %v861_v36 = vpop.f32.mrf.mxu1  ;;  %1776 = vmatpush.msrb.mxu1 %v1691_v25 }
 0x118   : > { %1712 = vmatpush.msrb.mxu0 %v1657_v37  ;;  %v1679_v37 = vld [vmem:[%s6250_s7 + $0x150] sm:$0xff] }
 0x119   : > { %v1132_v40 = vadd.f32 %v4573_v32, %v4570_v31  ;;  %v1185_v41 = vmul.f32 %v4570_v31, %v4570_v31  ;;  %v1186_v42 = vmul.f32 %v4573_v32, %v4573_v32  ;;  %1777 = vmatpush.msrb.mxu1 %v1689_v39 }
 0x11b   : > { %1133 = vadd.xlane.f32.xlu1 %v1132_v40  ;;  %v1228_v46 = vadd.f32 %v1186_v42, %v1185_v41  ;;  %v1655_v42 = vld [vmem:[%s6250_s7 + $0x90] sm:$0xff]  ;;  %1778 = vmatpush.msrb.mxu1 %v1687_v43  ;;  %v1645_v43 = vld [vmem:[%s6250_s7 + $0x40] sm:$0xff] }
 0x11c   : > { %v982_v55 = vpop.f32.mrf.mxu2  ;;  %v1047_v56 = vpop.f32.mrf.mxu3  ;;  %1713 = vmatpush.msrb.mxu0 %v1655_v42 }
 0x11d   : > { %v983_v57 = vadd.f32 %v982_v55, %v796_v33  ;;  %v1048_v58 = vadd.f32 %v1047_v56, %v861_v36  ;;  %1229 = vadd.xlane.f32.xlu2 %v1228_v46  ;;  %v1658_v33 = vld [vmem:[%s6250_s7 + $0xa8] sm:$0xff]  ;;  %v1656_v46 = vld [vmem:[%s6250_s7 + $0x98] sm:$0xff]  ;;  %v1653_v56 = vld [vmem:[%s6250_s7 + $0x80] sm:$0xff] }
 0x11e   : > { %v1690_v36 = vld [vmem:[%s6250_s7 + $0x1a8] sm:$0xff]  ;;  %1842 = vmatpush.msrb.mxu2 %v1658_v33  ;;  %v1688_v55 = vld [vmem:[%s6250_s7 + $0x198] sm:$0xff]  ;;  %1714 = vmatpush.msrb.mxu0 %v1653_v56 }
 0x11f   : > { %v4603_v60 = vadd.f32 %v4400_v44, %v983_v57  ;;  %v4606_v63 = vadd.f32 %v4402_v45, %v1048_v58  ;;  %v799_v2 = vpop.f32.mrf.mxu0  ;;  %v864_v3 = vpop.f32.mrf.mxu1  ;;  %1907 = vmatpush.msrb.mxu3 %v1690_v36  ;;  %v1685_v57 = vld [vmem:[%s6250_s7 + $0x180] sm:$0xff]  ;;  %v1654_v58 = vld [vmem:[%s6250_s7 + $0x88] sm:$0xff]  ;;  %v1647_v36 = vld [vmem:[%s6250_s7 + $0x50] sm:$0xff] }
 0x120   : > { %1843 = vmatpush.msrb.mxu2 %v1656_v46  ;;  %1779 = vmatpush.msrb.mxu1 %v1685_v57  ;;  %v1643_v57 = vld [vmem:[%s6250_s7 + $0x30] sm:$0xff] }
 0x121   : > { %v1135_v4 = vadd.f32 %v4606_v63, %v4603_v60  ;;  %v1187_v5 = vmul.f32 %v4603_v60, %v4603_v60  ;;  %v1188_v6 = vmul.f32 %v4606_v63, %v4606_v63  ;;  %1908 = vmatpush.msrb.mxu3 %v1688_v55  ;;  %v1646_v55 = vld [vmem:[%s6250_s7 + $0x48] sm:$0xff] }
 0x122   : > { %1844 = vmatpush.msrb.mxu2 %v1654_v58  ;;  %v1675_v58 = vld [vmem:[%s6250_s7 + $0x130] sm:$0xff] }
 0x123   : > { %1136 = vadd.xlane.f32.xlu0 %v1135_v4  ;;  %v1231_v11 = vadd.f32 %v1188_v6, %v1187_v5  ;;  %v1651_v4 = vld [vmem:[%s6250_s7 + $0x70] sm:$0xff]  ;;  %v1652_v6 = vld [vmem:[%s6250_s7 + $0x78] sm:$0xff] }
 0x124   : > { %v985_v12 = vpop.f32.mrf.mxu2  ;;  %v1050_v13 = vpop.f32.mrf.mxu3  ;;  %v1683_v5 = vld [vmem:[%s6250_s7 + $0x170] sm:$0xff]  ;;  %1715 = vmatpush.msrb.mxu0 %v1651_v4  ;;  %1845 = vmatpush.msrb.mxu2 %v1652_v6  ;;  %v1644_v4 = vld [vmem:[%s6250_s7 + $0x38] sm:$0xff] }
 0x125   : > { %v986_v16 = vadd.f32 %v985_v12, %v799_v2  ;;  %v1051_v17 = vadd.f32 %v1050_v13, %v864_v3  ;;  %1232 = vadd.xlane.f32.xlu1 %v1231_v11  ;;  %v1686_v3 = vld [vmem:[%s6250_s7 + $0x188] sm:$0xff]  ;;  %1780 = vmatpush.msrb.mxu1 %v1683_v5  ;;  %v1676_v5 = vld [vmem:[%s6250_s7 + $0x138] sm:$0xff] }
 0x126   : > { %1909 = vmatpush.msrb.mxu3 %v1686_v3 }
 0x127   : > { %v4615_v18 = vadd.f32 %v4400_v44, %v986_v16  ;;  %v4618_v19 = vadd.f32 %v4402_v45, %v1051_v17  ;;  %v802_v20 = vpop.f32.mrf.mxu0  ;;  %v867_v23 = vpop.f32.mrf.mxu1  ;;  %v1684_v16 = vld [vmem:[%s6250_s7 + $0x178] sm:$0xff]  ;;  %1781 = vmatpush.msrb.mxu1 %v1681_v24 }
 0x128   : > { %1910 = vmatpush.msrb.mxu3 %v1684_v16  ;;  %v1642_v16 = vld [vmem:[%s6250_s7 + $0x28] sm:$0xff] }
 0x129   : > { %v1138_v26 = vadd.f32 %v4618_v19, %v4615_v18  ;;  %v1189_v27 = vmul.f32 %v4615_v18, %v4615_v18  ;;  %v1190_v30 = vmul.f32 %v4618_v19, %v4618_v19  ;;  %1782 = vmatpush.msrb.mxu1 %v1679_v37  ;;  %v1669_v37 = vld [vmem:[%s6250_s7 + $0x100] sm:$0xff] }
 0x12b   : > { %1139 = vadd.xlane.f32.xlu2 %v1138_v26  ;;  %v1234_v38 = vadd.f32 %v1190_v30, %v1189_v27  ;;  %v1650_v26 = vld [vmem:[%s6250_s7 + $0x68] sm:$0xff] }
 0x12c   : > { %v988_v40 = vpop.f32.mrf.mxu2  ;;  %v1053_v41 = vpop.f32.mrf.mxu3  ;;  %v1682_v27 = vld [vmem:[%s6250_s7 + $0x168] sm:$0xff]  ;;  %1846 = vmatpush.msrb.mxu2 %v1650_v26 }
 0x12d   : > { %v989_v53 = vadd.f32 %v988_v40, %v802_v20  ;;  %v1054_v54 = vadd.f32 %v1053_v41, %v867_v23  ;;  %1235 = vadd.xlane.f32.xlu0 %v1234_v38  ;;  %v1649_v23 = vld [vmem:[%s6250_s7 + $0x60] sm:$0xff]  ;;  %v1648_v40 = vld [vmem:[%s6250_s7 + $0x58] sm:$0xff]  ;;  %1911 = vmatpush.msrb.mxu3 %v1682_v27 }
 0x12e   : > { %1716 = vmatpush.msrb.mxu0 %v1649_v23  ;;  %v1680_v41 = vld [vmem:[%s6250_s7 + $0x158] sm:$0xff]  ;;  %1847 = vmatpush.msrb.mxu2 %v1648_v40  ;;  %v1670_v40 = vld [vmem:[%s6250_s7 + $0x108] sm:$0xff] }
 0x12f   : > { %v4666_v59 = vadd.f32 %v4400_v44, %v989_v53  ;;  %v4669_v2 = vadd.f32 %v4402_v45, %v1054_v54  ;;  %v805_v17 = vpop.f32.mrf.mxu0  ;;  %v870_v20 = vpop.f32.mrf.mxu1  ;;  %v1677_v54 = vld [vmem:[%s6250_s7 + $0x140] sm:$0xff]  ;;  %1912 = vmatpush.msrb.mxu3 %v1680_v41 }
 0x130   : > { %1717 = vmatpush.msrb.mxu0 %v1647_v36  ;;  %1783 = vmatpush.msrb.mxu1 %v1677_v54  ;;  %v1637_v36 = vld [vmem:[%s6250_s7] sm:$0xff] }
 0x131   : > { %v1141_v11 = vadd.f32 %v4669_v2, %v4666_v59  ;;  %v1191_v12 = vmul.f32 %v4666_v59, %v4666_v59  ;;  %v1192_v13 = vmul.f32 %v4669_v2, %v4669_v2  ;;  %1848 = vmatpush.msrb.mxu2 %v1646_v55 }
 0x132   : > { %1718 = vmatpush.msrb.mxu0 %v1645_v43  ;;  %1784 = vmatpush.msrb.mxu1 %v1675_v58 }
 0x133   : > { %1142 = vadd.xlane.f32.xlu1 %v1141_v11  ;;  %v1237_v25 = vadd.f32 %v1192_v13, %v1191_v12  ;;  %v1641_v11 = vld [vmem:[%s6250_s7 + $0x20] sm:$0xff]  ;;  %1849 = vmatpush.msrb.mxu2 %v1644_v4 }
 0x134   : > { %v991_v30 = vpop.f32.mrf.mxu2  ;;  %v1056_v33 = vpop.f32.mrf.mxu3  ;;  %1719 = vmatpush.msrb.mxu0 %v1643_v57  ;;  %v1673_v13 = vld [vmem:[%s6250_s7 + $0x120] sm:$0xff] }
 0x135   : > { %v992_v38 = vadd.f32 %v991_v30, %v805_v17  ;;  %v1057_v39 = vadd.f32 %v1056_v33, %v870_v20  ;;  %1238 = vadd.xlane.f32.xlu2 %v1237_v25  ;;  %v1674_v17 = vld [vmem:[%s6250_s7 + $0x128] sm:$0xff]  ;;  %v1639_v20 = vld [vmem:[%s6250_s7 + $0x10] sm:$0xff]  ;;  %1785 = vmatpush.msrb.mxu1 %v1673_v13  ;;  %v1640_v30 = vld [vmem:[%s6250_s7 + $0x18] sm:$0xff] }
 0x136   : > { %v1101_v42 = vpop.xlane.xlu0 %1100  ;;  %1720 = vmatpush.msrb.mxu0 %v1641_v11  ;;  %v1671_v25 = vld [vmem:[%s6250_s7 + $0x110] sm:$0xff]  ;;  %1850 = vmatpush.msrb.mxu2 %v1642_v16  ;;  %v1672_v33 = vld [vmem:[%s6250_s7 + $0x118] sm:$0xff] }
 0x137   : > { %v4720_v46 = vadd.f32 %v4400_v44, %v992_v38  ;;  %v4723_v53 = vadd.f32 %v4402_v45, %v1057_v39  ;;  %v1678_v44 = vld [vmem:[%s6250_s7 + $0x148] sm:$0xff]  ;;  %v4752_v6 = vmul.f32 0.00390625, %v1101_v42  ;;  %1786 = vmatpush.msrb.mxu1 %v1671_v25 }
 0x138   : > { %1913 = vmatpush.msrb.mxu3 %v1678_v44  ;;  %1721 = vmatpush.msrb.mxu0 %v1639_v20  ;;  %v1638_v39 = vld [vmem:[%s6250_s7 + $0x8] sm:$0xff] }
 0x139   : > { %v1144_v45 = vadd.f32 %v4723_v53, %v4720_v46  ;;  %v1193_v56 = vmul.f32 %v4720_v46, %v4720_v46  ;;  %v1194_v3 = vmul.f32 %v4723_v53, %v4723_v53  ;;  %v1259_v26 = vmul.f32 %v4752_v6, %v4752_v6  ;;  %1851 = vmatpush.msrb.mxu2 %v1640_v30 }
 0x13a   : > { %1914 = vmatpush.msrb.mxu3 %v1676_v5  ;;  %1722 = vmatpush.msrb.mxu0 %v1637_v36 }
 0x13b   : > { %1145 = vadd.xlane.f32.xlu0 %v1144_v45  ;;  %v1240_v12 = vadd.f32 %v1194_v3, %v1193_v56  ;;  %1787 = vmatpush.msrb.mxu1 %v1669_v37 }
 0x13c   : > { %1915 = vmatpush.msrb.mxu3 %v1674_v17  ;;  %1852 = vmatpush.msrb.mxu2 %v1638_v39  ;;  %v1467_v39 = vsub.f32 %v4405_v50, %v4752_v6 }
 0x13d   : > { %1241 = vadd.xlane.f32.xlu1 %v1240_v12 }
 0x13e   : > { %v1104_v23 = vpop.xlane.xlu1 %1103  ;;  %v1197_v24 = vpop.xlane.xlu0 %1196  ;;  %1916 = vmatpush.msrb.mxu3 %v1672_v33 }
 0x13f   : > { %v1243_v27 = vmul.f32 0.00390625, %v1197_v24  ;;  %v4792_v41 = vmul.f32 0.00390625, %v1104_v23 }
 0x140   : > { %1917 = vmatpush.msrb.mxu3 %v1670_v40  ;;  %v1468_v40 = vsub.f32 %v4408_v51, %v4752_v6 }
 0x141   : > { %v1275_v38 = vsub.f32 %v1243_v27, %v1259_v26  ;;  %v1260_v55 = vmul.f32 %v4792_v41, %v4792_v41  ;;  %v1097_v27 = vld [vmem:[%s6248_s5] sm:$0x3] }
 0x143   : > { %v1291_v42 = vadd.f32 1e-05, %v1275_v38 }
 0x145   : > { %3743 = vrsqrt.f32 %v1291_v42  ;;  %vm1313_vm5 = vweird.f32 %v1291_v42 }
 0x146   : > { %v1107_v43 = vpop.xlane.xlu2 %1106  ;;  %v1200_v54 = vpop.xlane.xlu1 %1199 }
 0x147   : > { %v1244_v44 = vmul.f32 0.00390625, %v1200_v54  ;;  %v4796_v57 = vmul.f32 0.00390625, %v1107_v43  ;;  %v1098_v43 = vld [vmem:[%s6249_s6] sm:$0x3]  ;;  %v4821_v54 = vperm.slane %v1097_v27, 0 }
 0x149   : > { %v1276_v45 = vsub.f32 %v1244_v44, %v1260_v55  ;;  %v1261_v12 = vmul.f32 %v4796_v57, %v4796_v57 }
 0x14b   : > { %v3744_v56 = vpop.eup %3743  ;;  %v4798_v58 = vadd.f32 1e-05, %v1276_v45 }
 0x14c   : > { %v1308_v3 = vmul.f32 %v3744_v56, %v1291_v42  ;;  %vm1314_vm4 = vweird.f32 %v3744_v56 }
 0x14d   : > { %3745 = vrsqrt.f32 %v4798_v58  ;;  %vm1315_vm6 = vmor %vm1313_vm5, %vm1314_vm4  ;;  %vm1323_vm8 = vweird.f32 %v4798_v58 }
 0x14e   : > { %v1309_v4 = vmul.f32 %v3744_v56, %v1308_v3  ;;  %v1203_v5 = vpop.xlane.xlu2 %1202  ;;  %v1110_v11 = vpop.xlane.xlu0 %1109  ;;  %v4825_v3 = vperm.slane %v1097_v27, 1 }
 0x14f   : > { %v1245_v13 = vmul.f32 0.00390625, %v1203_v5  ;;  %v4803_v16 = vmul.f32 0.00390625, %v1110_v11  ;;  %v4830_v11 = vperm.slane %v1098_v43, 0 }
 0x150   : > { %v1310_v17 = vmul.f32 0.5, %v1309_v4  ;;  %v1206_v20 = vpop.xlane.xlu1 %1205 }
 0x151   : > { %v1277_v23 = vsub.f32 %v1245_v13, %v1261_v12  ;;  %v1246_v24 = vmul.f32 0.00390625, %v1206_v20  ;;  %v1262_v26 = vmul.f32 %v4803_v16, %v4803_v16  ;;  %v4832_v12 = vperm.slane %v1098_v43, 1 }
 0x152   : > { %v1311_v25 = vsub.f32 1.5, %v1310_v17 }
 0x153   : > { %v3746_v30 = vpop.eup %3745  ;;  %v4810_v33 = vadd.f32 1e-05, %v1277_v23  ;;  %v1278_v38 = vsub.f32 %v1246_v24, %v1262_v26 }
 0x154   : > { %v1312_v36 = vmul.f32 %v3744_v56, %v1311_v25  ;;  %v1318_v37 = vmul.f32 %v3746_v30, %v4798_v58  ;;  %vm1324_vm7 = vweird.f32 %v3746_v30 }
 0x155   : > { %3747 = vrsqrt.f32 %v4810_v33  ;;  %v4823_v42 = vadd.f32 1e-05, %v1278_v38  ;;  %vm1325_vm9 = vmor %vm1323_vm8, %vm1324_vm7  ;;  %vm1333_vm11 = vweird.f32 %v4810_v33 }
 0x156   : > { %v1319_v55 = vmul.f32 %v3746_v30, %v1318_v37  ;;  %v1113_v44 = vpop.xlane.xlu2 %1112  ;;  %v1316_v45 = vsel %vm1315_vm6, %v3744_v56, %v1312_v36 }
 0x157   : > { %v4827_v50 = vmul.f32 0.00390625, %v1113_v44  ;;  %v1499_v4 = vmul.f32 %v1467_v39, %v1316_v45  ;;  %v1500_v51 = vmul.f32 %v1468_v40, %v1316_v45  ;;  %3749 = vrsqrt.f32 %v4823_v42 }
 0x158   : > { %v1320_v6 = vmul.f32 0.5, %v1319_v55  ;;  %v1209_v5 = vpop.xlane.xlu0 %1208  ;;  %v1469_v45 = vsub.f32 %v4417_v61, %v4792_v41  ;;  %vm1343_vm13 = vweird.f32 %v4823_v42 }
 0x159   : > { %v1263_v13 = vmul.f32 %v4827_v50, %v4827_v50  ;;  %v1247_v17 = vmul.f32 0.00390625, %v1209_v5  ;;  %v1536_v56 = vmul.f32 %v4821_v54, %v1499_v4  ;;  %v1537_v23 = vmul.f32 %v4825_v3, %v1500_v51 }
 0x15a   : > { %v1321_v20 = vsub.f32 1.5, %v1320_v6  ;;  %v1470_v4 = vsub.f32 %v4420_v62, %v4792_v41 }
 0x15b   : > { %v3748_v24 = vpop.eup %3747  ;;  %v1279_v25 = vsub.f32 %v1247_v17, %v1263_v13  ;;  %v1573_v27 = vadd.f32 %v4830_v11, %v1536_v56  ;;  %v1574_v36 = vadd.f32 %v4832_v12, %v1537_v23 }
 0x15c   : > { %v1328_v26 = vmul.f32 %v3748_v24, %v4810_v33  ;;  %v1322_v38 = vmul.f32 %v3746_v30, %v1321_v20  ;;  %vm1334_vm10 = vweird.f32 %v3748_v24 }
 0x15d   : > { %v4841_v37 = vadd.f32 1e-05, %v1279_v25  ;;  %v4843_v39 = vpop.eup %3749  ;;  %v1605_v55 = vmax.f32 %v1573_v27, 0.0  ;;  %v1606_v44 = vmax.f32 %v1574_v36, 0.0  ;;  %vm1335_vm12 = vmor %vm1333_vm11, %vm1334_vm10 }
 0x15e   : > { %v1329_v40 = vmul.f32 %v3748_v24, %v1328_v26  ;;  %v1116_v43 = vpop.xlane.xlu1 %1115  ;;  %v1338_v51 = vmul.f32 %v4843_v39, %v4823_v42  ;;  %v1326_v13 = vsel %vm1325_vm9, %v3746_v30, %v1322_v38  ;;  %v1471_v30 = vsub.f32 %v4429_v9, %v4796_v57 }
 0x15f   : > { %3751 = vrsqrt.f32 %v4841_v37  ;;  %v4853_v5 = vmul.f32 0.00390625, %v1116_v43  ;;  %1723 = vmatmul.f32.vlgmr.msrb.gmra.mxu0 %v1605_v55  ;;  %1788 = vmatmul.f32.vlgmr.msrb.gmra.mxu1 %v1606_v44  ;;  %v1501_v20 = vmul.f32 %v1469_v45, %v1326_v13  ;;  %v1502_v62 = vmul.f32 %v1470_v4, %v1326_v13 }
 0x160   : > { %v1330_v6 = vmul.f32 0.5, %v1329_v40  ;;  %v1212_v58 = vpop.xlane.xlu2 %1211  ;;  %v1339_v17 = vmul.f32 %v4843_v39, %v1338_v51  ;;  %1853 = vmatmul.f32.vlgmr.msrb.gmra.mxu2 %v1605_v55  ;;  %1918 = vmatmul.f32.vlgmr.msrb.gmra.mxu3 %v1606_v44  ;;  %v1472_v40 = vsub.f32 %v4432_v10, %v4796_v57  ;;  %vm1344_vm14 = vweird.f32 %v4843_v39 }
 0x161   : > { %v1248_v61 = vmul.f32 0.00390625, %v1212_v58  ;;  %v1264_v56 = vmul.f32 %v4853_v5, %v4853_v5  ;;  %v1538_v25 = vmul.f32 %v4821_v54, %v1501_v20  ;;  %v1539_v26 = vmul.f32 %v4825_v3, %v1502_v62  ;;  %vm1345_vm15 = vmor %vm1343_vm13, %vm1344_vm14 }
 0x162   : > { %v1331_v41 = vsub.f32 1.5, %v1330_v6  ;;  %v1340_v23 = vmul.f32 0.5, %v1339_v17  ;;  %vm1353_vm0 = vweird.f32 %v4841_v37 }
 0x163   : > { %v1280_v27 = vsub.f32 %v1248_v61, %v1264_v56  ;;  %v1575_v43 = vadd.f32 %v4830_v11, %v1538_v25  ;;  %v1576_v55 = vadd.f32 %v4832_v12, %v1539_v26  ;;  %v1473_v61 = vsub.f32 %v4441_v21, %v4803_v16 }
 0x164   : > { %v1332_v36 = vmul.f32 %v3748_v24, %v1331_v41  ;;  %v1341_v44 = vsub.f32 1.5, %v1340_v23  ;;  %v1474_v25 = vsub.f32 %v4444_v22, %v4803_v16 }
 0x165   : > { %v3752_v38 = vpop.eup %3751  ;;  %v4869_v4 = vadd.f32 1e-05, %v1280_v27  ;;  %v1607_v6 = vmax.f32 %v1575_v43, 0.0  ;;  %v1608_v58 = vmax.f32 %v1576_v55, 0.0 }
 0x166   : > { %v1348_v45 = vmul.f32 %v3752_v38, %v4841_v37  ;;  %v1119_v9 = vpop.xlane.xlu0 %1118  ;;  %v1336_v33 = vsel %vm1335_vm12, %v3748_v24, %v1332_v36  ;;  %v1342_v23 = vmul.f32 %v4843_v39, %v1341_v44  ;;  %vm1354_vm1 = vweird.f32 %v3752_v38 }
 0x167   : > { %v4871_v51 = vmul.f32 0.00390625, %v1119_v9  ;;  %v1503_v13 = vmul.f32 %v1471_v30, %v1336_v33  ;;  %3753 = vrsqrt.f32 %v4869_v4  ;;  %v1504_v17 = vmul.f32 %v1472_v40, %v1336_v33  ;;  %1726 = vmatmul.f32.gmra.mxu0 %v1607_v6  ;;  %1791 = vmatmul.f32.gmra.mxu1 %v1608_v58  ;;  %vm1355_vm2 = vmor %vm1353_vm0, %vm1354_vm1 }
 0x168   : > { %v1349_v10 = vmul.f32 %v3752_v38, %v1348_v45  ;;  %v1215_v57 = vpop.xlane.xlu1 %1214  ;;  %1856 = vmatmul.f32.gmra.mxu2 %v1607_v6  ;;  %1921 = vmatmul.f32.gmra.mxu3 %v1608_v58  ;;  %v1346_v36 = vsel %vm1345_vm15, %v4843_v39, %v1342_v23  ;;  %v1475_v9 = vsub.f32 %v4453_v34, %v4827_v50  ;;  %vm1363_vm3 = vweird.f32 %v4869_v4 }
 0x169   : > { %v1249_v20 = vmul.f32 0.00390625, %v1215_v57  ;;  %v1265_v24 = vmul.f32 %v4871_v51, %v4871_v51  ;;  %v1540_v41 = vmul.f32 %v4821_v54, %v1503_v13  ;;  %v1541_v56 = vmul.f32 %v4825_v3, %v1504_v17 }
 0x16a   : > { %v1350_v62 = vmul.f32 0.5, %v1349_v10  ;;  %v1505_v43 = vmul.f32 %v1473_v61, %v1346_v36  ;;  %v1506_v22 = vmul.f32 %v1474_v25, %v1346_v36  ;;  %v1476_v33 = vsub.f32 %v4456_v35, %v4827_v50 }
 0x16b   : > { %v1281_v21 = vsub.f32 %v1249_v20, %v1265_v24  ;;  %v1577_v30 = vadd.f32 %v4830_v11, %v1540_v41  ;;  %v1578_v27 = vadd.f32 %v4832_v12, %v1541_v56 }
 0x16c   : > { %v1351_v26 = vsub.f32 1.5, %v1350_v62  ;;  %v1542_v13 = vmul.f32 %v4821_v54, %v1505_v43  ;;  %v1543_v10 = vmul.f32 %v4825_v3, %v1506_v22 }
 0x16d   : > { %v4892_v40 = vadd.f32 1e-05, %v1281_v21  ;;  %v3754_v16 = vpop.eup %3753  ;;  %v1609_v44 = vmax.f32 %v1577_v30, 0.0  ;;  %v1610_v42 = vmax.f32 %v1578_v27, 0.0 }
 0x16e   : > { %v1122_v55 = vpop.xlane.xlu2 %1121  ;;  %v1352_v45 = vmul.f32 %v3752_v38, %v1351_v26  ;;  %v1358_v39 = vmul.f32 %v3754_v16, %v4869_v4  ;;  %v1579_v20 = vadd.f32 %v4830_v11, %v1542_v13  ;;  %v1580_v24 = vadd.f32 %v4832_v12, %v1543_v10 }
 0x16f   : > { %3755 = vrsqrt.f32 %v4892_v40  ;;  %v4903_v6 = vmul.f32 0.00390625, %v1122_v55  ;;  %1729 = vmatmul.f32.gmra.mxu0 %v1609_v44  ;;  %1794 = vmatmul.f32.gmra.mxu1 %v1610_v42  ;;  %vm1364_vm4 = vweird.f32 %v3754_v16  ;;  %vm1373_vm6 = vweird.f32 %v4892_v40 }
 0x170   : > { %v1218_v58 = vpop.xlane.xlu0 %1217  ;;  %v1356_v57 = vsel %vm1355_vm2, %v3752_v38, %v1352_v45  ;;  %v1359_v34 = vmul.f32 %v3754_v16, %v1358_v39  ;;  %1859 = vmatmul.f32.gmra.mxu2 %v1609_v44  ;;  %1924 = vmatmul.f32.gmra.mxu3 %v1610_v42  ;;  %v1611_v27 = vmax.f32 %v1579_v20, 0.0  ;;  %v1612_v36 = vmax.f32 %v1580_v24, 0.0  ;;  %vm1365_vm5 = vmor %vm1363_vm3, %vm1364_vm4 }
 0x171   : > { %v1250_v35 = vmul.f32 0.00390625, %v1218_v58  ;;  %v1266_v50 = vmul.f32 %v4903_v6, %v4903_v6  ;;  %v1507_v37 = vmul.f32 %v1475_v9, %v1356_v57  ;;  %v1508_v17 = vmul.f32 %v1476_v33, %v1356_v57 }
 0x172   : > { %v1360_v61 = vmul.f32 0.5, %v1359_v34  ;;  %v1477_v44 = vsub.f32 %v4465_v48, %v4853_v5  ;;  %v1478_v42 = vsub.f32 %v4468_v49, %v4853_v5 }
 0x173   : > { %v1282_v62 = vsub.f32 %v1250_v35, %v1266_v50  ;;  %v1544_v21 = vmul.f32 %v4821_v54, %v1507_v37  ;;  %v1545_v26 = vmul.f32 %v4825_v3, %v1508_v17 }
 0x174   : > { %v1361_v56 = vsub.f32 1.5, %v1360_v61 }
 0x175   : > { %v3756_v41 = vpop.eup %3755  ;;  %v4913_v23 = vadd.f32 1e-05, %v1282_v62  ;;  %v1581_v39 = vadd.f32 %v4830_v11, %v1544_v21  ;;  %v1582_v13 = vadd.f32 %v4832_v12, %v1545_v26 }
 0x176   : > { %v1368_v38 = vmul.f32 %v3756_v41, %v4892_v40  ;;  %v1125_v25 = vpop.xlane.xlu1 %1124  ;;  %v1362_v43 = vmul.f32 %v3754_v16, %v1361_v56  ;;  %vm1374_vm7 = vweird.f32 %v3756_v41  ;;  %v1479_v40 = vsub.f32 %v4477_v0, %v4871_v51 }
 0x177   : > { %v4917_v30 = vmul.f32 0.00390625, %v1125_v25  ;;  %3757 = vrsqrt.f32 %v4913_v23  ;;  %1732 = vmatmul.f32.gmra.mxu0 %v1611_v27  ;;  %1797 = vmatmul.f32.gmra.mxu1 %v1612_v36  ;;  %v1613_v35 = vmax.f32 %v1581_v39, 0.0  ;;  %vm1375_vm8 = vmor %vm1373_vm6, %vm1374_vm7  ;;  %v1614_v17 = vmax.f32 %v1582_v13, 0.0 }
 0x178   : > { %v1369_v22 = vmul.f32 %v3756_v41, %v1368_v38  ;;  %v1221_v55 = vpop.xlane.xlu2 %1220  ;;  %1862 = vmatmul.f32.gmra.mxu2 %v1611_v27  ;;  %1927 = vmatmul.f32.gmra.mxu3 %v1612_v36  ;;  %v1366_v58 = vsel %vm1365_vm5, %v3754_v16, %v1362_v43  ;;  %v1480_v56 = vsub.f32 %v4480_v1, %v4871_v51  ;;  %vm1383_vm9 = vweird.f32 %v4913_v23 }
 0x179   : > { %v1251_v45 = vmul.f32 0.00390625, %v1221_v55  ;;  %v1267_v9 = vmul.f32 %v4917_v30, %v4917_v30  ;;  %v1509_v49 = vmul.f32 %v1477_v44, %v1366_v58  ;;  %v1510_v5 = vmul.f32 %v1478_v42, %v1366_v58 }
 0x17a   : > { %v1370_v33 = vmul.f32 0.5, %v1369_v22 }
 0x17b   : > { %v1283_v48 = vsub.f32 %v1251_v45, %v1267_v9  ;;  %v1546_v50 = vmul.f32 %v4821_v54, %v1509_v49  ;;  %v1547_v61 = vmul.f32 %v4825_v3, %v1510_v5  ;;  %v1481_v49 = vsub.f32 %v4489_v14, %v4903_v6 }
 0x17c   : > { %v1371_v10 = vsub.f32 1.5, %v1370_v33  ;;  %v1482_v5 = vsub.f32 %v4492_v15, %v4903_v6 }
 0x17d   : > { %v4932_v4 = vadd.f32 1e-05, %v1283_v48  ;;  %v3758_v57 = vpop.eup %3757  ;;  %v1583_v26 = vadd.f32 %v4830_v11, %v1546_v50  ;;  %v1584_v36 = vadd.f32 %v4832_v12, %v1547_v61 }
 0x17e   : > { %v1128_v34 = vpop.xlane.xlu0 %1127  ;;  %v1372_v37 = vmul.f32 %v3756_v41, %v1371_v10  ;;  %v1378_v16 = vmul.f32 %v3758_v57, %v4913_v23  ;;  %vm1384_vm10 = vweird.f32 %v3758_v57 }
 0x17f   : > { %3759 = vrsqrt.f32 %v4932_v4  ;;  %v4940_v20 = vmul.f32 0.00390625, %v1128_v34  ;;  %1735 = vmatmul.f32.gmra.mxu0 %v1613_v35  ;;  %1800 = vmatmul.f32.gmra.mxu1 %v1614_v17  ;;  %v1615_v42 = vmax.f32 %v1583_v26, 0.0  ;;  %v1616_v33 = vmax.f32 %v1584_v36, 0.0  ;;  %vm1385_vm11 = vmor %vm1383_vm9, %vm1384_vm10 }
 0x180   : > { %v1224_v24 = vpop.xlane.xlu1 %1223  ;;  %v1376_v62 = vsel %vm1375_vm8, %v3756_v41, %v1372_v37  ;;  %v1379_v38 = vmul.f32 %v3758_v57, %v1378_v16  ;;  %1865 = vmatmul.f32.gmra.mxu2 %v1613_v35  ;;  %1930 = vmatmul.f32.gmra.mxu3 %v1614_v17  ;;  %vm1393_vm12 = vweird.f32 %v4932_v4 }
 0x181   : > { %v1252_v25 = vmul.f32 0.00390625, %v1224_v24  ;;  %v1268_v21 = vmul.f32 %v4940_v20, %v4940_v20  ;;  %v1511_v27 = vmul.f32 %v1479_v40, %v1376_v62  ;;  %v1512_v43 = vmul.f32 %v1480_v56, %v1376_v62 }
 0x182   : > { %v1380_v0 = vmul.f32 0.5, %v1379_v38 }
 0x183   : > { %v1284_v41 = vsub.f32 %v1252_v25, %v1268_v21  ;;  %v1548_v45 = vmul.f32 %v4821_v54, %v1511_v27  ;;  %v1549_v39 = vmul.f32 %v4825_v3, %v1512_v43 }
 0x184   : > { %v1381_v55 = vsub.f32 1.5, %v1380_v0  ;;  %v1484_v0 = vsub.f32 %v4504_v29, %v4917_v30 }
 0x185   : > { %v3760_v22 = vpop.eup %3759  ;;  %v4950_v51 = vadd.f32 1e-05, %v1284_v41  ;;  %v1585_v50 = vadd.f32 %v4830_v11, %v1548_v45  ;;  %v1586_v16 = vadd.f32 %v4832_v12, %v1549_v39 }
 0x186   : > { %v1388_v1 = vmul.f32 %v3760_v22, %v4932_v4  ;;  %v1131_v44 = vpop.xlane.xlu2 %1130  ;;  %v1382_v58 = vmul.f32 %v3758_v57, %v1381_v55  ;;  %vm1394_vm13 = vweird.f32 %v3760_v22  ;;  %v1483_v4 = vsub.f32 %v4501_v28, %v4917_v30 }
 0x187   : > { %v4953_v9 = vmul.f32 0.00390625, %v1131_v44  ;;  %3761 = vrsqrt.f32 %v4950_v51  ;;  %1738 = vmatmul.f32.gmra.mxu0 %v1615_v42  ;;  %1803 = vmatmul.f32.gmra.mxu1 %v1616_v33  ;;  %v1617_v62 = vmax.f32 %v1585_v50, 0.0  ;;  %vm1395_vm14 = vmor %vm1393_vm12, %vm1394_vm13  ;;  %v1618_v38 = vmax.f32 %v1586_v16, 0.0 }
 0x188   : > { %v1389_v48 = vmul.f32 %v3760_v22, %v1388_v1  ;;  %v1227_v13 = vpop.xlane.xlu0 %1226  ;;  %1868 = vmatmul.f32.gmra.mxu2 %v1615_v42  ;;  %1933 = vmatmul.f32.gmra.mxu3 %v1616_v33  ;;  %v1386_v37 = vsel %vm1385_vm11, %v3758_v57, %v1382_v58  ;;  %vm1403_vm15 = vweird.f32 %v4950_v51  ;;  %v1485_v50 = vsub.f32 %v4522_v47, %v4940_v20 }
 0x189   : > { %v1269_v10 = vmul.f32 %v4953_v9, %v4953_v9  ;;  %v1253_v34 = vmul.f32 0.00390625, %v1227_v13  ;;  %v1513_v15 = vmul.f32 %v1481_v49, %v1386_v37  ;;  %v1514_v6 = vmul.f32 %v1482_v5, %v1386_v37 }
 0x18a   : > { %v1390_v35 = vmul.f32 0.5, %v1389_v48  ;;  %v1486_v37 = vsub.f32 %v4525_v52, %v4940_v20 }
 0x18b   : > { %v1285_v14 = vsub.f32 %v1253_v34, %v1269_v10  ;;  %v1550_v56 = vmul.f32 %v4821_v54, %v1513_v15  ;;  %v1551_v25 = vmul.f32 %v4825_v3, %v1514_v6 }
 0x18c   : > { %v1391_v17 = vsub.f32 1.5, %v1390_v35 }
 0x18d   : > { %v4969_v23 = vadd.f32 1e-05, %v1285_v14  ;;  %v3762_v61 = vpop.eup %3761  ;;  %v1587_v55 = vadd.f32 %v4830_v11, %v1550_v56  ;;  %v1588_v44 = vadd.f32 %v4832_v12, %v1551_v25 }
 0x18e   : > { %v1392_v40 = vmul.f32 %v3760_v22, %v1391_v17  ;;  %v1134_v24 = vpop.xlane.xlu1 %1133  ;;  %v1398_v57 = vmul.f32 %v3762_v61, %v4950_v51  ;;  %vm1404_vm0 = vweird.f32 %v3762_v61 }
 0x18f   : > { %3763 = vrsqrt.f32 %v4969_v23  ;;  %v4977_v21 = vmul.f32 0.00390625, %v1134_v24  ;;  %1741 = vmatmul.f32.gmra.mxu0 %v1617_v62  ;;  %1806 = vmatmul.f32.gmra.mxu1 %v1618_v38  ;;  %v1619_v58 = vmax.f32 %v1587_v55, 0.0  ;;  %v1620_v5 = vmax.f32 %v1588_v44, 0.0  ;;  %vm1405_vm1 = vmor %vm1403_vm15, %vm1404_vm0 }
 0x190   : > { %v1230_v26 = vpop.xlane.xlu2 %1229  ;;  %v1396_v27 = vsel %vm1395_vm14, %v3760_v22, %v1392_v40  ;;  %v1399_v36 = vmul.f32 %v3762_v61, %v1398_v57  ;;  %1871 = vmatmul.f32.gmra.mxu2 %v1617_v62  ;;  %1936 = vmatmul.f32.gmra.mxu3 %v1618_v38  ;;  %vm1413_vm2 = vweird.f32 %v4969_v23 }
 0x191   : > { %v1254_v43 = vmul.f32 0.00390625, %v1230_v26  ;;  %v1270_v41 = vmul.f32 %v4977_v21, %v4977_v21  ;;  %v1515_v1 = vmul.f32 %v1483_v4, %v1396_v27  ;;  %v1516_v42 = vmul.f32 %v1484_v0, %v1396_v27 }
 0x192   : > { %v1400_v28 = vmul.f32 0.5, %v1399_v36 }
 0x193   : > { %v1286_v22 = vsub.f32 %v1254_v43, %v1270_v41  ;;  %v1552_v48 = vmul.f32 %v4821_v54, %v1515_v1  ;;  %v1553_v10 = vmul.f32 %v4825_v3, %v1516_v42  ;;  %v1488_v43 = vsub.f32 %v4549_v8, %v4953_v9 }
 0x194   : > { %v1401_v33 = vsub.f32 1.5, %v1400_v28 }
 0x195   : > { %v3764_v45 = vpop.eup %3763  ;;  %v4987_v30 = vadd.f32 1e-05, %v1286_v22  ;;  %v1589_v6 = vadd.f32 %v4830_v11, %v1552_v48  ;;  %v1590_v40 = vadd.f32 %v4832_v12, %v1553_v10 }
 0x196   : > { %v1408_v29 = vmul.f32 %v3764_v45, %v4969_v23  ;;  %v1137_v39 = vpop.xlane.xlu0 %1136  ;;  %v1402_v13 = vmul.f32 %v3762_v61, %v1401_v33  ;;  %vm1414_vm3 = vweird.f32 %v3764_v45  ;;  %v1487_v23 = vsub.f32 %v4546_v7, %v4953_v9 }
 0x197   : > { %v4990_v49 = vmul.f32 0.00390625, %v1137_v39  ;;  %3765 = vrsqrt.f32 %v4987_v30  ;;  %1744 = vmatmul.f32.gmra.mxu0 %v1619_v58  ;;  %1809 = vmatmul.f32.gmra.mxu1 %v1620_v5  ;;  %v1621_v38 = vmax.f32 %v1589_v6, 0.0  ;;  %vm1415_vm4 = vmor %vm1413_vm2, %vm1414_vm3  ;;  %v1622_v4 = vmax.f32 %v1590_v40, 0.0 }
 0x198   : > { %v1409_v34 = vmul.f32 %v3764_v45, %v1408_v29  ;;  %v1233_v35 = vpop.xlane.xlu1 %1232  ;;  %1874 = vmatmul.f32.gmra.mxu2 %v1619_v58  ;;  %1939 = vmatmul.f32.gmra.mxu3 %v1620_v5  ;;  %v1406_v17 = vsel %vm1405_vm1, %v3762_v61, %v1402_v13  ;;  %vm1423_vm5 = vweird.f32 %v4987_v30 }
 0x199   : > { %v1255_v14 = vmul.f32 0.00390625, %v1233_v35  ;;  %v1271_v16 = vmul.f32 %v4990_v49, %v4990_v49  ;;  %v1517_v52 = vmul.f32 %v1485_v50, %v1406_v17  ;;  %v1518_v20 = vmul.f32 %v1486_v37, %v1406_v17 }
 0x19a   : > { %v1410_v15 = vmul.f32 0.5, %v1409_v34  ;;  %v1489_v37 = vsub.f32 %v4570_v31, %v4977_v21 }
 0x19b   : > { %v1287_v47 = vsub.f32 %v1255_v14, %v1271_v16  ;;  %v1554_v25 = vmul.f32 %v4821_v54, %v1517_v52  ;;  %v1555_v26 = vmul.f32 %v4825_v3, %v1518_v20  ;;  %v1490_v14 = vsub.f32 %v4573_v32, %v4977_v21 }
 0x19c   : > { %v1411_v24 = vsub.f32 1.5, %v1410_v15 }
 0x19d   : > { %v5006_v51 = vadd.f32 1e-05, %v1287_v47  ;;  %v3766_v62 = vpop.eup %3765  ;;  %v1591_v28 = vadd.f32 %v4830_v11, %v1554_v25  ;;  %v1592_v42 = vadd.f32 %v4832_v12, %v1555_v26 }
 0x19e   : > { %v1412_v56 = vmul.f32 %v3764_v45, %v1411_v24  ;;  %v1140_v57 = vpop.xlane.xlu2 %1139  ;;  %v1418_v61 = vmul.f32 %v3766_v62, %v4987_v30  ;;  %vm1424_vm6 = vweird.f32 %v3766_v62 }
 0x19f   : > { %3767 = vrsqrt.f32 %v5006_v51  ;;  %v5014_v27 = vmul.f32 0.00390625, %v1140_v57  ;;  %1747 = vmatmul.f32.gmra.mxu0 %v1621_v38  ;;  %1812 = vmatmul.f32.gmra.mxu1 %v1622_v4  ;;  %v1623_v58 = vmax.f32 %v1591_v28, 0.0  ;;  %v1624_v10 = vmax.f32 %v1592_v42, 0.0  ;;  %vm1425_vm7 = vmor %vm1423_vm5, %vm1424_vm6 }
 0x1a0   : > { %v1236_v0 = vpop.xlane.xlu0 %1235  ;;  %v1416_v36 = vsel %vm1415_vm4, %v3764_v45, %v1412_v56  ;;  %v1419_v41 = vmul.f32 %v3766_v62, %v1418_v61  ;;  %1877 = vmatmul.f32.gmra.mxu2 %v1621_v38  ;;  %1942 = vmatmul.f32.gmra.mxu3 %v1622_v4  ;;  %vm1433_vm8 = vweird.f32 %v5006_v51 }
 0x1a1   : > { %v1256_v55 = vmul.f32 0.00390625, %v1236_v0  ;;  %v1272_v1 = vmul.f32 %v5014_v27, %v5014_v27  ;;  %v1519_v44 = vmul.f32 %v1487_v23, %v1416_v36  ;;  %v1520_v22 = vmul.f32 %v1488_v43, %v1416_v36 }
 0x1a2   : > { %v1420_v7 = vmul.f32 0.5, %v1419_v41  ;;  %v1492_v23 = vsub.f32 %v4606_v63, %v4990_v49 }
 0x1a3   : > { %v1288_v45 = vsub.f32 %v1256_v55, %v1272_v1  ;;  %v1556_v48 = vmul.f32 %v4821_v54, %v1519_v44  ;;  %v1557_v34 = vmul.f32 %v4825_v3, %v1520_v22 }
 0x1a4   : > { %v1421_v29 = vsub.f32 1.5, %v1420_v7 }
 0x1a5   : > { %v3768_v33 = vpop.eup %3767  ;;  %v5024_v9 = vadd.f32 1e-05, %v1288_v45  ;;  %v1593_v17 = vadd.f32 %v4830_v11, %v1556_v48  ;;  %v1594_v40 = vadd.f32 %v4832_v12, %v1557_v34 }
 0x1a6   : > { %v1428_v8 = vmul.f32 %v3768_v33, %v5006_v51  ;;  %v1143_v39 = vpop.xlane.xlu1 %1142  ;;  %v1422_v13 = vmul.f32 %v3766_v62, %v1421_v29  ;;  %vm1434_vm9 = vweird.f32 %v3768_v33  ;;  %v1491_v51 = vsub.f32 %v4603_v60, %v4990_v49 }
 0x1a7   : > { %v5027_v5 = vmul.f32 0.00390625, %v1143_v39  ;;  %3769 = vrsqrt.f32 %v5024_v9  ;;  %1750 = vmatmul.f32.gmra.mxu0 %v1623_v58  ;;  %1815 = vmatmul.f32.gmra.mxu1 %v1624_v10  ;;  %v1625_v57 = vmax.f32 %v1593_v17, 0.0  ;;  %vm1435_vm10 = vmor %vm1433_vm8, %vm1434_vm9  ;;  %vm1443_vm11 = vweird.f32 %v5024_v9 }
 0x1a8   : > { %v1429_v35 = vmul.f32 %v3768_v33, %v1428_v8  ;;  %v1239_v50 = vpop.xlane.xlu2 %1238  ;;  %1880 = vmatmul.f32.gmra.mxu2 %v1623_v58  ;;  %1945 = vmatmul.f32.gmra.mxu3 %v1624_v10  ;;  %v1426_v47 = vsel %vm1425_vm7, %v3766_v62, %v1422_v13  ;;  %v1626_v62 = vmax.f32 %v1594_v40, 0.0  ;;  %v1493_v58 = vsub.f32 %v4615_v18, %v5014_v27 }
 0x1a9   : > { %v1257_v16 = vmul.f32 0.00390625, %v1239_v50  ;;  %v1273_v15 = vmul.f32 %v5027_v5, %v5027_v5  ;;  %v1521_v32 = vmul.f32 %v1489_v37, %v1426_v47  ;;  %v1522_v21 = vmul.f32 %v1490_v14, %v1426_v47 }
 0x1aa   : > { %v1430_v6 = vmul.f32 0.5, %v1429_v35  ;;  %v1494_v13 = vsub.f32 %v4618_v19, %v5014_v27  ;;  %v1496_v40 = vsub.f32 %v4669_v2, %v5027_v5 }
 0x1ab   : > { %v1289_v31 = vsub.f32 %v1257_v16, %v1273_v15  ;;  %v1558_v38 = vmul.f32 %v4821_v54, %v1521_v32  ;;  %v1559_v61 = vmul.f32 %v4825_v3, %v1522_v21 }
 0x1ac   : > { %v1431_v52 = vsub.f32 1.5, %v1430_v6 }
 0x1ad   : > { %v1305_v30 = vadd.f32 1e-05, %v1289_v31  ;;  %v3770_v20 = vpop.eup %3769  ;;  %v1595_v55 = vadd.f32 %v4830_v11, %v1558_v38  ;;  %v1596_v28 = vadd.f32 %v4832_v12, %v1559_v61  ;;  %v1495_v31 = vsub.f32 %v4666_v59, %v5027_v5 }
 0x1ae   : > { %v1432_v24 = vmul.f32 %v3768_v33, %v1431_v52  ;;  %v1146_v56 = vpop.xlane.xlu0 %1145  ;;  %v1438_v25 = vmul.f32 %v3770_v20, %v5024_v9  ;;  %vm1444_vm12 = vweird.f32 %v3770_v20 }
 0x1af   : > { %3771 = vrsqrt.f32 %v1305_v30  ;;  %v5046_v4 = vmul.f32 0.00390625, %v1146_v56  ;;  %1753 = vmatmul.f32.gmra.mxu0 %v1625_v57  ;;  %1818 = vmatmul.f32.gmra.mxu1 %v1626_v62  ;;  %v1627_v45 = vmax.f32 %v1595_v55, 0.0  ;;  %v1628_v29 = vmax.f32 %v1596_v28, 0.0  ;;  %vm1445_vm13 = vmor %vm1443_vm11, %vm1444_vm12 }
 0x1b0   : > { %v1436_v26 = vsel %vm1435_vm10, %v3768_v33, %v1432_v24  ;;  %v1439_v0 = vmul.f32 %v3770_v20, %v1438_v25  ;;  %v1242_v36 = vpop.xlane.xlu1 %1241  ;;  %1883 = vmatmul.f32.gmra.mxu2 %v1625_v57  ;;  %1948 = vmatmul.f32.gmra.mxu3 %v1626_v62  ;;  %vm1453_vm14 = vweird.f32 %v1305_v30 }
 0x1b1   : > { %v1258_v43 = vmul.f32 0.00390625, %v1242_v36  ;;  %v1274_v41 = vmul.f32 %v5046_v4, %v5046_v4  ;;  %v1523_v44 = vmul.f32 %v1491_v51, %v1436_v26  ;;  %v1524_v60 = vmul.f32 %v1492_v23, %v1436_v26 }
 0x1b2   : > { %v1440_v1 = vmul.f32 0.5, %v1439_v0  ;;  %v1497_v25 = vsub.f32 %v4720_v46, %v5046_v4  ;;  %v1498_v62 = vsub.f32 %v4723_v53, %v5046_v4 }
 0x1b3   : > { %v1290_v7 = vsub.f32 %v1258_v43, %v1274_v41  ;;  %v1560_v8 = vmul.f32 %v4821_v54, %v1523_v44  ;;  %v1561_v39 = vmul.f32 %v4825_v3, %v1524_v60 }
 0x1b4   : > { %v1441_v63 = vsub.f32 1.5, %v1440_v1 }
 0x1b5   : > { %v3772_v42 = vpop.eup %3771  ;;  %v1306_v22 = vadd.f32 1e-05, %v1290_v7  ;;  %v1597_v35 = vadd.f32 %v4830_v11, %v1560_v8  ;;  %v1598_v50 = vadd.f32 %v4832_v12, %v1561_v39 }
 0x1b6   : > { %v1448_v49 = vmul.f32 %v3772_v42, %v1305_v30  ;;  %v1442_v33 = vmul.f32 %v3770_v20, %v1441_v63  ;;  %vm1454_vm15 = vweird.f32 %v3772_v42 }
 0x1b7   : > { %3773 = vrsqrt.f32 %v1306_v22  ;;  %1756 = vmatmul.f32.gmra.mxu0 %v1627_v45  ;;  %1821 = vmatmul.f32.gmra.mxu1 %v1628_v29  ;;  %vm1455_vm0 = vmor %vm1453_vm14, %vm1454_vm15  ;;  %v1629_v27 = vmax.f32 %v1597_v35, 0.0  ;;  %v1630_v6 = vmax.f32 %v1598_v50, 0.0  ;;  %vm1463_vm1 = vweird.f32 %v1306_v22 }
 0x1b8   : > { %v1449_v48 = vmul.f32 %v3772_v42, %v1448_v49  ;;  %v1446_v9 = vsel %vm1445_vm13, %v3770_v20, %v1442_v33  ;;  %1886 = vmatmul.f32.gmra.mxu2 %v1627_v45  ;;  %1951 = vmatmul.f32.gmra.mxu3 %v1628_v29 }
 0x1b9   : > { %v1525_v34 = vmul.f32 %v1493_v58, %v1446_v9  ;;  %v1526_v37 = vmul.f32 %v1494_v13, %v1446_v9 }
 0x1ba   : > { %v1450_v10 = vmul.f32 0.5, %v1449_v48 }
 0x1bb   : > { %v1562_v15 = vmul.f32 %v4821_v54, %v1525_v34  ;;  %v1563_v17 = vmul.f32 %v4825_v3, %v1526_v37 }
 0x1bc   : > { %v1451_v14 = vsub.f32 1.5, %v1450_v10 }
 0x1bd   : > { %v3774_v18 = vpop.eup %3773  ;;  %v1599_v21 = vadd.f32 %v4830_v11, %v1562_v15  ;;  %v1600_v30 = vadd.f32 %v4832_v12, %v1563_v17 }
 0x1be   : > { %v1452_v16 = vmul.f32 %v3772_v42, %v1451_v14  ;;  %v1458_v19 = vmul.f32 %v3774_v18, %v1306_v22  ;;  %vm1464_vm2 = vweird.f32 %v3774_v18 }
 0x1bf   : > { %1759 = vmatmul.f32.gmra.mxu0 %v1629_v27  ;;  %1824 = vmatmul.f32.gmra.mxu1 %v1630_v6  ;;  %v1631_v57 = vmax.f32 %v1599_v21, 0.0  ;;  %v1632_v38 = vmax.f32 %v1600_v30, 0.0  ;;  %vm1465_vm3 = vmor %vm1463_vm1, %vm1464_vm2 }
 0x1c0   : > { %v1456_v47 = vsel %vm1455_vm0, %v3772_v42, %v1452_v16  ;;  %v1459_v32 = vmul.f32 %v3774_v18, %v1458_v19  ;;  %1889 = vmatmul.f32.gmra.mxu2 %v1629_v27  ;;  %1954 = vmatmul.f32.gmra.mxu3 %v1630_v6 }
 0x1c1   : > { %v1527_v20 = vmul.f32 %v1495_v31, %v1456_v47  ;;  %v1528_v24 = vmul.f32 %v1496_v40, %v1456_v47 }
 0x1c2   : > { %v1460_v52 = vmul.f32 0.5, %v1459_v32 }
 0x1c3   : > { %v1564_v2 = vmul.f32 %v4821_v54, %v1527_v20  ;;  %v1565_v5 = vmul.f32 %v4825_v3, %v1528_v24 }
 0x1c4   : > { %v1461_v56 = vsub.f32 1.5, %v1460_v52 }
 0x1c5   : > { %v1601_v26 = vadd.f32 %v4830_v11, %v1564_v2  ;;  %v1602_v51 = vadd.f32 %v4832_v12, %v1565_v5 }
 0x1c6   : > { %v1462_v59 = vmul.f32 %v3774_v18, %v1461_v56 }
 0x1c7   : > { %1762 = vmatmul.f32.gmra.mxu0 %v1631_v57  ;;  %1827 = vmatmul.f32.gmra.mxu1 %v1632_v38  ;;  %v1633_v36 = vmax.f32 %v1601_v26, 0.0  ;;  %v1634_v43 = vmax.f32 %v1602_v51, 0.0 }
 0x1c8   : > { %v1466_v61 = vsel %vm1465_vm3, %v3774_v18, %v1462_v59  ;;  %1892 = vmatmul.f32.gmra.mxu2 %v1631_v57  ;;  %1957 = vmatmul.f32.gmra.mxu3 %v1632_v38 }
 0x1c9   : > { %v1529_v23 = vmul.f32 %v1497_v25, %v1466_v61  ;;  %v1530_v0 = vmul.f32 %v1498_v62, %v1466_v61 }
 0x1cb   : > { %v1566_v41 = vmul.f32 %v4821_v54, %v1529_v23  ;;  %v1567_v46 = vmul.f32 %v4825_v3, %v1530_v0  ;;  %v1701_v54 = vld [vmem:[%s6251_s8] sm:$0x3] }
 0x1cc   : > { %v5088_v28 = vperm.slane %v1701_v54, 0  ;;  %v5091_v7 = vperm.slane %v1701_v54, 1 }
 0x1cd   : > { %v1603_v53 = vadd.f32 %v4830_v11, %v1566_v41  ;;  %v1604_v4 = vadd.f32 %v4832_v12, %v1567_v46 }
 0x1cf   : > { %1765 = vmatmul.f32.gmra.mxu0 %v1633_v36  ;;  %1830 = vmatmul.f32.gmra.mxu1 %v1634_v43  ;;  %v1635_v55 = vmax.f32 %v1603_v53, 0.0  ;;  %v1636_v1 = vmax.f32 %v1604_v4, 0.0 }
 0x1d0   : > { %1895 = vmatmul.f32.gmra.mxu2 %v1633_v36  ;;  %1960 = vmatmul.f32.gmra.mxu3 %v1634_v43 }
 0x1d7   : > { %1768 = vmatmul.f32.gmra.mxu0 %v1635_v55  ;;  %1833 = vmatmul.f32.gmra.mxu1 %v1636_v1 }
 0x1d8   : > { %1898 = vmatmul.f32.gmra.mxu2 %v1635_v55  ;;  %1963 = vmatmul.f32.gmra.mxu3 %v1636_v1 }
 0x1dc   : > { %v1724_v3 = vpop.f32.mrf.mxu0  ;;  %v1789_v44 = vpop.f32.mrf.mxu1 }
 0x1dd   : > { %v1725_v60 = vadd.f32 %v1724_v3, %v5088_v28 }
 0x1df   : > { %v5093_v42 = vadd.f32 %v1789_v44, %v1725_v60 }
 0x1e1   : > { %v2033_v29 = vmul.f32 %v5093_v42, %v5093_v42 }
 0x1e3   : > { %v1854_v11 = vpop.f32.mrf.mxu2  ;;  %v1919_v12 = vpop.f32.mrf.mxu3 }
 0x1e4   : > { %v1855_v63 = vadd.f32 %v1854_v11, %v5091_v7  ;;  %v1727_v49 = vpop.f32.mrf.mxu0  ;;  %v1792_v22 = vpop.f32.mrf.mxu1 }
 0x1e5   : > { %v1728_v39 = vadd.f32 %v1727_v49, %v5088_v28 }
 0x1e6   : > { %v5096_v45 = vadd.f32 %v1919_v12, %v1855_v63 }
 0x1e7   : > { %v5105_v9 = vadd.f32 %v1792_v22, %v1728_v39 }
 0x1e8   : > { %v1969_v33 = vadd.f32 %v5096_v45, %v5093_v42  ;;  %v2034_v8 = vmul.f32 %v5096_v45, %v5096_v45 }
 0x1e9   : > { %v2035_v18 = vmul.f32 %v5105_v9, %v5105_v9 }
 0x1ea   : > { %1970 = vadd.xlane.f32.xlu2 %v1969_v33  ;;  %v2065_v58 = vadd.f32 %v2034_v8, %v2033_v29 }
 0x1eb   : > { %v1857_v48 = vpop.f32.mrf.mxu2  ;;  %v1922_v13 = vpop.f32.mrf.mxu3 }
 0x1ec   : > { %2066 = vadd.xlane.f32.xlu0 %v2065_v58  ;;  %v1858_v10 = vadd.f32 %v1857_v48, %v5091_v7  ;;  %v1730_v34 = vpop.f32.mrf.mxu0  ;;  %v1795_v35 = vpop.f32.mrf.mxu1 }
 0x1ed   : > { %v1731_v37 = vadd.f32 %v1730_v34, %v5088_v28 }
 0x1ee   : > { %v5108_v50 = vadd.f32 %v1922_v13, %v1858_v10 }
 0x1ef   : > { %v5117_v6 = vadd.f32 %v1795_v35, %v1731_v37 }
 0x1f0   : > { %v1972_v14 = vadd.f32 %v5108_v50, %v5105_v9  ;;  %v2036_v16 = vmul.f32 %v5108_v50, %v5108_v50 }
 0x1f1   : > { %v2037_v52 = vmul.f32 %v5117_v6, %v5117_v6 }
 0x1f2   : > { %1973 = vadd.xlane.f32.xlu1 %v1972_v14  ;;  %v2068_v15 = vadd.f32 %v2036_v16, %v2035_v18 }
 0x1f3   : > { %v1860_v19 = vpop.f32.mrf.mxu2  ;;  %v1925_v27 = vpop.f32.mrf.mxu3 }
 0x1f4   : > { %v1861_v17 = vadd.f32 %v1860_v19, %v5091_v7  ;;  %2069 = vadd.xlane.f32.xlu2 %v2068_v15  ;;  %v1733_v47 = vpop.f32.mrf.mxu0  ;;  %v1798_v31 = vpop.f32.mrf.mxu1 }
 0x1f5   : > { %v1734_v32 = vadd.f32 %v1733_v47, %v5088_v28 }
 0x1f6   : > { %v5120_v40 = vadd.f32 %v1925_v27, %v1861_v17 }
 0x1f7   : > { %v5129_v57 = vadd.f32 %v1798_v31, %v1734_v32 }
 0x1f8   : > { %v1975_v21 = vadd.f32 %v5120_v40, %v5117_v6  ;;  %v2038_v30 = vmul.f32 %v5120_v40, %v5120_v40 }
 0x1f9   : > { %v2039_v61 = vmul.f32 %v5129_v57, %v5129_v57 }
 0x1fa   : > { %1976 = vadd.xlane.f32.xlu0 %v1975_v21  ;;  %v2071_v20 = vadd.f32 %v2038_v30, %v2037_v52 }
 0x1fb   : > { %v1863_v24 = vpop.f32.mrf.mxu2  ;;  %v1928_v56 = vpop.f32.mrf.mxu3 }
 0x1fc   : > { %v1864_v59 = vadd.f32 %v1863_v24, %v5091_v7  ;;  %2072 = vadd.xlane.f32.xlu1 %v2071_v20  ;;  %v1736_v38 = vpop.f32.mrf.mxu0  ;;  %v1801_v2 = vpop.f32.mrf.mxu1  ;;  %v2538_v24 = vld [vmem:[#allocation8 + $0xf8] sm:$0xff] }
 0x1fd   : > { %v1737_v25 = vadd.f32 %v1736_v38, %v5088_v28  ;;  %2707 = vmatpush.msra.mxu2 %v2538_v24 }
 0x1fe   : > { %v5132_v5 = vadd.f32 %v1928_v56, %v1864_v59  ;;  %v2570_v56 = vld [vmem:[#allocation8 + $0x1f8] sm:$0xff] }
 0x1ff   : > { %v5141_v36 = vadd.f32 %v1801_v2, %v1737_v25  ;;  %2772 = vmatpush.msra.mxu3 %v2570_v56  ;;  %v2565_v56 = vld [vmem:[#allocation8 + $0x1d0] sm:$0xff] }
 0x200   : > { %v1978_v62 = vadd.f32 %v5132_v5, %v5129_v57  ;;  %v2040_v26 = vmul.f32 %v5132_v5, %v5132_v5 }
 0x201   : > { %v2041_v1 = vmul.f32 %v5141_v36, %v5141_v36 }
 0x202   : > { %1979 = vadd.xlane.f32.xlu2 %v1978_v62  ;;  %v2074_v51 = vadd.f32 %v2040_v26, %v2039_v61 }
 0x203   : > { %v1866_v23 = vpop.f32.mrf.mxu2  ;;  %v1931_v0 = vpop.f32.mrf.mxu3 }
 0x204   : > { %v1867_v43 = vadd.f32 %v1866_v23, %v5091_v7  ;;  %2075 = vadd.xlane.f32.xlu0 %v2074_v51  ;;  %v1739_v41 = vpop.f32.mrf.mxu0  ;;  %v1804_v46 = vpop.f32.mrf.mxu1 }
 0x205   : > { %v1740_v4 = vadd.f32 %v1739_v41, %v5088_v28  ;;  %v2537_v41 = vld [vmem:[#allocation8 + $0xf0] sm:$0xff] }
 0x206   : > { %v5144_v53 = vadd.f32 %v1931_v0, %v1867_v43  ;;  %2577 = vmatpush.msra.mxu0 %v2537_v41 }
 0x207   : > { %v5153_v11 = vadd.f32 %v1804_v46, %v1740_v4  ;;  %v2569_v4 = vld [vmem:[#allocation8 + $0x1f0] sm:$0xff] }
 0x208   : > { %v1981_v55 = vadd.f32 %v5144_v53, %v5141_v36  ;;  %v2042_v54 = vmul.f32 %v5144_v53, %v5144_v53  ;;  %2642 = vmatpush.msra.mxu1 %v2569_v4 }
 0x209   : > { %v2043_v8 = vmul.f32 %v5153_v11, %v5153_v11 }
 0x20a   : > { %1982 = vadd.xlane.f32.xlu1 %v1981_v55  ;;  %v2077_v3 = vadd.f32 %v2042_v54, %v2041_v1  ;;  %v2536_v55 = vld [vmem:[#allocation8 + $0xe8] sm:$0xff] }
 0x20b   : > { %v1869_v44 = vpop.f32.mrf.mxu2  ;;  %v1934_v60 = vpop.f32.mrf.mxu3  ;;  %v2568_v1 = vld [vmem:[#allocation8 + $0x1e8] sm:$0xff]  ;;  %2708 = vmatpush.msra.mxu2 %v2536_v55 }
 0x20c   : > { %v1870_v12 = vadd.f32 %v1869_v44, %v5091_v7  ;;  %2078 = vadd.xlane.f32.xlu2 %v2077_v3  ;;  %v1742_v63 = vpop.f32.mrf.mxu0  ;;  %v1807_v49 = vpop.f32.mrf.mxu1  ;;  %2773 = vmatpush.msra.mxu3 %v2568_v1  ;;  %v2531_v1 = vld [vmem:[#allocation8 + $0xc0] sm:$0xff] }
 0x20d   : > { %v1743_v33 = vadd.f32 %v1742_v63, %v5088_v28 }
 0x20e   : > { %v5156_v22 = vadd.f32 %v1934_v60, %v1870_v12 }
 0x20f   : > { %v5165_v10 = vadd.f32 %v1807_v49, %v1743_v33 }
 0x210   : > { %v1984_v29 = vadd.f32 %v5156_v22, %v5153_v11  ;;  %v2044_v39 = vmul.f32 %v5156_v22, %v5156_v22 }
 0x211   : > { %v2045_v15 = vmul.f32 %v5165_v10, %v5165_v10 }
 0x212   : > { %1985 = vadd.xlane.f32.xlu0 %v1984_v29  ;;  %v2080_v58 = vadd.f32 %v2044_v39, %v2043_v8 }
 0x213   : > { %v1872_v48 = vpop.f32.mrf.mxu2  ;;  %v1937_v13 = vpop.f32.mrf.mxu3 }
 0x214   : > { %v1873_v34 = vadd.f32 %v1872_v48, %v5091_v7  ;;  %2081 = vadd.xlane.f32.xlu1 %v2080_v58  ;;  %v1745_v35 = vpop.f32.mrf.mxu0  ;;  %v1810_v37 = vpop.f32.mrf.mxu1  ;;  %v2535_v58 = vld [vmem:[#allocation8 + $0xe0] sm:$0xff] }
 0x215   : > { %v1746_v18 = vadd.f32 %v1745_v35, %v5088_v28  ;;  %2578 = vmatpush.msra.mxu0 %v2535_v58  ;;  %v2566_v35 = vld [vmem:[#allocation8 + $0x1d8] sm:$0xff] }
 0x216   : > { %v5168_v14 = vadd.f32 %v1937_v13, %v1873_v34  ;;  %v2567_v13 = vld [vmem:[#allocation8 + $0x1e0] sm:$0xff]  ;;  %v2534_v34 = vld [vmem:[#allocation8 + $0xd8] sm:$0xff]  ;;  %2774 = vmatpush.msra.mxu3 %v2566_v35 }
 0x217   : > { %v5177_v17 = vadd.f32 %v1810_v37, %v1746_v18  ;;  %2643 = vmatpush.msra.mxu1 %v2567_v13  ;;  %2709 = vmatpush.msra.mxu2 %v2534_v34 }
 0x218   : > { %v1987_v16 = vadd.f32 %v5168_v14, %v5165_v10  ;;  %v2046_v19 = vmul.f32 %v5168_v14, %v5168_v14 }
 0x219   : > { %v2047_v20 = vmul.f32 %v5177_v17, %v5177_v17  ;;  %2644 = vmatpush.msra.mxu1 %v2565_v56 }
 0x21a   : > { %1988 = vadd.xlane.f32.xlu2 %v1987_v16  ;;  %v2083_v27 = vadd.f32 %v2046_v19, %v2045_v15 }
 0x21b   : > { %v1875_v47 = vpop.f32.mrf.mxu2  ;;  %v1940_v31 = vpop.f32.mrf.mxu3 }
 0x21c   : > { %v1876_v32 = vadd.f32 %v1875_v47, %v5091_v7  ;;  %2084 = vadd.xlane.f32.xlu0 %v2083_v27  ;;  %v1748_v21 = vpop.f32.mrf.mxu0  ;;  %v1813_v52 = vpop.f32.mrf.mxu1 }
 0x21d   : > { %v1749_v59 = vadd.f32 %v1748_v21, %v5088_v28 }
 0x21e   : > { %v5180_v30 = vadd.f32 %v1940_v31, %v1876_v32 }
 0x21f   : > { %v5189_v26 = vadd.f32 %v1813_v52, %v1749_v59  ;;  %v2532_v59 = vld [vmem:[#allocation8 + $0xc8] sm:$0xff] }
 0x220   : > { %v1990_v38 = vadd.f32 %v5180_v30, %v5177_v17  ;;  %v2048_v2 = vmul.f32 %v5180_v30, %v5180_v30  ;;  %2710 = vmatpush.msra.mxu2 %v2532_v59 }
 0x221   : > { %v2049_v3 = vmul.f32 %v5189_v26, %v5189_v26 }
 0x222   : > { %1991 = vadd.xlane.f32.xlu1 %v1990_v38  ;;  %v2086_v25 = vadd.f32 %v2048_v2, %v2047_v20  ;;  %v2533_v20 = vld [vmem:[#allocation8 + $0xd0] sm:$0xff]  ;;  %v2564_v38 = vld [vmem:[#allocation8 + $0x1c8] sm:$0xff] }
 0x223   : > { %v1878_v62 = vpop.f32.mrf.mxu2  ;;  %v1943_v61 = vpop.f32.mrf.mxu3  ;;  %2579 = vmatpush.msra.mxu0 %v2533_v20  ;;  %2775 = vmatpush.msra.mxu3 %v2564_v38  ;;  %v2561_v20 = vld [vmem:[#allocation8 + $0x1b0] sm:$0xff]  ;;  %v2528_v38 = vld [vmem:[#allocation8 + $0xa8] sm:$0xff] }
 0x224   : > { %v1879_v51 = vadd.f32 %v1878_v62, %v5091_v7  ;;  %2087 = vadd.xlane.f32.xlu2 %v2086_v25  ;;  %v1751_v23 = vpop.f32.mrf.mxu0  ;;  %v1816_v0 = vpop.f32.mrf.mxu1 }
 0x225   : > { %v1752_v46 = vadd.f32 %v1751_v23, %v5088_v28  ;;  %2580 = vmatpush.msra.mxu0 %v2531_v1 }
 0x226   : > { %v5192_v43 = vadd.f32 %v1943_v61, %v1879_v51 }
 0x227   : > { %v5201_v12 = vadd.f32 %v1816_v0, %v1752_v46 }
 0x228   : > { %v1993_v54 = vadd.f32 %v5192_v43, %v5189_v26  ;;  %v2050_v44 = vmul.f32 %v5192_v43, %v5192_v43 }
 0x229   : > { %v2051_v48 = vmul.f32 %v5201_v12, %v5201_v12 }
 0x22a   : > { %1994 = vadd.xlane.f32.xlu0 %v1993_v54  ;;  %v2089_v60 = vadd.f32 %v2050_v44, %v2049_v3  ;;  %v2563_v54 = vld [vmem:[#allocation8 + $0x1c0] sm:$0xff]  ;;  %v2530_v3 = vld [vmem:[#allocation8 + $0xb8] sm:$0xff] }
 0x22b   : > { %v1881_v63 = vpop.f32.mrf.mxu2  ;;  %v1946_v49 = vpop.f32.mrf.mxu3  ;;  %2645 = vmatpush.msra.mxu1 %v2563_v54  ;;  %2711 = vmatpush.msra.mxu2 %v2530_v3  ;;  %v2558_v3 = vld [vmem:[#allocation8 + $0x198] sm:$0xff] }
 0x22c   : > { %v1882_v33 = vadd.f32 %v1881_v63, %v5091_v7  ;;  %2090 = vadd.xlane.f32.xlu1 %v2089_v60  ;;  %v1754_v29 = vpop.f32.mrf.mxu0  ;;  %v1819_v8 = vpop.f32.mrf.mxu1  ;;  %v2562_v60 = vld [vmem:[#allocation8 + $0x1b8] sm:$0xff] }
 0x22d   : > { %v1755_v37 = vadd.f32 %v1754_v29, %v5088_v28  ;;  %2776 = vmatpush.msra.mxu3 %v2562_v60  ;;  %2646 = vmatpush.msra.mxu1 %v2561_v20  ;;  %v2523_v60 = vld [vmem:[#allocation8 + $0x80] sm:$0xff]  ;;  %v2552_v20 = vld [vmem:[#allocation8 + $0x168] sm:$0xff] }
 0x22e   : > { %v5204_v39 = vadd.f32 %v1946_v49, %v1882_v33  ;;  %2712 = vmatpush.msra.mxu2 %v2528_v38  ;;  %v2549_v38 = vld [vmem:[#allocation8 + $0x150] sm:$0xff] }
 0x22f   : > { %v5213_v47 = vadd.f32 %v1819_v8, %v1755_v37 }
 0x230   : > { %v1996_v18 = vadd.f32 %v5204_v39, %v5201_v12  ;;  %v2052_v16 = vmul.f32 %v5204_v39, %v5204_v39 }
 0x231   : > { %v2053_v25 = vmul.f32 %v5213_v47, %v5213_v47 }
 0x232   : > { %1997 = vadd.xlane.f32.xlu2 %v1996_v18  ;;  %v2092_v15 = vadd.f32 %v2052_v16, %v2051_v48 }
 0x233   : > { %v1884_v19 = vpop.f32.mrf.mxu2  ;;  %v1949_v27 = vpop.f32.mrf.mxu3 }
 0x234   : > { %v1885_v31 = vadd.f32 %v1884_v19, %v5091_v7  ;;  %2093 = vadd.xlane.f32.xlu0 %v2092_v15  ;;  %v1757_v32 = vpop.f32.mrf.mxu0  ;;  %v1822_v21 = vpop.f32.mrf.mxu1 }
 0x235   : > { %v1758_v24 = vadd.f32 %v1757_v32, %v5088_v28 }
 0x236   : > { %v5216_v52 = vadd.f32 %v1949_v27, %v1885_v31 }
 0x237   : > { %v5225_v51 = vadd.f32 %v1822_v21, %v1758_v24  ;;  %v2529_v21 = vld [vmem:[#allocation8 + $0xb0] sm:$0xff] }
 0x238   : > { %v1999_v2 = vadd.f32 %v5216_v52, %v5213_v47  ;;  %v2054_v62 = vmul.f32 %v5216_v52, %v5216_v52  ;;  %2581 = vmatpush.msra.mxu0 %v2529_v21 }
 0x239   : > { %v2055_v44 = vmul.f32 %v5225_v51, %v5225_v51 }
 0x23a   : > { %2000 = vadd.xlane.f32.xlu1 %v1999_v2  ;;  %v2095_v61 = vadd.f32 %v2054_v62, %v2053_v25  ;;  %v2560_v2 = vld [vmem:[#allocation8 + $0x1a8] sm:$0xff]  ;;  %v2527_v25 = vld [vmem:[#allocation8 + $0xa0] sm:$0xff] }
 0x23b   : > { %v1887_v23 = vpop.f32.mrf.mxu2  ;;  %v1952_v0 = vpop.f32.mrf.mxu3  ;;  %2777 = vmatpush.msra.mxu3 %v2560_v2  ;;  %2582 = vmatpush.msra.mxu0 %v2527_v25 }
 0x23c   : > { %v1888_v41 = vadd.f32 %v1887_v23, %v5091_v7  ;;  %2096 = vadd.xlane.f32.xlu2 %v2095_v61  ;;  %v1760_v46 = vpop.f32.mrf.mxu0  ;;  %v1825_v4 = vpop.f32.mrf.mxu1  ;;  %v2559_v61 = vld [vmem:[#allocation8 + $0x1a0] sm:$0xff] }
 0x23d   : > { %v1761_v63 = vadd.f32 %v1760_v46, %v5088_v28  ;;  %2647 = vmatpush.msra.mxu1 %v2559_v61  ;;  %v2526_v46 = vld [vmem:[#allocation8 + $0x98] sm:$0xff]  ;;  %2778 = vmatpush.msra.mxu3 %v2558_v3  ;;  %v2548_v3 = vld [vmem:[#allocation8 + $0x148] sm:$0xff] }
 0x23e   : > { %v5228_v55 = vadd.f32 %v1952_v0, %v1888_v41  ;;  %v2525_v0 = vld [vmem:[#allocation8 + $0x90] sm:$0xff]  ;;  %2713 = vmatpush.msra.mxu2 %v2526_v46 }
 0x23f   : > { %v5237_v48 = vadd.f32 %v1825_v4, %v1761_v63  ;;  %v2557_v41 = vld [vmem:[#allocation8 + $0x190] sm:$0xff]  ;;  %2583 = vmatpush.msra.mxu0 %v2525_v0  ;;  %v2555_v63 = vld [vmem:[#allocation8 + $0x180] sm:$0xff]  ;;  %v2550_v0 = vld [vmem:[#allocation8 + $0x158] sm:$0xff] }
 0x240   : > { %v2002_v49 = vadd.f32 %v5228_v55, %v5225_v51  ;;  %v2056_v33 = vmul.f32 %v5228_v55, %v5228_v55  ;;  %2648 = vmatpush.msra.mxu1 %v2557_v41  ;;  %v2515_v41 = vld [vmem:[#allocation8 + $0x40] sm:$0xff] }
 0x241   : > { %v2057_v15 = vmul.f32 %v5237_v48, %v5237_v48  ;;  %2584 = vmatpush.msra.mxu0 %v2523_v60 }
 0x242   : > { %2003 = vadd.xlane.f32.xlu0 %v2002_v49  ;;  %v2098_v29 = vadd.f32 %v2056_v33, %v2055_v44  ;;  %v2524_v49 = vld [vmem:[#allocation8 + $0x88] sm:$0xff]  ;;  %2649 = vmatpush.msra.mxu1 %v2555_v63 }
 0x243   : > { %v1890_v8 = vpop.f32.mrf.mxu2  ;;  %v1955_v58 = vpop.f32.mrf.mxu3  ;;  %2714 = vmatpush.msra.mxu2 %v2524_v49 }
 0x244   : > { %v1891_v13 = vadd.f32 %v1890_v8, %v5091_v7  ;;  %2099 = vadd.xlane.f32.xlu1 %v2098_v29  ;;  %v1763_v34 = vpop.f32.mrf.mxu0  ;;  %v1828_v37 = vpop.f32.mrf.mxu1  ;;  %v2556_v29 = vld [vmem:[#allocation8 + $0x188] sm:$0xff] }
 0x245   : > { %v1764_v18 = vadd.f32 %v1763_v34, %v5088_v28  ;;  %v2521_v34 = vld [vmem:[#allocation8 + $0x70] sm:$0xff]  ;;  %2779 = vmatpush.msra.mxu3 %v2556_v29  ;;  %v2514_v29 = vld [vmem:[#allocation8 + $0x38] sm:$0xff] }
 0x246   : > { %v5240_v35 = vadd.f32 %v1955_v58, %v1891_v13  ;;  %2585 = vmatpush.msra.mxu0 %v2521_v34  ;;  %v2546_v34 = vld [vmem:[#allocation8 + $0x138] sm:$0xff] }
 0x247   : > { %v5249_v24 = vadd.f32 %v1828_v37, %v1764_v18  ;;  %v2553_v37 = vld [vmem:[#allocation8 + $0x170] sm:$0xff]  ;;  %v2522_v18 = vld [vmem:[#allocation8 + $0x78] sm:$0xff] }
 0x248   : > { %v2005_v16 = vadd.f32 %v5240_v35, %v5237_v48  ;;  %v2058_v19 = vmul.f32 %v5240_v35, %v5240_v35  ;;  %2650 = vmatpush.msra.mxu1 %v2553_v37  ;;  %2715 = vmatpush.msra.mxu2 %v2522_v18  ;;  %v2511_v37 = vld [vmem:[#allocation8 + $0x20] sm:$0xff] }
 0x249   : > { %v2059_v1 = vmul.f32 %v5249_v24, %v5249_v24 }
 0x24a   : > { %2006 = vadd.xlane.f32.xlu2 %v2005_v16  ;;  %v2101_v27 = vadd.f32 %v2058_v19, %v2057_v15  ;;  %v2554_v15 = vld [vmem:[#allocation8 + $0x178] sm:$0xff] }
 0x24b   : > { %v1893_v31 = vpop.f32.mrf.mxu2  ;;  %v1958_v32 = vpop.f32.mrf.mxu3  ;;  %2780 = vmatpush.msra.mxu3 %v2554_v15  ;;  %v2543_v15 = vld [vmem:[#allocation8 + $0x120] sm:$0xff] }
 0x24c   : > { %v1894_v56 = vadd.f32 %v1893_v31, %v5091_v7  ;;  %2102 = vadd.xlane.f32.xlu0 %v2101_v27  ;;  %v1766_v59 = vpop.f32.mrf.mxu0  ;;  %v1831_v44 = vpop.f32.mrf.mxu1  ;;  %v2519_v27 = vld [vmem:[#allocation8 + $0x60] sm:$0xff] }
 0x24d   : > { %v1767_v23 = vadd.f32 %v1766_v59, %v5088_v28  ;;  %v2551_v31 = vld [vmem:[#allocation8 + $0x160] sm:$0xff]  ;;  %2586 = vmatpush.msra.mxu0 %v2519_v27  ;;  %v2517_v59 = vld [vmem:[#allocation8 + $0x50] sm:$0xff]  ;;  %2781 = vmatpush.msra.mxu3 %v2552_v20 }
 0x24e   : > { %v5252_v62 = vadd.f32 %v1958_v32, %v1894_v56  ;;  %v2520_v32 = vld [vmem:[#allocation8 + $0x68] sm:$0xff]  ;;  %2651 = vmatpush.msra.mxu1 %v2551_v31 }
 0x24f   : > { %v5261_v8 = vadd.f32 %v1831_v44, %v1767_v23  ;;  %2716 = vmatpush.msra.mxu2 %v2520_v32  ;;  %v2518_v23 = vld [vmem:[#allocation8 + $0x58] sm:$0xff]  ;;  %2587 = vmatpush.msra.mxu0 %v2517_v59  ;;  %v2513_v44 = vld [vmem:[#allocation8 + $0x30] sm:$0xff]  ;;  %v2544_v31 = vld [vmem:[#allocation8 + $0x128] sm:$0xff] }
 0x250   : > { %v2008_v4 = vadd.f32 %v5252_v62, %v5249_v24  ;;  %v2060_v54 = vmul.f32 %v5252_v62, %v5252_v62  ;;  %2652 = vmatpush.msra.mxu1 %v2549_v38  ;;  %2782 = vmatpush.msra.mxu3 %v2550_v0  ;;  %v2509_v59 = vld [vmem:[#allocation8 + $0x10] sm:$0xff]  ;;  %v2507_v0 = vld [vmem:[#allocation8] sm:$0xff] }
 0x251   : > { %v2061_v56 = vmul.f32 %v5261_v8, %v5261_v8  ;;  %2717 = vmatpush.msra.mxu2 %v2518_v23  ;;  %2588 = vmatpush.msra.mxu0 %v2515_v41  ;;  %v2541_v38 = vld [vmem:[#allocation8 + $0x110] sm:$0xff]  ;;  %v2542_v23 = vld [vmem:[#allocation8 + $0x118] sm:$0xff] }
 0x252   : > { %2009 = vadd.xlane.f32.xlu1 %v2008_v4  ;;  %v2104_v33 = vadd.f32 %v2060_v54, %v2059_v1  ;;  %v2547_v4 = vld [vmem:[#allocation8 + $0x140] sm:$0xff]  ;;  %v2516_v1 = vld [vmem:[#allocation8 + $0x48] sm:$0xff]  ;;  %2783 = vmatpush.msra.mxu3 %v2548_v3 }
 0x253   : > { %v1896_v58 = vpop.f32.mrf.mxu2  ;;  %v1961_v13 = vpop.f32.mrf.mxu3  ;;  %2653 = vmatpush.msra.mxu1 %v2547_v4  ;;  %2718 = vmatpush.msra.mxu2 %v2516_v1  ;;  %v2508_v4 = vld [vmem:[#allocation8 + $0x8] sm:$0xff] }
 0x254   : > { %v1897_v16 = vadd.f32 %v1896_v58, %v5091_v7  ;;  %2105 = vadd.xlane.f32.xlu2 %v2104_v33  ;;  %v1769_v19 = vpop.f32.mrf.mxu0  ;;  %v1834_v54 = vpop.f32.mrf.mxu1  ;;  %v2545_v33 = vld [vmem:[#allocation8 + $0x130] sm:$0xff]  ;;  %2589 = vmatpush.msra.mxu0 %v2513_v44  ;;  %v2540_v1 = vld [vmem:[#allocation8 + $0x108] sm:$0xff] }
 0x255   : > { %v1770_v2 = vadd.f32 %v1769_v19, %v5088_v28  ;;  %v2512_v19 = vld [vmem:[#allocation8 + $0x28] sm:$0xff]  ;;  %2654 = vmatpush.msra.mxu1 %v2545_v33  ;;  %2719 = vmatpush.msra.mxu2 %v2514_v29 }
 0x256   : > { %v5264_v21 = vadd.f32 %v1961_v13, %v1897_v16  ;;  %2784 = vmatpush.msra.mxu3 %v2546_v34  ;;  %2590 = vmatpush.msra.mxu0 %v2511_v37 }
 0x257   : > { %v5273_v60 = vadd.f32 %v1834_v54, %v1770_v2  ;;  %2655 = vmatpush.msra.mxu1 %v2543_v15  ;;  %2720 = vmatpush.msra.mxu2 %v2512_v19 }
 0x258   : > { %v2011_v25 = vadd.f32 %v5264_v21, %v5261_v8  ;;  %v2062_v61 = vmul.f32 %v5264_v21, %v5264_v21  ;;  %2785 = vmatpush.msra.mxu3 %v2544_v31  ;;  %2591 = vmatpush.msra.mxu0 %v2509_v59 }
 0x259   : > { %v2063_v20 = vmul.f32 %v5273_v60, %v5273_v60  ;;  %2656 = vmatpush.msra.mxu1 %v2541_v38 }
 0x25a   : > { %2012 = vadd.xlane.f32.xlu0 %v2011_v25  ;;  %v2107_v46 = vadd.f32 %v2062_v61, %v2061_v56  ;;  %v2510_v25 = vld [vmem:[#allocation8 + $0x18] sm:$0xff]  ;;  %2786 = vmatpush.msra.mxu3 %v2542_v23 }
 0x25b   : > { %v1899_v28 = vpop.f32.mrf.mxu2  ;;  %v1964_v58 = vpop.f32.mrf.mxu3  ;;  %2721 = vmatpush.msra.mxu2 %v2510_v25  ;;  %2592 = vmatpush.msra.mxu0 %v2507_v0 }
 0x25c   : > { %v1900_v63 = vadd.f32 %v1899_v28, %v5091_v7  ;;  %2108 = vadd.xlane.f32.xlu1 %v2107_v46  ;;  %v2539_v46 = vld [vmem:[#allocation8 + $0x100] sm:$0xff]  ;;  %2787 = vmatpush.msra.mxu3 %v2540_v1 }
 0x25d   : > { %v1971_v49 = vpop.xlane.xlu2 %1970  ;;  %2657 = vmatpush.msra.mxu1 %v2539_v46  ;;  %2722 = vmatpush.msra.mxu2 %v2508_v4 }
 0x25e   : > { %v5276_v13 = vmul.f32 0.00390625, %v1971_v49  ;;  %v5278_v18 = vadd.f32 %v1964_v58, %v1900_v63 }
 0x25f   : > { %v2067_v16 = vpop.xlane.xlu0 %2066 }
 0x260   : > { %v2129_v7 = vmul.f32 %v5276_v13, %v5276_v13  ;;  %v2113_v27 = vmul.f32 0.00390625, %v2067_v16  ;;  %v2014_v32 = vadd.f32 %v5278_v18, %v5273_v60  ;;  %v2064_v56 = vmul.f32 %v5278_v18, %v5278_v18 }
 0x261   : > { %v2338_v23 = vsub.f32 %v5096_v45, %v5276_v13 }
 0x262   : > { %v2145_v2 = vsub.f32 %v2113_v27, %v2129_v7  ;;  %2015 = vadd.xlane.f32.xlu2 %v2014_v32  ;;  %v2110_v61 = vadd.f32 %v2064_v56, %v2063_v20  ;;  %v1967_v27 = vld [vmem:[#allocation3] sm:$0x3]  ;;  %v1968_v56 = vld [vmem:[#allocation6] sm:$0x3] }
 0x263   : > { %v5296_v38 = vperm.slane %v1967_v27, 0 }
 0x264   : > { %v2161_v41 = vadd.f32 1e-05, %v2145_v2  ;;  %2111 = vadd.xlane.f32.xlu0 %v2110_v61  ;;  %v5298_v2 = vperm.slane %v1967_v27, 1  ;;  %v2337_v61 = vsub.f32 %v5093_v42, %v5276_v13 }
 0x265   : > { %v1974_v54 = vpop.xlane.xlu1 %1973 }
 0x266   : > { %3775 = vrsqrt.f32 %v2161_v41  ;;  %v5288_v28 = vmul.f32 0.00390625, %v1974_v54  ;;  %vm2183_vm5 = vweird.f32 %v2161_v41 }
 0x267   : > { %v2070_v3 = vpop.xlane.xlu2 %2069 }
 0x268   : > { %v2130_v44 = vmul.f32 %v5288_v28, %v5288_v28  ;;  %v2114_v63 = vmul.f32 0.00390625, %v2070_v3  ;;  %v5308_v3 = vperm.slane %v1968_v56, 0 }
 0x26a   : > { %v2146_v49 = vsub.f32 %v2114_v63, %v2130_v44  ;;  %v5310_v44 = vperm.slane %v1968_v56, 1 }
 0x26c   : > { %v3776_v33 = vpop.eup %3775  ;;  %v2162_v58 = vadd.f32 1e-05, %v2146_v49 }
 0x26d   : > { %v2178_v29 = vmul.f32 %v3776_v33, %v2161_v41  ;;  %v1977_v34 = vpop.xlane.xlu0 %1976  ;;  %vm2184_vm4 = vweird.f32 %v3776_v33 }
 0x26e   : > { %3777 = vrsqrt.f32 %v2162_v58  ;;  %v5292_v16 = vmul.f32 0.00390625, %v1977_v34  ;;  %vm2185_vm6 = vmor %vm2183_vm5, %vm2184_vm4  ;;  %vm2193_vm8 = vweird.f32 %v2162_v58 }
 0x26f   : > { %v2179_v37 = vmul.f32 %v3776_v33, %v2178_v29  ;;  %v2073_v15 = vpop.xlane.xlu1 %2072 }
 0x270   : > { %v2115_v7 = vmul.f32 0.00390625, %v2073_v15  ;;  %v2131_v31 = vmul.f32 %v5292_v16, %v5292_v16 }
 0x271   : > { %v2180_v19 = vmul.f32 0.5, %v2179_v37 }
 0x272   : > { %v2147_v20 = vsub.f32 %v2115_v7, %v2131_v31 }
 0x273   : > { %v2181_v32 = vsub.f32 1.5, %v2180_v19 }
 0x274   : > { %v3778_v59 = vpop.eup %3777  ;;  %v5304_v46 = vadd.f32 1e-05, %v2147_v20 }
 0x275   : > { %v2182_v25 = vmul.f32 %v3776_v33, %v2181_v32  ;;  %v2188_v0 = vmul.f32 %v3778_v59, %v2162_v58  ;;  %v1980_v4 = vpop.xlane.xlu2 %1979  ;;  %vm2194_vm7 = vweird.f32 %v3778_v59 }
 0x276   : > { %v5306_v54 = vmul.f32 0.00390625, %v1980_v4  ;;  %3779 = vrsqrt.f32 %v5304_v46  ;;  %vm2195_vm9 = vmor %vm2193_vm8, %vm2194_vm7  ;;  %v2340_v4 = vsub.f32 %v5108_v50, %v5288_v28  ;;  %vm2203_vm11 = vweird.f32 %v5304_v46 }
 0x277   : > { %v2186_v1 = vsel %vm2185_vm6, %v3776_v33, %v2182_v25  ;;  %v2189_v49 = vmul.f32 %v3778_v59, %v2188_v0  ;;  %v2076_v42 = vpop.xlane.xlu0 %2075  ;;  %v2339_v0 = vsub.f32 %v5105_v9, %v5288_v28 }
 0x278   : > { %v2369_v63 = vmul.f32 %v2337_v61, %v2186_v1  ;;  %v2370_v41 = vmul.f32 %v2338_v23, %v2186_v1  ;;  %v2132_v45 = vmul.f32 %v5306_v54, %v5306_v54  ;;  %v2116_v34 = vmul.f32 0.00390625, %v2076_v42 }
 0x279   : > { %v2190_v33 = vmul.f32 0.5, %v2189_v49 }
 0x27a   : > { %v2406_v13 = vmul.f32 %v5296_v38, %v2369_v63  ;;  %v2407_v29 = vmul.f32 %v5298_v2, %v2370_v41  ;;  %v2148_v15 = vsub.f32 %v2116_v34, %v2132_v45 }
 0x27b   : > { %v2191_v37 = vsub.f32 1.5, %v2190_v33 }
 0x27c   : > { %v2443_v19 = vadd.f32 %v5308_v3, %v2406_v13  ;;  %v2444_v7 = vadd.f32 %v5310_v44, %v2407_v29  ;;  %v3780_v27 = vpop.eup %3779  ;;  %v5319_v32 = vadd.f32 1e-05, %v2148_v15 }
 0x27d   : > { %v2192_v31 = vmul.f32 %v3778_v59, %v2191_v37  ;;  %v1983_v20 = vpop.xlane.xlu1 %1982  ;;  %v2198_v61 = vmul.f32 %v3780_v27, %v5304_v46  ;;  %vm2204_vm10 = vweird.f32 %v3780_v27 }
 0x27e   : > { %v2475_v56 = vmax.f32 %v2443_v19, 0.0  ;;  %v2476_v25 = vmax.f32 %v2444_v7, 0.0  ;;  %v5322_v23 = vmul.f32 0.00390625, %v1983_v20  ;;  %3781 = vrsqrt.f32 %v5319_v32  ;;  %vm2205_vm12 = vmor %vm2203_vm11, %vm2204_vm10 }
 0x27f   : > { %v2079_v58 = vpop.xlane.xlu2 %2078  ;;  %v2196_v1 = vsel %vm2195_vm9, %v3778_v59, %v2192_v31  ;;  %v2199_v63 = vmul.f32 %v3780_v27, %v2198_v61  ;;  %v2341_v61 = vsub.f32 %v5117_v6, %v5292_v16  ;;  %vm2213_vm14 = vweird.f32 %v5319_v32 }
 0x280   : > { %2593 = vmatmul.f32.vlgmr.msra.gmra.mxu0 %v2475_v56  ;;  %2658 = vmatmul.f32.vlgmr.msra.gmra.mxu1 %v2476_v25  ;;  %v2117_v41 = vmul.f32 0.00390625, %v2079_v58  ;;  %v2133_v49 = vmul.f32 %v5322_v23, %v5322_v23  ;;  %v2371_v42 = vmul.f32 %v2339_v0, %v2196_v1  ;;  %v2372_v45 = vmul.f32 %v2340_v4, %v2196_v1 }
 0x281   : > { %2723 = vmatmul.f32.vlgmr.msra.gmra.mxu2 %v2475_v56  ;;  %2788 = vmatmul.f32.vlgmr.msra.gmra.mxu3 %v2476_v25  ;;  %v2200_v13 = vmul.f32 0.5, %v2199_v63  ;;  %v2342_v0 = vsub.f32 %v5120_v40, %v5292_v16 }
 0x282   : > { %v2149_v9 = vsub.f32 %v2117_v41, %v2133_v49  ;;  %v2408_v29 = vmul.f32 %v5296_v38, %v2371_v42  ;;  %v2409_v50 = vmul.f32 %v5298_v2, %v2372_v45 }
 0x283   : > { %v2201_v28 = vsub.f32 1.5, %v2200_v13 }
 0x284   : > { %v3782_v33 = vpop.eup %3781  ;;  %v5333_v34 = vadd.f32 1e-05, %v2149_v9  ;;  %v2445_v37 = vadd.f32 %v5308_v3, %v2408_v29  ;;  %v2446_v15 = vadd.f32 %v5310_v44, %v2409_v50 }
 0x285   : > { %v1986_v59 = vpop.xlane.xlu0 %1985  ;;  %v2202_v19 = vmul.f32 %v3780_v27, %v2201_v28  ;;  %v2208_v7 = vmul.f32 %v3782_v33, %v5319_v32  ;;  %vm2214_vm13 = vweird.f32 %v3782_v33 }
 0x286   : > { %v5338_v31 = vmul.f32 0.00390625, %v1986_v59  ;;  %3783 = vrsqrt.f32 %v5333_v34  ;;  %v2477_v56 = vmax.f32 %v2445_v37, 0.0  ;;  %v2478_v25 = vmax.f32 %v2446_v15, 0.0  ;;  %vm2215_vm15 = vmor %vm2213_vm14, %vm2214_vm13 }
 0x287   : > { %v2082_v20 = vpop.xlane.xlu1 %2081  ;;  %v2209_v4 = vmul.f32 %v3782_v33, %v2208_v7  ;;  %v2206_v46 = vsel %vm2205_vm12, %v3780_v27, %v2202_v19  ;;  %v2343_v15 = vsub.f32 %v5129_v57, %v5306_v54  ;;  %v2344_v19 = vsub.f32 %v5132_v5, %v5306_v54 }
 0x288   : > { %v2118_v58 = vmul.f32 0.00390625, %v2082_v20  ;;  %v2134_v1 = vmul.f32 %v5338_v31, %v5338_v31  ;;  %2596 = vmatmul.f32.gmra.mxu0 %v2477_v56  ;;  %2661 = vmatmul.f32.gmra.mxu1 %v2478_v25  ;;  %v2373_v41 = vmul.f32 %v2341_v61, %v2206_v46  ;;  %v2374_v49 = vmul.f32 %v2342_v0, %v2206_v46 }
 0x289   : > { %v2210_v63 = vmul.f32 0.5, %v2209_v4  ;;  %2726 = vmatmul.f32.gmra.mxu2 %v2477_v56  ;;  %2791 = vmatmul.f32.gmra.mxu3 %v2478_v25  ;;  %vm2223_vm1 = vweird.f32 %v5333_v34 }
 0x28a   : > { %v2150_v42 = vsub.f32 %v2118_v58, %v2134_v1  ;;  %v2410_v45 = vmul.f32 %v5296_v38, %v2373_v41  ;;  %v2411_v40 = vmul.f32 %v5298_v2, %v2374_v49 }
 0x28b   : > { %v2211_v6 = vsub.f32 1.5, %v2210_v63 }
 0x28c   : > { %v3784_v16 = vpop.eup %3783  ;;  %v5351_v13 = vadd.f32 1e-05, %v2150_v42  ;;  %v2447_v59 = vadd.f32 %v5308_v3, %v2410_v45  ;;  %v2448_v37 = vadd.f32 %v5310_v44, %v2411_v40 }
 0x28d   : > { %v1989_v9 = vpop.xlane.xlu2 %1988  ;;  %v2212_v29 = vmul.f32 %v3782_v33, %v2211_v6  ;;  %v2218_v50 = vmul.f32 %v3784_v16, %v5333_v34  ;;  %vm2224_vm0 = vweird.f32 %v3784_v16 }
 0x28e   : > { %v5354_v27 = vmul.f32 0.00390625, %v1989_v9  ;;  %3785 = vrsqrt.f32 %v5351_v13  ;;  %v2479_v32 = vmax.f32 %v2447_v59, 0.0  ;;  %v2480_v25 = vmax.f32 %v2448_v37, 0.0  ;;  %vm2225_vm2 = vmor %vm2223_vm1, %vm2224_vm0 }
 0x28f   : > { %v2085_v28 = vpop.xlane.xlu0 %2084  ;;  %v2219_v7 = vmul.f32 %v3784_v16, %v2218_v50  ;;  %v2216_v61 = vsel %vm2215_vm15, %v3782_v33, %v2212_v29  ;;  %v2345_v9 = vsub.f32 %v5141_v36, %v5322_v23  ;;  %v2346_v29 = vsub.f32 %v5144_v53, %v5322_v23 }
 0x290   : > { %v2135_v20 = vmul.f32 %v5354_v27, %v5354_v27  ;;  %v2119_v56 = vmul.f32 0.00390625, %v2085_v28  ;;  %v2375_v4 = vmul.f32 %v2343_v15, %v2216_v61  ;;  %v2376_v58 = vmul.f32 %v2344_v19, %v2216_v61  ;;  %2599 = vmatmul.f32.gmra.mxu0 %v2479_v32  ;;  %2664 = vmatmul.f32.gmra.mxu1 %v2480_v25 }
 0x291   : > { %v2220_v0 = vmul.f32 0.5, %v2219_v7  ;;  %2729 = vmatmul.f32.gmra.mxu2 %v2479_v32  ;;  %2794 = vmatmul.f32.gmra.mxu3 %v2480_v25  ;;  %vm2233_vm4 = vweird.f32 %v5351_v13 }
 0x292   : > { %v2151_v1 = vsub.f32 %v2119_v56, %v2135_v20  ;;  %v2412_v57 = vmul.f32 %v5296_v38, %v2375_v4  ;;  %v2413_v5 = vmul.f32 %v5298_v2, %v2376_v58 }
 0x293   : > { %v2221_v46 = vsub.f32 1.5, %v2220_v0 }
 0x294   : > { %v3786_v54 = vpop.eup %3785  ;;  %v5368_v63 = vadd.f32 1e-05, %v2151_v1  ;;  %v2449_v45 = vadd.f32 %v5308_v3, %v2412_v57  ;;  %v2450_v40 = vadd.f32 %v5310_v44, %v2413_v5  ;;  %v2347_v57 = vsub.f32 %v5153_v11, %v5338_v31 }
 0x295   : > { %v1992_v41 = vpop.xlane.xlu1 %1991  ;;  %v2222_v49 = vmul.f32 %v3784_v16, %v2221_v46  ;;  %v2228_v33 = vmul.f32 %v3786_v54, %v5351_v13  ;;  %vm2234_vm3 = vweird.f32 %v3786_v54  ;;  %v2348_v5 = vsub.f32 %v5156_v22, %v5338_v31 }
 0x296   : > { %v5371_v42 = vmul.f32 0.00390625, %v1992_v41  ;;  %3787 = vrsqrt.f32 %v5368_v63  ;;  %v2481_v34 = vmax.f32 %v2449_v45, 0.0  ;;  %v2482_v37 = vmax.f32 %v2450_v40, 0.0  ;;  %vm2235_vm5 = vmor %vm2233_vm4, %vm2234_vm3 }
 0x297   : > { %v2088_v6 = vpop.xlane.xlu2 %2087  ;;  %v2229_v50 = vmul.f32 %v3786_v54, %v2228_v33  ;;  %v2226_v15 = vsel %vm2225_vm2, %v3784_v16, %v2222_v49  ;;  %vm2243_vm7 = vweird.f32 %v5368_v63 }
 0x298   : > { %v2120_v28 = vmul.f32 0.00390625, %v2088_v6  ;;  %v2136_v59 = vmul.f32 %v5371_v42, %v5371_v42  ;;  %v2377_v7 = vmul.f32 %v2345_v9, %v2226_v15  ;;  %v2378_v20 = vmul.f32 %v2346_v29, %v2226_v15  ;;  %2602 = vmatmul.f32.gmra.mxu0 %v2481_v34  ;;  %2667 = vmatmul.f32.gmra.mxu1 %v2482_v37 }
 0x299   : > { %v2230_v19 = vmul.f32 0.5, %v2229_v50  ;;  %2732 = vmatmul.f32.gmra.mxu2 %v2481_v34  ;;  %2797 = vmatmul.f32.gmra.mxu3 %v2482_v37 }
 0x29a   : > { %v2152_v56 = vsub.f32 %v2120_v28, %v2136_v59  ;;  %v2414_v36 = vmul.f32 %v5296_v38, %v2377_v7  ;;  %v2415_v53 = vmul.f32 %v5298_v2, %v2378_v20 }
 0x29b   : > { %v2231_v32 = vsub.f32 1.5, %v2230_v19 }
 0x29c   : > { %v3788_v23 = vpop.eup %3787  ;;  %v5385_v25 = vadd.f32 1e-05, %v2152_v56  ;;  %v2451_v1 = vadd.f32 %v5308_v3, %v2414_v36  ;;  %v2452_v46 = vadd.f32 %v5310_v44, %v2415_v53  ;;  %v2349_v56 = vsub.f32 %v5165_v10, %v5354_v27 }
 0x29d   : > { %v1995_v61 = vpop.xlane.xlu0 %1994  ;;  %v2232_v0 = vmul.f32 %v3786_v54, %v2231_v32  ;;  %v2238_v16 = vmul.f32 %v3788_v23, %v5368_v63  ;;  %vm2244_vm6 = vweird.f32 %v3788_v23  ;;  %v2350_v32 = vsub.f32 %v5168_v14, %v5354_v27 }
 0x29e   : > { %v5388_v4 = vmul.f32 0.00390625, %v1995_v61  ;;  %3789 = vrsqrt.f32 %v5385_v25  ;;  %v2483_v13 = vmax.f32 %v2451_v1, 0.0  ;;  %v2484_v6 = vmax.f32 %v2452_v46, 0.0  ;;  %vm2245_vm8 = vmor %vm2243_vm7, %vm2244_vm6 }
 0x29f   : > { %v2091_v58 = vpop.xlane.xlu1 %2090  ;;  %v2239_v41 = vmul.f32 %v3788_v23, %v2238_v16  ;;  %v2236_v45 = vsel %vm2235_vm5, %v3786_v54, %v2232_v0  ;;  %vm2253_vm10 = vweird.f32 %v5385_v25 }
 0x2a0   : > { %v2121_v49 = vmul.f32 0.00390625, %v2091_v58  ;;  %v2137_v33 = vmul.f32 %v5388_v4, %v5388_v4  ;;  %v2379_v9 = vmul.f32 %v2347_v57, %v2236_v45  ;;  %v2380_v29 = vmul.f32 %v2348_v5, %v2236_v45  ;;  %2605 = vmatmul.f32.gmra.mxu0 %v2483_v13  ;;  %2670 = vmatmul.f32.gmra.mxu1 %v2484_v6 }
 0x2a1   : > { %v2240_v40 = vmul.f32 0.5, %v2239_v41  ;;  %2735 = vmatmul.f32.gmra.mxu2 %v2483_v13  ;;  %2800 = vmatmul.f32.gmra.mxu3 %v2484_v6 }
 0x2a2   : > { %v2153_v50 = vsub.f32 %v2121_v49, %v2137_v33  ;;  %v2416_v11 = vmul.f32 %v5296_v38, %v2379_v9  ;;  %v2417_v22 = vmul.f32 %v5298_v2, %v2380_v29  ;;  %v2351_v9 = vsub.f32 %v5177_v17, %v5371_v42 }
 0x2a3   : > { %v2241_v28 = vsub.f32 1.5, %v2240_v40  ;;  %v2352_v29 = vsub.f32 %v5180_v30, %v5371_v42 }
 0x2a4   : > { %v3790_v31 = vpop.eup %3789  ;;  %v5402_v59 = vadd.f32 1e-05, %v2153_v50  ;;  %v2453_v7 = vadd.f32 %v5308_v3, %v2416_v11  ;;  %v2454_v20 = vadd.f32 %v5310_v44, %v2417_v22 }
 0x2a5   : > { %v1998_v34 = vpop.xlane.xlu2 %1997  ;;  %v2242_v37 = vmul.f32 %v3788_v23, %v2241_v28  ;;  %v2248_v54 = vmul.f32 %v3790_v31, %v5385_v25  ;;  %vm2254_vm9 = vweird.f32 %v3790_v31 }
 0x2a6   : > { %v5405_v15 = vmul.f32 0.00390625, %v1998_v34  ;;  %3791 = vrsqrt.f32 %v5402_v59  ;;  %v2485_v63 = vmax.f32 %v2453_v7, 0.0  ;;  %v2486_v0 = vmax.f32 %v2454_v20, 0.0  ;;  %vm2255_vm11 = vmor %vm2253_vm10, %vm2254_vm9 }
 0x2a7   : > { %v2094_v19 = vpop.xlane.xlu0 %2093  ;;  %v2249_v36 = vmul.f32 %v3790_v31, %v2248_v54  ;;  %v2246_v16 = vsel %vm2245_vm8, %v3788_v23, %v2242_v37  ;;  %vm2263_vm13 = vweird.f32 %v5402_v59 }
 0x2a8   : > { %v2138_v53 = vmul.f32 %v5405_v15, %v5405_v15  ;;  %v2122_v61 = vmul.f32 0.00390625, %v2094_v19  ;;  %v2381_v1 = vmul.f32 %v2349_v56, %v2246_v16  ;;  %v2382_v46 = vmul.f32 %v2350_v32, %v2246_v16  ;;  %2608 = vmatmul.f32.gmra.mxu0 %v2485_v63  ;;  %2673 = vmatmul.f32.gmra.mxu1 %v2486_v0 }
 0x2a9   : > { %v2250_v58 = vmul.f32 0.5, %v2249_v36  ;;  %2738 = vmatmul.f32.gmra.mxu2 %v2485_v63  ;;  %2803 = vmatmul.f32.gmra.mxu3 %v2486_v0  ;;  %v2353_v16 = vsub.f32 %v5189_v26, %v5388_v4 }
 0x2aa   : > { %v2154_v57 = vsub.f32 %v2122_v61, %v2138_v53  ;;  %v2418_v10 = vmul.f32 %v5296_v38, %v2381_v1  ;;  %v2419_v14 = vmul.f32 %v5298_v2, %v2382_v46 }
 0x2ab   : > { %v2251_v5 = vsub.f32 1.5, %v2250_v58  ;;  %v2354_v58 = vsub.f32 %v5192_v43, %v5388_v4 }
 0x2ac   : > { %v3792_v27 = vpop.eup %3791  ;;  %v5419_v41 = vadd.f32 1e-05, %v2154_v57  ;;  %v2455_v45 = vadd.f32 %v5308_v3, %v2418_v10  ;;  %v2456_v40 = vadd.f32 %v5310_v44, %v2419_v14 }
 0x2ad   : > { %v2001_v49 = vpop.xlane.xlu1 %2000  ;;  %v2252_v33 = vmul.f32 %v3790_v31, %v2251_v5  ;;  %v2258_v23 = vmul.f32 %v3792_v27, %v5402_v59  ;;  %vm2264_vm12 = vweird.f32 %v3792_v27 }
 0x2ae   : > { %v5422_v13 = vmul.f32 0.00390625, %v2001_v49  ;;  %3793 = vrsqrt.f32 %v5419_v41  ;;  %v2487_v25 = vmax.f32 %v2455_v45, 0.0  ;;  %v2488_v22 = vmax.f32 %v2456_v40, 0.0  ;;  %vm2265_vm14 = vmor %vm2263_vm13, %vm2264_vm12 }
 0x2af   : > { %v2097_v6 = vpop.xlane.xlu2 %2096  ;;  %v2259_v50 = vmul.f32 %v3792_v27, %v2258_v23  ;;  %v2256_v34 = vsel %vm2255_vm11, %v3790_v31, %v2252_v33  ;;  %vm2273_vm0 = vweird.f32 %v5419_v41 }
 0x2b0   : > { %v2123_v28 = vmul.f32 0.00390625, %v2097_v6  ;;  %v2139_v11 = vmul.f32 %v5422_v13, %v5422_v13  ;;  %v2383_v54 = vmul.f32 %v2351_v9, %v2256_v34  ;;  %v2384_v19 = vmul.f32 %v2352_v29, %v2256_v34  ;;  %2611 = vmatmul.f32.gmra.mxu0 %v2487_v25  ;;  %2676 = vmatmul.f32.gmra.mxu1 %v2488_v22 }
 0x2b1   : > { %v2260_v37 = vmul.f32 0.5, %v2259_v50  ;;  %2741 = vmatmul.f32.gmra.mxu2 %v2487_v25  ;;  %2806 = vmatmul.f32.gmra.mxu3 %v2488_v22  ;;  %v2355_v25 = vsub.f32 %v5201_v12, %v5405_v15  ;;  %v2356_v22 = vsub.f32 %v5204_v39, %v5405_v15 }
 0x2b2   : > { %v2155_v7 = vsub.f32 %v2123_v28, %v2139_v11  ;;  %v2420_v17 = vmul.f32 %v5296_v38, %v2383_v54  ;;  %v2421_v30 = vmul.f32 %v5298_v2, %v2384_v19 }
 0x2b3   : > { %v2261_v20 = vsub.f32 1.5, %v2260_v37 }
 0x2b4   : > { %v3794_v42 = vpop.eup %3793  ;;  %v5436_v56 = vadd.f32 1e-05, %v2155_v7  ;;  %v2457_v63 = vadd.f32 %v5308_v3, %v2420_v17  ;;  %v2458_v0 = vadd.f32 %v5310_v44, %v2421_v30 }
 0x2b5   : > { %v2004_v32 = vpop.xlane.xlu0 %2003  ;;  %v2262_v36 = vmul.f32 %v3792_v27, %v2261_v20  ;;  %v2268_v31 = vmul.f32 %v3794_v42, %v5419_v41  ;;  %vm2274_vm15 = vweird.f32 %v3794_v42 }
 0x2b6   : > { %v5439_v53 = vmul.f32 0.00390625, %v2004_v32  ;;  %3795 = vrsqrt.f32 %v5436_v56  ;;  %v2489_v59 = vmax.f32 %v2457_v63, 0.0  ;;  %v2490_v5 = vmax.f32 %v2458_v0, 0.0  ;;  %vm2275_vm1 = vmor %vm2273_vm0, %vm2274_vm15 }
 0x2b7   : > { %v2100_v61 = vpop.xlane.xlu1 %2099  ;;  %v2269_v1 = vmul.f32 %v3794_v42, %v2268_v31  ;;  %v2266_v10 = vsel %vm2265_vm14, %v3792_v27, %v2262_v36  ;;  %vm2283_vm3 = vweird.f32 %v5436_v56 }
 0x2b8   : > { %v2124_v46 = vmul.f32 0.00390625, %v2100_v61  ;;  %v2140_v57 = vmul.f32 %v5439_v53, %v5439_v53  ;;  %v2385_v49 = vmul.f32 %v2353_v16, %v2266_v10  ;;  %v2386_v33 = vmul.f32 %v2354_v58, %v2266_v10  ;;  %2614 = vmatmul.f32.gmra.mxu0 %v2489_v59  ;;  %2679 = vmatmul.f32.gmra.mxu1 %v2490_v5 }
 0x2b9   : > { %v2270_v14 = vmul.f32 0.5, %v2269_v1  ;;  %2744 = vmatmul.f32.gmra.mxu2 %v2489_v59  ;;  %2809 = vmatmul.f32.gmra.mxu3 %v2490_v5 }
 0x2ba   : > { %v2156_v23 = vsub.f32 %v2124_v46, %v2140_v57  ;;  %v2422_v26 = vmul.f32 %v5296_v38, %v2385_v49  ;;  %v2423_v43 = vmul.f32 %v5298_v2, %v2386_v33  ;;  %v2357_v46 = vsub.f32 %v5213_v47, %v5422_v13 }
 0x2bb   : > { %v2271_v6 = vsub.f32 1.5, %v2270_v14  ;;  %v2358_v57 = vsub.f32 %v5216_v52, %v5422_v13 }
 0x2bc   : > { %v3796_v4 = vpop.eup %3795  ;;  %v5453_v45 = vadd.f32 1e-05, %v2156_v23  ;;  %v2459_v28 = vadd.f32 %v5308_v3, %v2422_v26  ;;  %v2460_v11 = vadd.f32 %v5310_v44, %v2423_v43 }
 0x2bd   : > { %v2007_v40 = vpop.xlane.xlu2 %2006  ;;  %v2272_v9 = vmul.f32 %v3794_v42, %v2271_v6  ;;  %v2278_v27 = vmul.f32 %v3796_v4, %v5436_v56  ;;  %vm2284_vm2 = vweird.f32 %v3796_v4 }
 0x2be   : > { %v5456_v29 = vmul.f32 0.00390625, %v2007_v40  ;;  %3797 = vrsqrt.f32 %v5453_v45  ;;  %v2491_v41 = vmax.f32 %v2459_v28, 0.0  ;;  %v2492_v19 = vmax.f32 %v2460_v11, 0.0  ;;  %vm2285_vm4 = vmor %vm2283_vm3, %vm2284_vm2 }
 0x2bf   : > { %v2103_v50 = vpop.xlane.xlu0 %2102  ;;  %v2279_v34 = vmul.f32 %v3796_v4, %v2278_v27  ;;  %v2276_v7 = vsel %vm2275_vm1, %v3794_v42, %v2272_v9  ;;  %vm2293_vm6 = vweird.f32 %v5453_v45 }
 0x2c0   : > { %v2141_v37 = vmul.f32 %v5456_v29, %v5456_v29  ;;  %v2125_v54 = vmul.f32 0.00390625, %v2103_v50  ;;  %v2387_v17 = vmul.f32 %v2355_v25, %v2276_v7  ;;  %v2388_v30 = vmul.f32 %v2356_v22, %v2276_v7  ;;  %2617 = vmatmul.f32.gmra.mxu0 %v2491_v41  ;;  %2682 = vmatmul.f32.gmra.mxu1 %v2492_v19 }
 0x2c1   : > { %v2280_v20 = vmul.f32 0.5, %v2279_v34  ;;  %2747 = vmatmul.f32.gmra.mxu2 %v2491_v41  ;;  %2812 = vmatmul.f32.gmra.mxu3 %v2492_v19  ;;  %v2359_v22 = vsub.f32 %v5225_v51, %v5439_v53  ;;  %v2360_v34 = vsub.f32 %v5228_v55, %v5439_v53 }
 0x2c2   : > { %v2157_v32 = vsub.f32 %v2125_v54, %v2141_v37  ;;  %v2424_v12 = vmul.f32 %v5296_v38, %v2387_v17  ;;  %v2425_v39 = vmul.f32 %v5298_v2, %v2388_v30 }
 0x2c3   : > { %v2281_v36 = vsub.f32 1.5, %v2280_v20 }
 0x2c4   : > { %v3798_v15 = vpop.eup %3797  ;;  %v5470_v31 = vadd.f32 1e-05, %v2157_v32  ;;  %v2461_v58 = vadd.f32 %v5308_v3, %v2424_v12  ;;  %v2462_v1 = vadd.f32 %v5310_v44, %v2425_v39 }
 0x2c5   : > { %v2010_v61 = vpop.xlane.xlu1 %2009  ;;  %v2282_v63 = vmul.f32 %v3796_v4, %v2281_v36  ;;  %v2288_v42 = vmul.f32 %v3798_v15, %v5453_v45  ;;  %vm2294_vm5 = vweird.f32 %v3798_v15 }
 0x2c6   : > { %v5473_v0 = vmul.f32 0.00390625, %v2010_v61  ;;  %3799 = vrsqrt.f32 %v5470_v31  ;;  %v2493_v56 = vmax.f32 %v2461_v58, 0.0  ;;  %v2494_v14 = vmax.f32 %v2462_v1, 0.0  ;;  %vm2295_vm7 = vmor %vm2293_vm6, %vm2294_vm5 }
 0x2c7   : > { %v2106_v16 = vpop.xlane.xlu2 %2105  ;;  %v2289_v59 = vmul.f32 %v3798_v15, %v2288_v42  ;;  %v2286_v49 = vsel %vm2285_vm4, %v3796_v4, %v2282_v63  ;;  %vm2303_vm9 = vweird.f32 %v5470_v31  ;;  %v2361_v1 = vsub.f32 %v5237_v48, %v5456_v29 }
 0x2c8   : > { %v2126_v5 = vmul.f32 0.00390625, %v2106_v16  ;;  %v2142_v10 = vmul.f32 %v5473_v0, %v5473_v0  ;;  %v2389_v23 = vmul.f32 %v2357_v46, %v2286_v49  ;;  %v2390_v6 = vmul.f32 %v2358_v57, %v2286_v49  ;;  %2620 = vmatmul.f32.gmra.mxu0 %v2493_v56  ;;  %2685 = vmatmul.f32.gmra.mxu1 %v2494_v14 }
 0x2c9   : > { %v2290_v33 = vmul.f32 0.5, %v2289_v59  ;;  %2750 = vmatmul.f32.gmra.mxu2 %v2493_v56  ;;  %2815 = vmatmul.f32.gmra.mxu3 %v2494_v14  ;;  %v2362_v46 = vsub.f32 %v5240_v35, %v5456_v29 }
 0x2ca   : > { %v2158_v26 = vsub.f32 %v2126_v5, %v2142_v10  ;;  %v2426_v47 = vmul.f32 %v5296_v38, %v2389_v23  ;;  %v2427_v52 = vmul.f32 %v5298_v2, %v2390_v6 }
 0x2cb   : > { %v2291_v43 = vsub.f32 1.5, %v2290_v33 }
 0x2cc   : > { %v3800_v13 = vpop.eup %3799  ;;  %v5487_v40 = vadd.f32 1e-05, %v2158_v26  ;;  %v2463_v11 = vadd.f32 %v5308_v3, %v2426_v47  ;;  %v2464_v25 = vadd.f32 %v5310_v44, %v2427_v52 }
 0x2cd   : > { %v2013_v9 = vpop.xlane.xlu0 %2012  ;;  %v2292_v27 = vmul.f32 %v3798_v15, %v2291_v43  ;;  %v2298_v4 = vmul.f32 %v3800_v13, %v5470_v31  ;;  %vm2304_vm8 = vweird.f32 %v3800_v13 }
 0x2ce   : > { %v5490_v50 = vmul.f32 0.00390625, %v2013_v9  ;;  %3801 = vrsqrt.f32 %v5487_v40  ;;  %v2495_v45 = vmax.f32 %v2463_v11, 0.0  ;;  %v2496_v19 = vmax.f32 %v2464_v25, 0.0  ;;  %vm2305_vm10 = vmor %vm2303_vm9, %vm2304_vm8 }
 0x2cf   : > { %v2109_v28 = vpop.xlane.xlu1 %2108  ;;  %v2299_v37 = vmul.f32 %v3800_v13, %v2298_v4  ;;  %v2296_v7 = vsel %vm2295_vm7, %v3798_v15, %v2292_v27  ;;  %vm2313_vm12 = vweird.f32 %v5487_v40  ;;  %v2364_v9 = vsub.f32 %v5252_v62, %v5473_v0 }
 0x2d0   : > { %v2127_v54 = vmul.f32 0.00390625, %v2109_v28  ;;  %v2143_v41 = vmul.f32 %v5490_v50, %v5490_v50  ;;  %v2391_v17 = vmul.f32 %v2359_v22, %v2296_v7  ;;  %v2392_v30 = vmul.f32 %v2360_v34, %v2296_v7  ;;  %2623 = vmatmul.f32.gmra.mxu0 %v2495_v45  ;;  %2688 = vmatmul.f32.gmra.mxu1 %v2496_v19 }
 0x2d1   : > { %v2300_v20 = vmul.f32 0.5, %v2299_v37  ;;  %2753 = vmatmul.f32.gmra.mxu2 %v2495_v45  ;;  %2818 = vmatmul.f32.gmra.mxu3 %v2496_v19  ;;  %v2365_v7 = vsub.f32 %v5261_v8, %v5490_v50 }
 0x2d2   : > { %v2159_v32 = vsub.f32 %v2127_v54, %v2143_v41  ;;  %v2428_v51 = vmul.f32 %v5296_v38, %v2391_v17  ;;  %v2429_v55 = vmul.f32 %v5298_v2, %v2392_v30 }
 0x2d3   : > { %v2301_v36 = vsub.f32 1.5, %v2300_v20  ;;  %v2366_v20 = vsub.f32 %v5264_v21, %v5490_v50 }
 0x2d4   : > { %v3802_v53 = vpop.eup %3801  ;;  %v5504_v12 = vadd.f32 1e-05, %v2159_v32  ;;  %v2465_v16 = vadd.f32 %v5308_v3, %v2428_v51  ;;  %v2466_v58 = vadd.f32 %v5310_v44, %v2429_v55 }
 0x2d5   : > { %v2016_v39 = vpop.xlane.xlu2 %2015  ;;  %v2302_v61 = vmul.f32 %v3800_v13, %v2301_v36  ;;  %v2308_v15 = vmul.f32 %v3802_v53, %v5487_v40  ;;  %vm2314_vm11 = vweird.f32 %v3802_v53 }
 0x2d6   : > { %v5507_v63 = vmul.f32 0.00390625, %v2016_v39  ;;  %3803 = vrsqrt.f32 %v5504_v12  ;;  %v2497_v31 = vmax.f32 %v2465_v16, 0.0  ;;  %v2498_v10 = vmax.f32 %v2466_v58, 0.0  ;;  %vm2315_vm13 = vmor %vm2313_vm12, %vm2314_vm11 }
 0x2d7   : > { %v2112_v42 = vpop.xlane.xlu0 %2111  ;;  %v2309_v57 = vmul.f32 %v3802_v53, %v2308_v15  ;;  %v2306_v56 = vsel %vm2305_vm10, %v3800_v13, %v2302_v61  ;;  %v2363_v13 = vsub.f32 %v5249_v24, %v5473_v0  ;;  %vm2323_vm15 = vweird.f32 %v5504_v12 }
 0x2d8   : > { %v2144_v59 = vmul.f32 %v5507_v63, %v5507_v63  ;;  %v2128_v5 = vmul.f32 0.00390625, %v2112_v42  ;;  %v2393_v49 = vmul.f32 %v2361_v1, %v2306_v56  ;;  %v2394_v33 = vmul.f32 %v2362_v46, %v2306_v56  ;;  %2626 = vmatmul.f32.gmra.mxu0 %v2497_v31  ;;  %2691 = vmatmul.f32.gmra.mxu1 %v2498_v10 }
 0x2d9   : > { %v2310_v14 = vmul.f32 0.5, %v2309_v57  ;;  %2756 = vmatmul.f32.gmra.mxu2 %v2497_v31  ;;  %2821 = vmatmul.f32.gmra.mxu3 %v2498_v10  ;;  %v2367_v15 = vsub.f32 %v5273_v60, %v5507_v63  ;;  %v2368_v42 = vsub.f32 %v5278_v18, %v5507_v63  ;;  %v2571_v18 = vld [vmem:[%s6255_s12] sm:$0x3] }
 0x2da   : > { %v2160_v23 = vsub.f32 %v2128_v5, %v2144_v59  ;;  %v2430_v48 = vmul.f32 %v5296_v38, %v2393_v49  ;;  %v2431_v35 = vmul.f32 %v5298_v2, %v2394_v33  ;;  %v5553_v56 = vperm.slane %v2571_v18, 0 }
 0x2db   : > { %v2311_v6 = vsub.f32 1.5, %v2310_v14 }
 0x2dc   : > { %v3804_v29 = vpop.eup %3803  ;;  %v2176_v26 = vadd.f32 1e-05, %v2160_v23  ;;  %v2467_v52 = vadd.f32 %v5308_v3, %v2430_v48  ;;  %v2468_v27 = vadd.f32 %v5310_v44, %v2431_v35 }
 0x2dd   : > { %v2312_v43 = vmul.f32 %v3802_v53, %v2311_v6  ;;  %v2318_v47 = vmul.f32 %v3804_v29, %v5504_v12  ;;  %vm2324_vm14 = vweird.f32 %v3804_v29 }
 0x2de   : > { %3805 = vrsqrt.f32 %v2176_v26  ;;  %v2499_v28 = vmax.f32 %v2467_v52, 0.0  ;;  %v2500_v25 = vmax.f32 %v2468_v27, 0.0  ;;  %vm2325_vm0 = vmor %vm2323_vm15, %vm2324_vm14  ;;  %vm2333_vm2 = vweird.f32 %v2176_v26 }
 0x2df   : > { %v2319_v4 = vmul.f32 %v3804_v29, %v2318_v47  ;;  %v2316_v11 = vsel %vm2315_vm13, %v3802_v53, %v2312_v43 }
 0x2e0   : > { %v2395_v22 = vmul.f32 %v2363_v13, %v2316_v11  ;;  %v2396_v40 = vmul.f32 %v2364_v9, %v2316_v11  ;;  %2629 = vmatmul.f32.gmra.mxu0 %v2499_v28  ;;  %2694 = vmatmul.f32.gmra.mxu1 %v2500_v25 }
 0x2e1   : > { %v2320_v34 = vmul.f32 0.5, %v2319_v4  ;;  %2759 = vmatmul.f32.gmra.mxu2 %v2499_v28  ;;  %2824 = vmatmul.f32.gmra.mxu3 %v2500_v25 }
 0x2e2   : > { %v2432_v37 = vmul.f32 %v5296_v38, %v2395_v22  ;;  %v2433_v24 = vmul.f32 %v5298_v2, %v2396_v40 }
 0x2e3   : > { %v2321_v54 = vsub.f32 1.5, %v2320_v34 }
 0x2e4   : > { %v3806_v62 = vpop.eup %3805  ;;  %v2469_v0 = vadd.f32 %v5308_v3, %v2432_v37  ;;  %v2470_v41 = vadd.f32 %v5310_v44, %v2433_v24 }
 0x2e5   : > { %v2322_v45 = vmul.f32 %v3804_v29, %v2321_v54  ;;  %v2328_v19 = vmul.f32 %v3806_v62, %v2176_v26  ;;  %vm2334_vm1 = vweird.f32 %v3806_v62 }
 0x2e6   : > { %v2501_v17 = vmax.f32 %v2469_v0, 0.0  ;;  %v2502_v30 = vmax.f32 %v2470_v41, 0.0  ;;  %vm2335_vm3 = vmor %vm2333_vm2, %vm2334_vm1 }
 0x2e7   : > { %v2329_v32 = vmul.f32 %v3806_v62, %v2328_v19  ;;  %v2326_v36 = vsel %vm2325_vm0, %v3804_v29, %v2322_v45 }
 0x2e8   : > { %v2397_v51 = vmul.f32 %v2365_v7, %v2326_v36  ;;  %v2398_v55 = vmul.f32 %v2366_v20, %v2326_v36  ;;  %2632 = vmatmul.f32.gmra.mxu0 %v2501_v17  ;;  %2697 = vmatmul.f32.gmra.mxu1 %v2502_v30 }
 0x2e9   : > { %v2330_v53 = vmul.f32 0.5, %v2329_v32  ;;  %2762 = vmatmul.f32.gmra.mxu2 %v2501_v17  ;;  %2827 = vmatmul.f32.gmra.mxu3 %v2502_v30 }
 0x2ea   : > { %v2434_v39 = vmul.f32 %v5296_v38, %v2397_v51  ;;  %v2435_v12 = vmul.f32 %v5298_v2, %v2398_v55 }
 0x2eb   : > { %v2331_v61 = vsub.f32 1.5, %v2330_v53 }
 0x2ec   : > { %v2471_v8 = vadd.f32 %v5308_v3, %v2434_v39  ;;  %v2472_v21 = vadd.f32 %v5310_v44, %v2435_v12 }
 0x2ed   : > { %v2332_v50 = vmul.f32 %v3806_v62, %v2331_v61 }
 0x2ee   : > { %v2503_v16 = vmax.f32 %v2471_v8, 0.0  ;;  %v2504_v58 = vmax.f32 %v2472_v21, 0.0 }
 0x2ef   : > { %v2336_v1 = vsel %vm2335_vm3, %v3806_v62, %v2332_v50 }
 0x2f0   : > { %v2399_v46 = vmul.f32 %v2367_v15, %v2336_v1  ;;  %v2400_v57 = vmul.f32 %v2368_v42, %v2336_v1  ;;  %2635 = vmatmul.f32.gmra.mxu0 %v2503_v16  ;;  %2700 = vmatmul.f32.gmra.mxu1 %v2504_v58 }
 0x2f1   : > { %2765 = vmatmul.f32.gmra.mxu2 %v2503_v16  ;;  %2830 = vmatmul.f32.gmra.mxu3 %v2504_v58 }
 0x2f2   : > { %v2436_v59 = vmul.f32 %v5296_v38, %v2399_v46  ;;  %v2437_v5 = vmul.f32 %v5298_v2, %v2400_v57 }
 0x2f4   : > { %v2473_v31 = vadd.f32 %v5308_v3, %v2436_v59  ;;  %v2474_v60 = vadd.f32 %v5310_v44, %v2437_v5  ;;  %v5558_v3 = vperm.slane %v2571_v18, 1 }
 0x2f6   : > { %v2505_v63 = vmax.f32 %v2473_v31, 0.0  ;;  %v2506_v10 = vmax.f32 %v2474_v60, 0.0 }
 0x2f8   : > { %2638 = vmatmul.f32.gmra.mxu0 %v2505_v63  ;;  %2703 = vmatmul.f32.gmra.mxu1 %v2506_v10 }
 0x2f9   : > { %2768 = vmatmul.f32.gmra.mxu2 %v2505_v63  ;;  %2833 = vmatmul.f32.gmra.mxu3 %v2506_v10 }
 0x2fd   : > { %v2594_v38 = vpop.f32.mrf.mxu0  ;;  %v2659_v2 = vpop.f32.mrf.mxu1 }
 0x2fe   : > { %v2595_v14 = vadd.f32 %v2594_v38, %v5553_v56 }
 0x300   : > { %v5556_v49 = vadd.f32 %v2659_v2, %v2595_v14 }
 0x302   : > { %6289 = vst [vmem:[#allocation23_spill] sm:$0xff] %v5556_v49 }
 0x304   : > { %v2724_v44 = vpop.f32.mrf.mxu2  ;;  %v2789_v33 = vpop.f32.mrf.mxu3 }
 0x305   : > { %v2725_v23 = vadd.f32 %v2724_v44, %v5558_v3  ;;  %v2597_v48 = vpop.f32.mrf.mxu0  ;;  %v2662_v35 = vpop.f32.mrf.mxu1 }
 0x306   : > { %v2598_v29 = vadd.f32 %v2597_v48, %v5553_v56 }
 0x307   : > { %v5561_v6 = vadd.f32 %v2789_v33, %v2725_v23 }
 0x308   : > { %v5564_v26 = vadd.f32 %v2662_v35, %v2598_v29 }
 0x309   : > { %6290 = vst [vmem:[#allocation24_spill] sm:$0xff] %v5561_v6 }
 0x30a   : > { %6291 = vst [vmem:[#allocation25_spill] sm:$0xff] %v5564_v26 }
 0x30c   : > { %v2727_v43 = vpop.f32.mrf.mxu2  ;;  %v2792_v47 = vpop.f32.mrf.mxu3 }
 0x30d   : > { %v2728_v52 = vadd.f32 %v2727_v43, %v5558_v3  ;;  %v2600_v9 = vpop.f32.mrf.mxu0  ;;  %v2665_v27 = vpop.f32.mrf.mxu1 }
 0x30e   : > { %v2601_v4 = vadd.f32 %v2600_v9, %v5553_v56 }
 0x30f   : > { %v5567_v13 = vadd.f32 %v2792_v47, %v2728_v52 }
 0x310   : > { %v5570_v28 = vadd.f32 %v2665_v27, %v2601_v4 }
 0x311   : > { %6292 = vst [vmem:[#allocation26_spill] sm:$0xff] %v5567_v13 }
 0x314   : > { %v2730_v11 = vpop.f32.mrf.mxu2  ;;  %v2795_v25 = vpop.f32.mrf.mxu3 }
 0x315   : > { %v2731_v22 = vadd.f32 %v2730_v11, %v5558_v3  ;;  %v2603_v40 = vpop.f32.mrf.mxu0  ;;  %v2668_v34 = vpop.f32.mrf.mxu1 }
 0x316   : > { %v2604_v37 = vadd.f32 %v2603_v40, %v5553_v56 }
 0x317   : > { %v5574_v24 = vadd.f32 %v2795_v25, %v2731_v22 }
 0x318   : > { %v5576_v54 = vadd.f32 %v2668_v34, %v2604_v37 }
 0x31c   : > { %v2733_v62 = vpop.f32.mrf.mxu2  ;;  %v2798_v0 = vpop.f32.mrf.mxu3 }
 0x31d   : > { %v2734_v41 = vadd.f32 %v2733_v62, %v5558_v3  ;;  %v2606_v45 = vpop.f32.mrf.mxu0  ;;  %v2671_v19 = vpop.f32.mrf.mxu1 }
 0x31e   : > { %v2607_v7 = vadd.f32 %v2606_v45, %v5553_v56 }
 0x31f   : > { %v5580_v20 = vadd.f32 %v2798_v0, %v2734_v41 }
 0x320   : > { %v5582_v17 = vadd.f32 %v2671_v19, %v2607_v7 }
 0x324   : > { %v2736_v30 = vpop.f32.mrf.mxu2  ;;  %v2801_v32 = vpop.f32.mrf.mxu3 }
 0x325   : > { %v2737_v36 = vadd.f32 %v2736_v30, %v5558_v3  ;;  %v2609_v51 = vpop.f32.mrf.mxu0  ;;  %v2674_v55 = vpop.f32.mrf.mxu1 }
 0x326   : > { %v2610_v53 = vadd.f32 %v2609_v51, %v5553_v56 }
 0x327   : > { %v5586_v39 = vadd.f32 %v2801_v32, %v2737_v36 }
 0x328   : > { %v5588_v12 = vadd.f32 %v2674_v55, %v2610_v53 }
 0x32c   : > { %v2739_v61 = vpop.f32.mrf.mxu2  ;;  %v2804_v8 = vpop.f32.mrf.mxu3 }
 0x32d   : > { %v2740_v21 = vadd.f32 %v2739_v61, %v5558_v3  ;;  %v2612_v50 = vpop.f32.mrf.mxu0  ;;  %v2677_v15 = vpop.f32.mrf.mxu1 }
 0x32e   : > { %v2613_v42 = vadd.f32 %v2612_v50, %v5553_v56 }
 0x32f   : > { %v5592_v16 = vadd.f32 %v2804_v8, %v2740_v21 }
 0x330   : > { %v5594_v58 = vadd.f32 %v2677_v15, %v2613_v42 }
 0x334   : > { %v2742_v1 = vpop.f32.mrf.mxu2  ;;  %v2807_v46 = vpop.f32.mrf.mxu3 }
 0x335   : > { %v2743_v57 = vadd.f32 %v2742_v1, %v5558_v3  ;;  %v2615_v59 = vpop.f32.mrf.mxu0  ;;  %v2680_v5 = vpop.f32.mrf.mxu1 }
 0x336   : > { %v2616_v31 = vadd.f32 %v2615_v59, %v5553_v56 }
 0x337   : > { %v5598_v60 = vadd.f32 %v2807_v46, %v2743_v57 }
 0x338   : > { %v5600_v18 = vadd.f32 %v2680_v5, %v2616_v31 }
 0x33c   : > { %v2745_v63 = vpop.f32.mrf.mxu2  ;;  %v2810_v10 = vpop.f32.mrf.mxu3 }
 0x33d   : > { %v2746_v38 = vadd.f32 %v2745_v63, %v5558_v3  ;;  %v2618_v2 = vpop.f32.mrf.mxu0  ;;  %v2683_v14 = vpop.f32.mrf.mxu1 }
 0x33e   : > { %v2619_v44 = vadd.f32 %v2618_v2, %v5553_v56 }
 0x33f   : > { %v5604_v33 = vadd.f32 %v2810_v10, %v2746_v38 }
 0x340   : > { %v5606_v23 = vadd.f32 %v2683_v14, %v2619_v44 }
 0x344   : > { %v2748_v48 = vpop.f32.mrf.mxu2  ;;  %v2813_v35 = vpop.f32.mrf.mxu3 }
 0x345   : > { %v2749_v29 = vadd.f32 %v2748_v48, %v5558_v3  ;;  %v2621_v43 = vpop.f32.mrf.mxu0  ;;  %v2686_v47 = vpop.f32.mrf.mxu1 }
 0x346   : > { %v2622_v52 = vadd.f32 %v2621_v43, %v5553_v56 }
 0x347   : > { %v5610_v9 = vadd.f32 %v2813_v35, %v2749_v29 }
 0x348   : > { %v5612_v27 = vadd.f32 %v2686_v47, %v2622_v52 }
 0x34c   : > { %v2751_v4 = vpop.f32.mrf.mxu2  ;;  %v2816_v11 = vpop.f32.mrf.mxu3 }
 0x34d   : > { %v2752_v25 = vadd.f32 %v2751_v4, %v5558_v3  ;;  %v2624_v22 = vpop.f32.mrf.mxu0  ;;  %v2689_v40 = vpop.f32.mrf.mxu1 }
 0x34f   : > { %v5615_v34 = vadd.f32 %v2816_v11, %v2752_v25 }
 0x354   : > { %v2754_v37 = vpop.f32.mrf.mxu2  ;;  %v2819_v62 = vpop.f32.mrf.mxu3 }
 0x355   : > { %v2627_v0 = vpop.f32.mrf.mxu0  ;;  %v2692_v41 = vpop.f32.mrf.mxu1 }
 0x356   : > { %v2628_v45 = vadd.f32 %v2627_v0, %v5553_v56 }
 0x358   : > { %v5619_v51 = vadd.f32 %v2692_v41, %v2628_v45 }
 0x35c   : > { %v2757_v19 = vpop.f32.mrf.mxu2  ;;  %v2822_v7 = vpop.f32.mrf.mxu3 }
 0x35d   : > { %v2758_v30 = vadd.f32 %v2757_v19, %v5558_v3  ;;  %v2630_v32 = vpop.f32.mrf.mxu0  ;;  %v2695_v36 = vpop.f32.mrf.mxu1  ;;  %v2755_v19 = vadd.f32 %v2754_v37, %v5558_v3 }
 0x35e   : > { %v2631_v53 = vadd.f32 %v2630_v32, %v5553_v56 }
 0x35f   : > { %v5621_v55 = vadd.f32 %v2822_v7, %v2758_v30  ;;  %v2625_v30 = vadd.f32 %v2624_v22, %v5553_v56 }
 0x360   : > { %v5626_v50 = vadd.f32 %v2695_v36, %v2631_v53 }
 0x361   : > { %v2872_v61 = vadd.f32 %v5621_v55, %v5619_v51 }
 0x362   : > { %v2927_v5 = vmul.f32 %v5626_v50, %v5626_v50 }
 0x363   : > { %2873 = vadd.xlane.f32.xlu0 %v2872_v61  ;;  %v5662_v61 = vadd.f32 %v2819_v62, %v2755_v19  ;;  %v2854_v19 = vadd.f32 %v5592_v16, %v5588_v12 }
 0x364   : > { %v2760_v8 = vpop.f32.mrf.mxu2  ;;  %v2825_v21 = vpop.f32.mrf.mxu3 }
 0x365   : > { %v2761_v15 = vadd.f32 %v2760_v8, %v5558_v3  ;;  %v2633_v42 = vpop.f32.mrf.mxu0  ;;  %v2698_v46 = vpop.f32.mrf.mxu1  ;;  %v2924_v62 = vmul.f32 %v5662_v61, %v5662_v61 }
 0x366   : > { %v2634_v57 = vadd.f32 %v2633_v42, %v5553_v56  ;;  %v5666_v42 = vadd.f32 %v2689_v40, %v2625_v30  ;;  %v2860_v30 = vadd.f32 %v5604_v33, %v5600_v18 }
 0x367   : > { %v5629_v1 = vadd.f32 %v2825_v21, %v2761_v15 }
 0x368   : > { %v5638_v2 = vadd.f32 %v2698_v46, %v2634_v57 }
 0x369   : > { %v2875_v59 = vadd.f32 %v5629_v1, %v5626_v50  ;;  %v2928_v31 = vmul.f32 %v5629_v1, %v5629_v1 }
 0x36a   : > { %v2929_v29 = vmul.f32 %v5638_v2, %v5638_v2 }
 0x36b   : > { %2876 = vadd.xlane.f32.xlu1 %v2875_v59  ;;  %v2971_v63 = vadd.f32 %v2928_v31, %v2927_v5  ;;  %v2923_v59 = vmul.f32 %v5666_v42, %v5666_v42 }
 0x36c   : > { %v2763_v10 = vpop.f32.mrf.mxu2  ;;  %v2828_v38 = vpop.f32.mrf.mxu3 }
 0x36d   : > { %v2764_v14 = vadd.f32 %v2763_v10, %v5558_v3  ;;  %2972 = vadd.xlane.f32.xlu2 %v2971_v63  ;;  %v2636_v44 = vpop.f32.mrf.mxu0  ;;  %v2701_v47 = vpop.f32.mrf.mxu1  ;;  %v2965_v31 = vadd.f32 %v2924_v62, %v2923_v59  ;;  %v2926_v10 = vmul.f32 %v5621_v55, %v5621_v55  ;;  %v2913_v62 = vmul.f32 %v5588_v12, %v5588_v12 }
 0x36e   : > { %v2637_v35 = vadd.f32 %v2636_v44, %v5553_v56  ;;  %v2869_v44 = vadd.f32 %v5662_v61, %v5666_v42  ;;  %v2845_v59 = vadd.f32 %v5574_v24, %v5570_v28 }
 0x36f   : > { %v5641_v48 = vadd.f32 %v2828_v38, %v2764_v14  ;;  %v2925_v38 = vmul.f32 %v5619_v51, %v5619_v51  ;;  %v2863_v14 = vadd.f32 %v5610_v9, %v5606_v23 }
 0x370   : > { %v5650_v0 = vadd.f32 %v2701_v47, %v2637_v35  ;;  %v2917_v47 = vmul.f32 %v5600_v18, %v5600_v18 }
 0x371   : > { %v2930_v43 = vmul.f32 %v5641_v48, %v5641_v48  ;;  %v2878_v4 = vadd.f32 %v5641_v48, %v5638_v2  ;;  %v2968_v35 = vadd.f32 %v2926_v10, %v2925_v38  ;;  %v2909_v10 = vmul.f32 %v5576_v54, %v5576_v54 }
 0x372   : > { %v2931_v36 = vmul.f32 %v5650_v0, %v5650_v0 }
 0x373   : > { %v2974_v52 = vadd.f32 %v2930_v43, %v2929_v29  ;;  %v2918_v29 = vmul.f32 %v5604_v33, %v5604_v33  ;;  %v2922_v43 = vmul.f32 %v5615_v34, %v5615_v34 }
 0x374   : > { %v2766_v11 = vpop.f32.mrf.mxu2  ;;  %v2831_v25 = vpop.f32.mrf.mxu3 }
 0x375   : > { %v2767_v41 = vadd.f32 %v2766_v11, %v5558_v3  ;;  %2975 = vadd.xlane.f32.xlu0 %v2974_v52  ;;  %2879 = vadd.xlane.f32.xlu2 %v2878_v4  ;;  %v2639_v45 = vpop.f32.mrf.mxu0  ;;  %v2704_v15 = vpop.f32.mrf.mxu1  ;;  %v2921_v52 = vmul.f32 %v5612_v27, %v5612_v27  ;;  %v2956_v4 = vadd.f32 %v2918_v29, %v2917_v47 }
 0x376   : > { %v2640_v32 = vadd.f32 %v2639_v45, %v5553_v56  ;;  %v2919_v45 = vmul.f32 %v5606_v23, %v5606_v23  ;;  %v2907_v29 = vmul.f32 %v5570_v28, %v5570_v28 }
 0x377   : > { %v5654_v7 = vadd.f32 %v2831_v25, %v2767_v41  ;;  %v2962_v11 = vadd.f32 %v2922_v43, %v2921_v52  ;;  %v2866_v25 = vadd.f32 %v5615_v34, %v5612_v27  ;;  %v2920_v41 = vmul.f32 %v5610_v9, %v5610_v9 }
 0x378   : > { %v5668_v46 = vadd.f32 %v2704_v15, %v2640_v32  ;;  %v2842_v43 = vadd.f32 %v5567_v13, %v5564_v26  ;;  %v2904_v52 = vmul.f32 %v5561_v6, %v5561_v6 }
 0x379   : > { %v2932_v53 = vmul.f32 %v5654_v7, %v5654_v7  ;;  %v2881_v21 = vadd.f32 %v5654_v7, %v5650_v0  ;;  %v2959_v32 = vadd.f32 %v2920_v41, %v2919_v45 }
 0x37a   : > { %v2933_v5 = vmul.f32 %v5668_v46, %v5668_v46 }
 0x37b   : > { %v2977_v8 = vadd.f32 %v2932_v53, %v2931_v36  ;;  %v2912_v36 = vmul.f32 %v5586_v39, %v5586_v39  ;;  %v2916_v53 = vmul.f32 %v5598_v60, %v5598_v60 }
 0x37c   : > { %v2769_v37 = vpop.f32.mrf.mxu2  ;;  %v2834_v22 = vpop.f32.mrf.mxu3 }
 0x37d   : > { %v2770_v56 = vadd.f32 %v2769_v37, %v5558_v3  ;;  %2978 = vadd.xlane.f32.xlu1 %v2977_v8  ;;  %2882 = vadd.xlane.f32.xlu0 %v2881_v21  ;;  %v2911_v8 = vmul.f32 %v5582_v17, %v5582_v17  ;;  %v2915_v21 = vmul.f32 %v5594_v58, %v5594_v58 }
 0x37f   : > { %v5671_v57 = vadd.f32 %v2834_v22, %v2770_v56  ;;  %v2947_v15 = vadd.f32 %v2912_v36, %v2911_v8  ;;  %v2953_v37 = vadd.f32 %v2916_v53, %v2915_v21  ;;  %v2857_v56 = vadd.f32 %v5598_v60, %v5594_v58 }
 0x380   : > { %v2914_v22 = vmul.f32 %v5592_v16, %v5592_v16 }
 0x381   : > { %v2934_v40 = vmul.f32 %v5671_v57, %v5671_v57  ;;  %v2884_v3 = vadd.f32 %v5671_v57, %v5668_v46 }
 0x383   : > { %v2980_v63 = vadd.f32 %v2934_v40, %v2933_v5  ;;  %v2851_v5 = vadd.f32 %v5586_v39, %v5582_v17  ;;  %v2950_v40 = vadd.f32 %v2914_v22, %v2913_v62 }
 0x385   : > { %2966 = vadd.xlane.f32.xlu0 %v2965_v31  ;;  %2981 = vadd.xlane.f32.xlu2 %v2980_v63  ;;  %v2906_v31 = vmul.f32 %v5567_v13, %v5567_v13  ;;  %v2910_v63 = vmul.f32 %v5580_v20, %v5580_v20 }
 0x386   : > { %2885 = vadd.xlane.f32.xlu1 %v2884_v3  ;;  %v2905_v3 = vmul.f32 %v5564_v26, %v5564_v26 }
 0x388   : > { %v2938_v38 = vadd.f32 %v2906_v31, %v2905_v3 }
 0x38d   : > { %2864 = vadd.xlane.f32.xlu0 %v2863_v14  ;;  %2870 = vadd.xlane.f32.xlu2 %v2869_v44  ;;  %v2944_v14 = vadd.f32 %v2910_v63, %v2909_v10  ;;  %v2848_v44 = vadd.f32 %v5580_v20, %v5576_v54 }
 0x38e   : > { %2969 = vadd.xlane.f32.xlu1 %v2968_v35  ;;  %v2908_v35 = vmul.f32 %v5574_v24, %v5574_v24 }
 0x390   : > { %v2941_v47 = vadd.f32 %v2908_v35, %v2907_v29 }
 0x395   : > { %2957 = vadd.xlane.f32.xlu0 %v2956_v4  ;;  %2963 = vadd.xlane.f32.xlu2 %v2962_v11  ;;  %v2903_v4 = vmul.f32 %v5556_v49, %v5556_v49 }
 0x396   : > { %2867 = vadd.xlane.f32.xlu1 %v2866_v25  ;;  %v2839_v25 = vadd.f32 %v5561_v6, %v5556_v49 }
 0x397   : > { %v2935_v11 = vadd.f32 %v2904_v52, %v2903_v4 }
 0x39d   : > { %2855 = vadd.xlane.f32.xlu0 %v2854_v19  ;;  %2861 = vadd.xlane.f32.xlu2 %v2860_v30 }
 0x39e   : > { %2960 = vadd.xlane.f32.xlu1 %v2959_v32 }
 0x3a5   : > { %2948 = vadd.xlane.f32.xlu0 %v2947_v15  ;;  %2954 = vadd.xlane.f32.xlu2 %v2953_v37 }
 0x3a6   : > { %2858 = vadd.xlane.f32.xlu1 %v2857_v56 }
 0x3ad   : > { %2846 = vadd.xlane.f32.xlu0 %v2845_v59  ;;  %2852 = vadd.xlane.f32.xlu2 %v2851_v5 }
 0x3ae   : > { %2951 = vadd.xlane.f32.xlu1 %v2950_v40 }
 0x3b5   : > { %2939 = vadd.xlane.f32.xlu0 %v2938_v38  ;;  %2945 = vadd.xlane.f32.xlu2 %v2944_v14 }
 0x3b6   : > { %2849 = vadd.xlane.f32.xlu1 %v2848_v44 }
 0x3bd   : > { %2843 = vadd.xlane.f32.xlu2 %v2842_v43 }
 0x3be   : > { %2942 = vadd.xlane.f32.xlu1 %v2941_v47 }
 0x3c5   : > { %2936 = vadd.xlane.f32.xlu2 %v2935_v11 }
 0x3c6   : > { %2840 = vadd.xlane.f32.xlu1 %v2839_v25 }
 0x3d6   : > { %v2874_v19 = vpop.xlane.xlu0 %2873 }
 0x3de   : > { %v2877_v41 = vpop.xlane.xlu1 %2876 }
 0x3df   : > { %v2899_v45 = vmul.f32 0.00390625, %v2877_v41 }
 0x3e0   : > { %v2973_v30 = vpop.xlane.xlu2 %2972 }
 0x3e1   : > { %v2995_v32 = vmul.f32 0.00390625, %v2973_v30  ;;  %v3011_v36 = vmul.f32 %v2899_v45, %v2899_v45 }
 0x3e3   : > { %v3027_v53 = vsub.f32 %v2995_v32, %v3011_v36 }
 0x3e5   : > { %v3043_v8 = vadd.f32 1e-05, %v3027_v53  ;;  %v2837_v53 = vld [vmem:[%s6256_s13] sm:$0x3] }
 0x3e7   : > { %3807 = vrsqrt.f32 %v3043_v8  ;;  %vm3173_vm5 = vweird.f32 %v3043_v8 }
 0x3e8   : > { %v2880_v21 = vpop.xlane.xlu2 %2879  ;;  %v2976_v15 = vpop.xlane.xlu0 %2975 }
 0x3e9   : > { %v5749_v37 = vmul.f32 0.00390625, %v2880_v21  ;;  %v2996_v22 = vmul.f32 0.00390625, %v2976_v15 }
 0x3eb   : > { %v3012_v56 = vmul.f32 %v5749_v37, %v5749_v37 }
 0x3ed   : > { %v3808_v62 = vpop.eup %3807  ;;  %v3028_v59 = vsub.f32 %v2996_v22, %v3012_v56  ;;  %v5775_v56 = vmul.f32 0.00390625, %v2874_v19  ;;  %v3231_v22 = vsub.f32 %v5626_v50, %v2899_v45 }
 0x3ee   : > { %v3168_v5 = vmul.f32 %v3808_v62, %v3043_v8  ;;  %vm3174_vm4 = vweird.f32 %v3808_v62  ;;  %v3232_v8 = vsub.f32 %v5629_v1, %v2899_v45 }
 0x3ef   : > { %v5753_v40 = vadd.f32 1e-05, %v3028_v59  ;;  %vm3175_vm6 = vmor %vm3173_vm5, %vm3174_vm4  ;;  %v3010_v45 = vmul.f32 %v5775_v56, %v5775_v56 }
 0x3f0   : > { %v3169_v31 = vmul.f32 %v3808_v62, %v3168_v5  ;;  %v2979_v63 = vpop.xlane.xlu1 %2978  ;;  %v2883_v3 = vpop.xlane.xlu0 %2882 }
 0x3f1   : > { %3809 = vrsqrt.f32 %v5753_v40  ;;  %v5756_v10 = vmul.f32 0.00390625, %v2883_v3  ;;  %v2997_v14 = vmul.f32 0.00390625, %v2979_v63  ;;  %v5781_v63 = vperm.slane %v2837_v53, 0 }
 0x3f2   : > { %v3170_v38 = vmul.f32 0.5, %v3169_v31  ;;  %vm3183_vm8 = vweird.f32 %v5753_v40 }
 0x3f3   : > { %v3013_v44 = vmul.f32 %v5756_v10, %v5756_v10 }
 0x3f4   : > { %v3171_v35 = vsub.f32 1.5, %v3170_v38 }
 0x3f5   : > { %v3029_v29 = vsub.f32 %v2997_v14, %v3013_v44  ;;  %v5785_v14 = vperm.slane %v2837_v53, 1 }
 0x3f6   : > { %v3172_v52 = vmul.f32 %v3808_v62, %v3171_v35  ;;  %v2838_v35 = vld [vmem:[#allocation9] sm:$0x3] }
 0x3f7   : > { %v5760_v43 = vpop.eup %3809  ;;  %v5762_v47 = vadd.f32 1e-05, %v3029_v29 }
 0x3f8   : > { %v3178_v4 = vmul.f32 %v5760_v43, %v5753_v40  ;;  %v2982_v11 = vpop.xlane.xlu2 %2981  ;;  %v2967_v25 = vpop.xlane.xlu0 %2966  ;;  %v3176_v15 = vsel %vm3175_vm6, %v3808_v62, %v3172_v52  ;;  %vm3184_vm7 = vweird.f32 %v5760_v43 }
 0x3f9   : > { %3811 = vrsqrt.f32 %v5762_v47  ;;  %v2886_v41 = vpop.xlane.xlu1 %2885  ;;  %v2998_v36 = vmul.f32 0.00390625, %v2982_v11  ;;  %v3263_v3 = vmul.f32 %v3231_v22, %v3176_v15  ;;  %v3264_v50 = vmul.f32 %v3232_v8, %v3176_v15  ;;  %vm3185_vm9 = vmor %vm3183_vm8, %vm3184_vm7 }
 0x3fa   : > { %v3179_v30 = vmul.f32 %v5760_v43, %v3178_v4  ;;  %v5768_v32 = vmul.f32 0.00390625, %v2886_v41  ;;  %v2993_v41 = vmul.f32 0.00390625, %v2967_v25  ;;  %v5800_v22 = vperm.slane %v2838_v35, 1 }
 0x3fb   : > { %v3300_v53 = vmul.f32 %v5781_v63, %v3263_v3  ;;  %v3301_v8 = vmul.f32 %v5785_v14, %v3264_v50  ;;  %vm3193_vm10 = vweird.f32 %v5762_v47 }
 0x3fc   : > { %v3014_v21 = vmul.f32 %v5768_v32, %v5768_v32  ;;  %v3180_v59 = vmul.f32 0.5, %v3179_v30 }
 0x3fe   : > { %v3030_v5 = vsub.f32 %v2998_v36, %v3014_v21  ;;  %v3181_v52 = vsub.f32 1.5, %v3180_v59  ;;  %v5797_v36 = vperm.slane %v2838_v35, 0  ;;  %v3234_v35 = vsub.f32 %v5641_v48, %v5749_v37 }
 0x3ff   : > { %v5779_v31 = vpop.eup %3811  ;;  %v3236_v48 = vsub.f32 %v5654_v7, %v5756_v10  ;;  %v3238_v7 = vsub.f32 %v5671_v57, %v5768_v32 }
 0x400   : > { %v3188_v38 = vmul.f32 %v5779_v31, %v5762_v47  ;;  %v5787_v44 = vadd.f32 1e-05, %v3030_v5  ;;  %v2871_v19 = vpop.xlane.xlu2 %2870  ;;  %v2865_v62 = vpop.xlane.xlu0 %2864  ;;  %vm3194_vm11 = vweird.f32 %v5779_v31 }
 0x401   : > { %v5789_v29 = vmul.f32 0.00390625, %v2871_v19  ;;  %v2970_v1 = vpop.xlane.xlu1 %2969  ;;  %v3182_v19 = vmul.f32 %v5760_v43, %v3181_v52  ;;  %vm3195_vm13 = vmor %vm3193_vm10, %vm3194_vm11 }
 0x402   : > { %v3189_v4 = vmul.f32 %v5779_v31, %v3188_v38  ;;  %3813 = vrsqrt.f32 %v5787_v44  ;;  %v2994_v11 = vmul.f32 0.00390625, %v2970_v1  ;;  %v3233_v38 = vsub.f32 %v5638_v2, %v5749_v37 }
 0x403   : > { %v3009_v30 = vmul.f32 %v5789_v29, %v5789_v29  ;;  %v5819_v1 = vadd.f32 %v5797_v36, %v3300_v53  ;;  %v3235_v2 = vsub.f32 %v5650_v0, %v5756_v10  ;;  %v3237_v0 = vsub.f32 %v5668_v46, %v5768_v32 }
 0x404   : > { %v3190_v21 = vmul.f32 0.5, %v3189_v4  ;;  %v3026_v15 = vsub.f32 %v2994_v11, %v3010_v45  ;;  %vm3203_vm12 = vweird.f32 %v5787_v44 }
 0x405   : > { %v3025_v25 = vsub.f32 %v2993_v41, %v3009_v30  ;;  %v5825_v41 = vadd.f32 %v5800_v22, %v3301_v8  ;;  %v5834_v30 = vmul.f32 0.00390625, %v2865_v62 }
 0x406   : > { %v5811_v3 = vadd.f32 1e-05, %v3026_v15  ;;  %v3191_v4 = vsub.f32 1.5, %v3190_v21  ;;  %v3186_v21 = vsel %vm3185_vm9, %v5760_v43, %v3182_v19 }
 0x407   : > { %v5816_v50 = vadd.f32 1e-05, %v3025_v25  ;;  %v3265_v19 = vmul.f32 %v3233_v38, %v3186_v21  ;;  %v3007_v10 = vmul.f32 %v5834_v30, %v5834_v30  ;;  %v3266_v59 = vmul.f32 %v3234_v35, %v3186_v21 }
 0x408   : > { %v3814_v45 = vpop.eup %3813  ;;  %3815 = vrsqrt.f32 %v5811_v3  ;;  %v2964_v52 = vpop.xlane.xlu2 %2963  ;;  %v3192_v8 = vmul.f32 %v5779_v31, %v3191_v4  ;;  %vm3163_vm1 = vweird.f32 %v5811_v3 }
 0x409   : > { %v2958_v11 = vpop.xlane.xlu0 %2957  ;;  %v3198_v37 = vmul.f32 %v3814_v45, %v5787_v44  ;;  %3817 = vrsqrt.f32 %v5816_v50  ;;  %v2868_v40 = vpop.xlane.xlu1 %2867  ;;  %v2992_v25 = vmul.f32 0.00390625, %v2964_v52  ;;  %vm3204_vm14 = vweird.f32 %v3814_v45 }
 0x40a   : > { %v5836_v53 = vmul.f32 0.00390625, %v2868_v40  ;;  %v3196_v32 = vsel %vm3195_vm13, %v5779_v31, %v3192_v8  ;;  %v3302_v6 = vmul.f32 %v5781_v63, %v3265_v19  ;;  %vm3205_vm15 = vmor %vm3203_vm12, %vm3204_vm14  ;;  %v2990_v8 = vmul.f32 0.00390625, %v2958_v11 }
 0x40b   : > { %v3199_v15 = vmul.f32 %v3814_v45, %v3198_v37  ;;  %v3267_v49 = vmul.f32 %v3235_v2, %v3196_v32  ;;  %v3268_v13 = vmul.f32 %v3236_v48, %v3196_v32  ;;  %vm3153_vm0 = vweird.f32 %v5816_v50 }
 0x40c   : > { %v3008_v46 = vmul.f32 %v5836_v53, %v5836_v53  ;;  %v3225_v44 = vsub.f32 %v5612_v27, %v5836_v53  ;;  %v5887_v11 = vadd.f32 %v5797_v36, %v3302_v6 }
 0x40d   : > { %v3200_v40 = vmul.f32 0.5, %v3199_v15  ;;  %v3304_v32 = vmul.f32 %v5781_v63, %v3267_v49 }
 0x40e   : > { %v5850_v37 = vpop.eup %3815  ;;  %v3024_v52 = vsub.f32 %v2992_v25, %v3008_v46 }
 0x40f   : > { %v5858_v62 = vpop.eup %3817  ;;  %v3201_v38 = vsub.f32 1.5, %v3200_v40  ;;  %v3158_v15 = vmul.f32 %v5850_v37, %v5811_v3  ;;  %vm3164_vm4 = vweird.f32 %v5850_v37 }
 0x410   : > { %v3148_v25 = vmul.f32 %v5858_v62, %v5816_v50  ;;  %v5871_v46 = vadd.f32 1e-05, %v3024_v52  ;;  %v2862_v4 = vpop.xlane.xlu2 %2861  ;;  %vm3154_vm2 = vweird.f32 %v5858_v62  ;;  %v6294_v50 = vsub.f32 %v5662_v61, %v5789_v29  ;;  %vm3165_vm6 = vmor %vm3163_vm1, %vm3164_vm4 }
 0x411   : > { %v2856_v5 = vpop.xlane.xlu0 %2855  ;;  %v3202_v47 = vmul.f32 %v3814_v45, %v3201_v38  ;;  %v3159_v40 = vmul.f32 %v5850_v37, %v3158_v15  ;;  %v5874_v57 = vmul.f32 0.00390625, %v2862_v4  ;;  %v2961_v43 = vpop.xlane.xlu1 %2960  ;;  %vm3155_vm3 = vmor %vm3153_vm0, %vm3154_vm2 }
 0x412   : > { %v3149_v31 = vmul.f32 %v5858_v62, %v3148_v25  ;;  %3819 = vrsqrt.f32 %v5871_v46  ;;  %v2991_v52 = vmul.f32 0.00390625, %v2961_v43  ;;  %v3303_v43 = vmul.f32 %v5785_v14, %v3266_v59 }
 0x413   : > { %v3206_v35 = vsel %vm3205_vm15, %v3814_v45, %v3202_v47  ;;  %v3006_v21 = vmul.f32 %v5874_v57, %v5874_v57  ;;  %v3160_v15 = vmul.f32 0.5, %v3159_v40  ;;  %v3226_v40 = vsub.f32 %v5615_v34, %v5836_v53 }
 0x414   : > { %v3269_v4 = vmul.f32 %v3237_v0, %v3206_v35  ;;  %v3270_v38 = vmul.f32 %v3238_v7, %v3206_v35  ;;  %v3150_v19 = vmul.f32 0.5, %v3149_v31  ;;  %v3023_v26 = vsub.f32 %v2991_v52, %v3007_v10 }
 0x415   : > { %v3022_v25 = vsub.f32 %v2990_v8, %v3006_v21  ;;  %v3305_v10 = vmul.f32 %v5785_v14, %v3268_v13  ;;  %v3161_v6 = vsub.f32 1.5, %v3160_v15  ;;  %v5911_v35 = vmul.f32 0.00390625, %v2856_v5 }
 0x416   : > { %v3306_v2 = vmul.f32 %v5781_v63, %v3269_v4  ;;  %v3307_v45 = vmul.f32 %v5785_v14, %v3270_v38  ;;  %v3151_v48 = vsub.f32 1.5, %v3150_v19  ;;  %v5895_v7 = vadd.f32 1e-05, %v3023_v26 }
 0x417   : > { %v5893_v0 = vadd.f32 1e-05, %v3022_v25  ;;  %v3371_v21 = vmax.f32 %v5887_v11, 0.0  ;;  %v3340_v4 = vadd.f32 %v5800_v22, %v3303_v43  ;;  %v3341_v15 = vadd.f32 %v5797_v36, %v3304_v32 }
 0x418   : > { %v5899_v47 = vpop.eup %3819  ;;  %v2955_v31 = vpop.xlane.xlu2 %2954  ;;  %v3343_v8 = vadd.f32 %v5797_v36, %v3306_v2  ;;  %v3344_v59 = vadd.f32 %v5800_v22, %v3307_v45  ;;  %v3152_v52 = vmul.f32 %v5858_v62, %v3151_v48  ;;  %v3342_v25 = vadd.f32 %v5800_v22, %v3305_v10 }
 0x419   : > { %v3138_v49 = vmul.f32 %v5899_v47, %v5871_v46  ;;  %3821 = vrsqrt.f32 %v5893_v0  ;;  %v2859_v26 = vpop.xlane.xlu1 %2858  ;;  %v2949_v13 = vpop.xlane.xlu0 %2948  ;;  %v3162_v2 = vmul.f32 %v5850_v37, %v3161_v6  ;;  %v2989_v43 = vmul.f32 0.00390625, %v2955_v31 }
 0x41a   : > { %3823 = vrsqrt.f32 %v5895_v7  ;;  %v5916_v19 = vmul.f32 0.00390625, %v2859_v26  ;;  %v3375_v5 = vmax.f32 %v3343_v8, 0.0  ;;  %v3376_v45 = vmax.f32 %v3344_v59, 0.0 }
 0x41b   : > { %v3139_v38 = vmul.f32 %v5899_v47, %v3138_v49  ;;  %v3156_v11 = vsel %vm3155_vm3, %v5858_v62, %v3152_v52  ;;  %vm3143_vm5 = vweird.f32 %v5871_v46  ;;  %v3217_v10 = vsub.f32 %v5588_v12, %v5911_v35 }
 0x41c   : > { %v3005_v49 = vmul.f32 %v5916_v19, %v5916_v19  ;;  %3390 = vmatpush.xpose.msrb.mxu0 %v3375_v5  ;;  %3410 = vmatpush.xpose.msrb.mxu1 %v3376_v45  ;;  %v3373_v8 = vmax.f32 %v3341_v15, 0.0  ;;  %v3374_v59 = vmax.f32 %v3342_v25, 0.0  ;;  %v6293_v26 = vsub.f32 %v5666_v42, %v5789_v29 }
 0x41d   : > { %v3140_v48 = vmul.f32 0.5, %v3139_v38  ;;  %v3260_v32 = vmul.f32 %v6294_v50, %v3156_v11  ;;  %vm3144_vm7 = vweird.f32 %v5899_v47  ;;  %v2987_v45 = vmul.f32 0.00390625, %v2949_v13 }
 0x41e   : > { %v3021_v31 = vsub.f32 %v2989_v43, %v3005_v49  ;;  %v3259_v38 = vmul.f32 %v6293_v26, %v3156_v11  ;;  %v3166_v61 = vsel %vm3165_vm6, %v5850_v37, %v3162_v2  ;;  %v3004_v43 = vmul.f32 %v5911_v35, %v5911_v35  ;;  %vm3145_vm8 = vmor %vm3143_vm5, %vm3144_vm7 }
 0x41f   : > { %v5934_v6 = vpop.eup %3821  ;;  %v3141_v62 = vsub.f32 1.5, %v3140_v48  ;;  %v6295_v2 = vsub.f32 %v5619_v51, %v5775_v56  ;;  %vm3123_vm9 = vweird.f32 %v5893_v0  ;;  %v3218_v51 = vsub.f32 %v5592_v16, %v5911_v35 }
 0x420   : > { %v5936_v52 = vpop.eup %3823  ;;  %v3118_v15 = vmul.f32 %v5934_v6, %v5893_v0  ;;  %v2853_v25 = vpop.xlane.xlu2 %2852  ;;  %v5953_v42 = vadd.f32 1e-05, %v3021_v31  ;;  %3391 = vmatpush.xpose.msrb.mxu0 %v3373_v8  ;;  %3411 = vmatpush.xpose.msrb.mxu1 %v3374_v59  ;;  %v3372_v31 = vmax.f32 %v3340_v4, 0.0  ;;  %v6296_v59 = vsub.f32 %v5621_v55, %v5775_v56 }
 0x421   : > { %v3128_v5 = vmul.f32 %v5936_v52, %v5895_v7  ;;  %v2952_v48 = vpop.xlane.xlu1 %2951  ;;  %v5957_v3 = vmul.f32 0.00390625, %v2853_v25  ;;  %v3142_v49 = vmul.f32 %v5899_v47, %v3141_v62  ;;  %v2847_v13 = vpop.xlane.xlu0 %2846  ;;  %v3261_v8 = vmul.f32 %v6295_v2, %v3166_v61 }
 0x422   : > { %v3119_v29 = vmul.f32 %v5934_v6, %v3118_v15  ;;  %v2988_v11 = vmul.f32 0.00390625, %v2952_v48  ;;  %3825 = vrsqrt.f32 %v5953_v42  ;;  %v3262_v15 = vmul.f32 %v6296_v59, %v3166_v61 }
 0x423   : > { %v3129_v50 = vmul.f32 %v5936_v52, %v3128_v5  ;;  %v3003_v37 = vmul.f32 %v5957_v3, %v5957_v3  ;;  %v3296_v5 = vmul.f32 %v5781_v63, %v3259_v38  ;;  %v3297_v48 = vmul.f32 %v5785_v14, %v3260_v32 }
 0x424   : > { %v3120_v26 = vmul.f32 0.5, %v3119_v29  ;;  %v3020_v62 = vsub.f32 %v2988_v11, %v3004_v43  ;;  %v3219_v55 = vsub.f32 %v5594_v58, %v5916_v19  ;;  %3392 = vmatpush.xpose.msrb.mxu0 %v3371_v21  ;;  %3412 = vmatpush.xpose.msrb.mxu1 %v3372_v31  ;;  %v3146_v4 = vsel %vm3145_vm8, %v5899_v47, %v3142_v49 }
 0x425   : > { %v3130_v25 = vmul.f32 0.5, %v3129_v50  ;;  %v3019_v56 = vsub.f32 %v2987_v45, %v3003_v37  ;;  %v3220_v32 = vsub.f32 %v5598_v60, %v5916_v19  ;;  %vm3124_vm10 = vweird.f32 %v5934_v6 }
 0x426   : > { %v3121_v38 = vsub.f32 1.5, %v3120_v26  ;;  %v5986_v61 = vadd.f32 1e-05, %v3020_v62  ;;  %vm3133_vm11 = vweird.f32 %v5895_v7  ;;  %v3298_v11 = vmul.f32 %v5781_v63, %v3261_v8  ;;  %vm3125_vm13 = vmor %vm3123_vm9, %vm3124_vm10 }
 0x427   : > { %v5990_v46 = vadd.f32 1e-05, %v3019_v56  ;;  %v3299_v21 = vmul.f32 %v5785_v14, %v3262_v15  ;;  %v3131_v47 = vsub.f32 1.5, %v3130_v25  ;;  %v3333_v49 = vadd.f32 %v5797_v36, %v3296_v5 }
 0x428   : > { %v2946_v29 = vpop.xlane.xlu2 %2945  ;;  %v5994_v45 = vpop.eup %3825  ;;  %3827 = vrsqrt.f32 %v5986_v61  ;;  %v3334_v50 = vadd.f32 %v5800_v22, %v3297_v48  ;;  %v3257_v31 = vmul.f32 %v3225_v44, %v3146_v4  ;;  %vm3134_vm12 = vweird.f32 %v5936_v52 }
 0x429   : > { %v2850_v43 = vpop.xlane.xlu1 %2849  ;;  %v3108_v26 = vmul.f32 %v5994_v45, %v5953_v42  ;;  %3829 = vrsqrt.f32 %v5990_v46  ;;  %v6297_v37 = vmax.f32 %v5819_v1, 0.0  ;;  %v6298_v2 = vmax.f32 %v5825_v41, 0.0  ;;  %vm3135_vm15 = vmor %vm3133_vm11, %vm3134_vm12 }
 0x42a   : > { %v3258_v8 = vmul.f32 %v3226_v40, %v3146_v4  ;;  %v3122_v27 = vmul.f32 %v5934_v6, %v3121_v38  ;;  %v6014_v44 = vmul.f32 0.00390625, %v2847_v13  ;;  %v6016_v59 = vmul.f32 0.00390625, %v2850_v43  ;;  %v2940_v13 = vpop.xlane.xlu0 %2939 }
 0x42b   : > { %3393 = vmatpush.xpose.msrb.mxu0 %v6297_v37  ;;  %3413 = vmatpush.xpose.msrb.mxu1 %v6298_v2  ;;  %v3109_v15 = vmul.f32 %v5994_v45, %v3108_v26  ;;  %v3215_v25 = vsub.f32 %v5582_v17, %v5957_v3  ;;  %v3335_v1 = vadd.f32 %v5797_v36, %v3298_v11  ;;  %v2986_v53 = vmul.f32 0.00390625, %v2946_v29 }
 0x42c   : > { %v3336_v41 = vadd.f32 %v5800_v22, %v3299_v21  ;;  %v3132_v62 = vmul.f32 %v5936_v52, %v3131_v47  ;;  %v3216_v34 = vsub.f32 %v5586_v39, %v5957_v3  ;;  %v3002_v40 = vmul.f32 %v6016_v59, %v6016_v59 }
 0x42d   : > { %v3110_v5 = vmul.f32 0.5, %v3109_v15  ;;  %v3367_v48 = vmax.f32 %v3335_v1, 0.0  ;;  %v3294_v4 = vmul.f32 %v5781_v63, %v3257_v31  ;;  %v3126_v11 = vsel %vm3125_vm13, %v5934_v6, %v3122_v27 }
 0x42e   : > { %v3368_v56 = vmax.f32 %v3336_v41, 0.0  ;;  %v6033_v38 = vpop.eup %3827  ;;  %v3018_v21 = vsub.f32 %v2986_v53, %v3002_v40  ;;  %v3365_v29 = vmax.f32 %v3333_v49, 0.0  ;;  %v3366_v47 = vmax.f32 %v3334_v50, 0.0 }
 0x42f   : > { %v6036_v43 = vpop.eup %3829  ;;  %v3111_v26 = vsub.f32 1.5, %v3110_v5  ;;  %vm3114_vm14 = vweird.f32 %v5994_v45  ;;  %v3098_v0 = vmul.f32 %v6033_v38, %v5986_v61  ;;  %v2984_v37 = vmul.f32 0.00390625, %v2940_v13  ;;  %3394 = vmatpush.xpose.msrb.mxu0 %v3367_v48 }
 0x430   : > { %3414 = vmatpush.xpose.msrb.mxu1 %v3368_v56  ;;  %v2844_v2 = vpop.xlane.xlu2 %2843  ;;  %v3088_v6 = vmul.f32 %v6036_v43, %v5990_v46  ;;  %v6047_v49 = vadd.f32 1e-05, %v3018_v21  ;;  %v3331_v27 = vadd.f32 %v5797_v36, %v3294_v4  ;;  %v3295_v41 = vmul.f32 %v5785_v14, %v3258_v8 }
 0x431   : > { %v6049_v50 = vmul.f32 0.00390625, %v2844_v2  ;;  %v2943_v31 = vpop.xlane.xlu1 %2942  ;;  %v3099_v15 = vmul.f32 %v6033_v38, %v3098_v0  ;;  %v3136_v53 = vsel %vm3135_vm15, %v5936_v52, %v3132_v62  ;;  %v3112_v7 = vmul.f32 %v5994_v45, %v3111_v26 }
 0x432   : > { %v2985_v1 = vmul.f32 0.00390625, %v2943_v31  ;;  %v3089_v40 = vmul.f32 %v6036_v43, %v3088_v6  ;;  %3831 = vrsqrt.f32 %v6047_v49  ;;  %v6299_v5 = vsub.f32 %v5600_v18, %v5874_v57 }
 0x433   : > { %v3000_v13 = vmul.f32 %v6049_v50, %v6049_v50  ;;  %v6300_v56 = vsub.f32 %v5604_v33, %v5874_v57  ;;  %vm3113_vm0 = vweird.f32 %v5953_v42  ;;  %3395 = vmatpush.xpose.msrb.mxu0 %v3365_v29  ;;  %v3001_v52 = vmul.f32 %v6014_v44, %v6014_v44 }
 0x434   : > { %v3253_v48 = vmul.f32 %v6299_v5, %v3126_v11  ;;  %3415 = vmatpush.xpose.msrb.mxu1 %v3366_v47  ;;  %v3090_v8 = vmul.f32 0.5, %v3089_v40  ;;  %v3213_v62 = vsub.f32 %v5576_v54, %v6016_v59  ;;  %v3363_v26 = vmax.f32 %v3331_v27, 0.0  ;;  %vm3115_vm1 = vmor %vm3113_vm0, %vm3114_vm14 }
 0x435   : > { %v3254_v4 = vmul.f32 %v6300_v56, %v3126_v11  ;;  %v3016_v21 = vsub.f32 %v2984_v37, %v3000_v13  ;;  %vm3093_vm2 = vweird.f32 %v5990_v46  ;;  %v3100_v18 = vmul.f32 0.5, %v3099_v15 }
 0x436   : > { %v3017_v33 = vsub.f32 %v2985_v1, %v3001_v52  ;;  %v3332_v57 = vadd.f32 %v5800_v22, %v3295_v41  ;;  %v6301_v42 = vsub.f32 %v5606_v23, %v5834_v30  ;;  %v3116_v29 = vsel %vm3115_vm1, %v5994_v45, %v3112_v7 }
 0x437   : > { %v3214_v47 = vsub.f32 %v5580_v20, %v6016_v59  ;;  %v6081_v0 = vadd.f32 1e-05, %v3016_v21  ;;  %v6302_v37 = vsub.f32 %v5610_v9, %v5834_v30  ;;  %v3091_v6 = vsub.f32 1.5, %v3090_v8  ;;  %3396 = vmatpush.xpose.msrb.mxu0 %v3363_v26 }
 0x438   : > { %v3255_v11 = vmul.f32 %v6301_v42, %v3136_v53  ;;  %v6086_v31 = vadd.f32 1e-05, %v3017_v33  ;;  %v3364_v27 = vmax.f32 %v3332_v57, 0.0  ;;  %v3832_v23 = vpop.eup %3831  ;;  %vm3103_vm3 = vweird.f32 %v5986_v61  ;;  %v2937_v5 = vpop.xlane.xlu2 %2936 }
 0x439   : > { %v3256_v2 = vmul.f32 %v6302_v37, %v3136_v53  ;;  %vm3104_vm4 = vweird.f32 %v6033_v38  ;;  %3833 = vrsqrt.f32 %v6081_v0  ;;  %v2841_v1 = vpop.xlane.xlu1 %2840  ;;  %v3290_v9 = vmul.f32 %v5781_v63, %v3253_v48 }
 0x43a   : > { %v3292_v15 = vmul.f32 %v5781_v63, %v3255_v11  ;;  %vm3094_vm5 = vweird.f32 %v6036_v43  ;;  %v3101_v30 = vsub.f32 1.5, %v3100_v18  ;;  %v3078_v41 = vmul.f32 %v3832_v23, %v6047_v49  ;;  %3416 = vmatpush.xpose.msrb.mxu1 %v3364_v27  ;;  %vm3105_vm9 = vmor %vm3103_vm3, %vm3104_vm4 }
 0x43b   : > { %v3293_v45 = vmul.f32 %v5785_v14, %v3256_v2  ;;  %3835 = vrsqrt.f32 %v6086_v31  ;;  %v3251_v53 = vmul.f32 %v3219_v55, %v3116_v29  ;;  %v3252_v7 = vmul.f32 %v3220_v32, %v3116_v29  ;;  %vm3095_vm7 = vmor %vm3093_vm2, %vm3094_vm5 }
 0x43c   : > { %v3329_v40 = vadd.f32 %v5797_v36, %v3292_v15  ;;  %v3092_v48 = vmul.f32 %v6036_v43, %v3091_v6  ;;  %v3079_v56 = vmul.f32 %v3832_v23, %v3078_v41  ;;  %vm3083_vm6 = vweird.f32 %v6047_v49 }
 0x43d   : > { %v3330_v13 = vadd.f32 %v5800_v22, %v3293_v45  ;;  %v6107_v52 = vmul.f32 0.00390625, %v2841_v1  ;;  %v3327_v58 = vadd.f32 %v5797_v36, %v3290_v9  ;;  %v3291_v55 = vmul.f32 %v5785_v14, %v3254_v4 }
 0x43e   : > { %v3361_v8 = vmax.f32 %v3329_v40, 0.0  ;;  %v3102_v60 = vmul.f32 %v6033_v38, %v3101_v30  ;;  %v3080_v19 = vmul.f32 0.5, %v3079_v56  ;;  %v2983_v32 = vmul.f32 0.00390625, %v2937_v5 }
 0x43f   : > { %v3362_v21 = vmax.f32 %v3330_v13, 0.0  ;;  %v2999_v26 = vmul.f32 %v6107_v52, %v6107_v52  ;;  %v6114_v18 = vpop.eup %3833  ;;  %vm3084_vm8 = vweird.f32 %v3832_v23  ;;  %v3328_v33 = vadd.f32 %v5800_v22, %v3291_v55 }
 0x440   : > { %3397 = vmatpush.xpose.msrb.mxu0 %v3361_v8  ;;  %v3288_v4 = vmul.f32 %v5781_v63, %v3251_v53  ;;  %v3289_v57 = vmul.f32 %v5785_v14, %v3252_v7  ;;  %v3096_v11 = vsel %vm3095_vm7, %v6036_v43, %v3092_v48  ;;  %v3081_v29 = vsub.f32 1.5, %v3080_v19  ;;  %vm3085_vm10 = vmor %vm3083_vm6, %vm3084_vm8 }
 0x441   : > { %3417 = vmatpush.xpose.msrb.mxu1 %v3362_v21  ;;  %v6123_v42 = vpop.eup %3835  ;;  %v3058_v37 = vmul.f32 %v6114_v18, %v6081_v0  ;;  %v3015_v2 = vsub.f32 %v2983_v32, %v2999_v26  ;;  %v3359_v6 = vmax.f32 %v3327_v58, 0.0  ;;  %v3360_v27 = vmax.f32 %v3328_v33, 0.0 }
 0x442   : > { %v3068_v46 = vmul.f32 %v6123_v42, %v6086_v31  ;;  %v3325_v15 = vadd.f32 %v5797_v36, %v3288_v4  ;;  %v3082_v45 = vmul.f32 %v3832_v23, %v3081_v29  ;;  %v3326_v9 = vadd.f32 %v5800_v22, %v3289_v57 }
 0x443   : > { %v3059_v43 = vmul.f32 %v6114_v18, %v3058_v37  ;;  %v6136_v1 = vadd.f32 1e-05, %v3015_v2  ;;  %v3247_v30 = vmul.f32 %v3215_v25, %v3096_v11  ;;  %v3106_v61 = vsel %vm3105_vm9, %v6033_v38, %v3102_v60  ;;  %v6304_v60 = vld [vmem:[#allocation26_spill] sm:$0xff] }
 0x444   : > { %v3069_v41 = vmul.f32 %v6123_v42, %v3068_v46  ;;  %3398 = vmatpush.xpose.msrb.mxu0 %v3359_v6  ;;  %v3248_v53 = vmul.f32 %v3216_v34, %v3096_v11  ;;  %v3086_v7 = vsel %vm3085_vm10, %v3832_v23, %v3082_v45  ;;  %v3357_v49 = vmax.f32 %v3325_v15, 0.0 }
 0x445   : > { %3418 = vmatpush.xpose.msrb.mxu1 %v3360_v27  ;;  %v3060_v40 = vmul.f32 0.5, %v3059_v43  ;;  %3837 = vrsqrt.f32 %v6136_v1  ;;  %v3245_v17 = vmul.f32 %v3213_v62, %v3086_v7  ;;  %v3358_v13 = vmax.f32 %v3326_v9, 0.0 }
 0x446   : > { %v3070_v25 = vmul.f32 0.5, %v3069_v41  ;;  %v3246_v5 = vmul.f32 %v3214_v47, %v3086_v7  ;;  %v3249_v39 = vmul.f32 %v3217_v10, %v3106_v61  ;;  %v3250_v3 = vmul.f32 %v3218_v51, %v3106_v61  ;;  %v6305_v41 = vld [vmem:[#allocation23_spill] sm:$0xff] }
 0x447   : > { %v3061_v38 = vsub.f32 1.5, %v3060_v40  ;;  %v3211_v54 = vsub.f32 %v5570_v28, %v6014_v44  ;;  %vm3064_vm11 = vweird.f32 %v6114_v18  ;;  %v3284_v20 = vmul.f32 %v5781_v63, %v3247_v30 }
 0x448   : > { %v3071_v34 = vsub.f32 1.5, %v3070_v25  ;;  %3399 = vmatpush.xpose.msrb.mxu0 %v3357_v49  ;;  %v3286_v62 = vmul.f32 %v5781_v63, %v3249_v39  ;;  %v3287_v12 = vmul.f32 %v5785_v14, %v3250_v3  ;;  %v3285_v10 = vmul.f32 %v5785_v14, %v3248_v53  ;;  %v6306_v53 = vld [vmem:[#allocation24_spill] sm:$0xff] }
 0x449   : > { %3419 = vmatpush.xpose.msrb.mxu1 %v3358_v13  ;;  %v3062_v59 = vmul.f32 %v6114_v18, %v3061_v38  ;;  %v3212_v16 = vsub.f32 %v5574_v24, %v6014_v44  ;;  %vm3074_vm12 = vweird.f32 %v6123_v42  ;;  %v3282_v35 = vmul.f32 %v5781_v63, %v3245_v17  ;;  %v6303_v24 = vld [vmem:[#allocation25_spill] sm:$0xff] }
 0x44a   : > { %v3072_v28 = vmul.f32 %v6123_v42, %v3071_v34  ;;  %vm3063_vm13 = vweird.f32 %v6081_v0  ;;  %v3323_v47 = vadd.f32 %v5797_v36, %v3286_v62  ;;  %v3324_v23 = vadd.f32 %v5800_v22, %v3287_v12 }
 0x44b   : > { %v3838_v51 = vpop.eup %3837  ;;  %v3283_v48 = vmul.f32 %v5785_v14, %v3246_v5  ;;  %vm3065_vm14 = vmor %vm3063_vm13, %vm3064_vm11  ;;  %v3209_v44 = vsub.f32 %v6303_v24, %v6049_v50  ;;  %vm3073_vm15 = vweird.f32 %v6086_v31  ;;  %v3321_v8 = vadd.f32 %v5797_v36, %v3284_v20 }
 0x44c   : > { %v3048_v56 = vmul.f32 %v3838_v51, %v6136_v1  ;;  %v3066_v0 = vsel %vm3065_vm14, %v6114_v18, %v3062_v59  ;;  %vm3075_vm0 = vmor %vm3073_vm15, %vm3074_vm12  ;;  %v3355_v21 = vmax.f32 %v3323_v47, 0.0  ;;  %v3356_v58 = vmax.f32 %v3324_v23, 0.0  ;;  %v3378_v18 = vld [vmem:[#allocation2] sm:$0x1] }
 0x44d   : > { %v3322_v55 = vadd.f32 %v5800_v22, %v3285_v10  ;;  %v3210_v19 = vsub.f32 %v6304_v60, %v6049_v50  ;;  %v3319_v26 = vadd.f32 %v5797_v36, %v3282_v35  ;;  %v3076_v33 = vsel %vm3075_vm0, %v6123_v42, %v3072_v28  ;;  %v3377_v10 = vld [vmem:[#allocation11] sm:$0x3] }
 0x44e   : > { %v3049_v32 = vmul.f32 %v3838_v51, %v3048_v56  ;;  %3400 = vmatpush.xpose.msrb.mxu0 %v3355_v21  ;;  %3420 = vmatpush.xpose.msrb.mxu1 %v3356_v58  ;;  %v3320_v31 = vadd.f32 %v5800_v22, %v3283_v48  ;;  %v3243_v4 = vmul.f32 %v3211_v54, %v3076_v33  ;;  %v3353_v37 = vmax.f32 %v3321_v8, 0.0 }
 0x44f   : > { %v3244_v57 = vmul.f32 %v3212_v16, %v3076_v33  ;;  %v3241_v11 = vmul.f32 %v3209_v44, %v3066_v0  ;;  %v3242_v2 = vmul.f32 %v3210_v19, %v3066_v0  ;;  %v3354_v46 = vmax.f32 %v3322_v55, 0.0 }
 0x450   : > { %v3050_v29 = vmul.f32 0.5, %v3049_v32  ;;  %v3280_v6 = vmul.f32 %v5781_v63, %v3243_v4  ;;  %v4072_v27 = vmov 0   ;;  %vm3054_vm1 = vweird.f32 %v3838_v51 }
 0x451   : > { %v3281_v50 = vmul.f32 %v5785_v14, %v3244_v57  ;;  %3742 = vset.pattern.permute.xlu0 %v4072_v27  ;;  %v3351_v42 = vmax.f32 %v3319_v26, 0.0  ;;  %v3352_v45 = vmax.f32 %v3320_v31, 0.0  ;;  %vm3053_vm2 = vweird.f32 %v6136_v1 }
 0x452   : > { %v3051_v15 = vsub.f32 1.5, %v3050_v29  ;;  %3381 = vperm.xlu0 %3742, %v3378_v18   ;;  %3401 = vmatpush.xpose.msrb.mxu0 %v3353_v37  ;;  %v3317_v43 = vadd.f32 %v5797_v36, %v3280_v6  ;;  %vm3055_vm3 = vmor %vm3053_vm2, %vm3054_vm1  ;;  %v3207_v61 = vsub.f32 %v6305_v41, %v6107_v52  ;;  %v3208_v7 = vsub.f32 %v6306_v53, %v6107_v52 }
 0x453   : > { %3421 = vmatpush.xpose.msrb.mxu1 %v3354_v46  ;;  %v3318_v9 = vadd.f32 %v5800_v22, %v3281_v50  ;;  %v3278_v40 = vmul.f32 %v5781_v63, %v3241_v11  ;;  %v3279_v17 = vmul.f32 %v5785_v14, %v3242_v2  ;;  %v3386_v16 = vperm.slane %v3377_v10, 0 }
 0x454   : > { %v3052_v30 = vmul.f32 %v3838_v51, %v3051_v15  ;;  %v3349_v5 = vmax.f32 %v3317_v43, 0.0  ;;  %v3387_v28 = vperm.slane %v3377_v10, 1 }
 0x455   : > { %v3350_v38 = vmax.f32 %v3318_v9, 0.0  ;;  %v3315_v1 = vadd.f32 %v5797_v36, %v3278_v40  ;;  %v3316_v39 = vadd.f32 %v5800_v22, %v3279_v17 }
 0x456   : > { %v3056_v25 = vsel %vm3055_vm3, %v3838_v51, %v3052_v30  ;;  %3402 = vmatpush.xpose.msrb.mxu0 %v3351_v42 }
 0x457   : > { %v3239_v49 = vmul.f32 %v3207_v61, %v3056_v25  ;;  %v3240_v13 = vmul.f32 %v3208_v7, %v3056_v25  ;;  %3422 = vmatpush.xpose.msrb.mxu1 %v3352_v45  ;;  %v3347_v20 = vmax.f32 %v3315_v1, 0.0  ;;  %v3348_v59 = vmax.f32 %v3316_v39, 0.0 }
 0x459   : > { %v3276_v3 = vmul.f32 %v5781_v63, %v3239_v49  ;;  %v3277_v54 = vmul.f32 %v5785_v14, %v3240_v13 }
 0x45a   : > { %3403 = vmatpush.xpose.msrb.mxu0 %v3349_v5 }
 0x45b   : > { %3423 = vmatpush.xpose.msrb.mxu1 %v3350_v38  ;;  %v3313_v52 = vadd.f32 %v5797_v36, %v3276_v3  ;;  %v3314_v34 = vadd.f32 %v5800_v22, %v3277_v54 }
 0x45d   : > { %v3345_v62 = vmax.f32 %v3313_v52, 0.0  ;;  %v3346_v12 = vmax.f32 %v3314_v34, 0.0 }
 0x45e   : > { %3404 = vmatpush.xpose.msrb.mxu0 %v3347_v20 }
 0x45f   : > { %3424 = vmatpush.xpose.msrb.mxu1 %v3348_v59 }
 0x462   : > { %3405 = vmatpush.xpose.msrb.mxu0 %v3345_v62 }
 0x463   : > { %3425 = vmatpush.xpose.msrb.mxu1 %v3346_v12 }
 0x465   : > { %3406 = vmatmul.f32.vlgmr.msrb.gmra.mxu0 %v3386_v16 }
 0x466   : > { %3426 = vmatmul.f32.vlgmr.msrb.gmra.mxu1 %v3387_v28 }
 0x4c4   : > { %v3382_v63 = vpop.permute.xlu0 %3381 }
 0x4c5   : > { %v3384_v14 = vperm.slane %v3382_v63, 0 }
 0x4e2   : > { %v3407_v36 = vpop.f32.mrf.mxu0 }
 0x4e3   : > { %v3427_v22 = vpop.f32.mrf.mxu1  ;;  %v3408_v35 = vadd.f32 %v3407_v36, %v3384_v14 }
 0x4e5   : > { %v3428_v51 = vadd.f32 %v3427_v22, %v3408_v35 }
 0x4e7   : > { %3430 = vst [vmem:[%s634_s23] sm:$0x1] %v3428_v51 }
 0x4e8   : > { %4016 = shalt.err (!%p4013_p8)
}
 0x4e9   : > { %3669 = dma.vmem_to_hbm [thread:$0]  (%p4204_p5), %s3443_s21, 16, %s3445_s24, %s3432_s25  }
 0x4ea PF: > { %s6307_s10 = sld [smem:[#allocation19_spill]] }
 0x4eb   : > { %s6308_s26 = sld [smem:[#allocation17_spill]] }
 0x4f0   : > { %p3701_p9 = scmp.ge.s32.totalorder %s6307_s10, 2 }
 0x4f1   : > { %s3456_s30 = sand.u32 1, %s6308_s26  }
 0x4f2   : > { %p3688_p10 = pnand %p3701_p9, %p4208_p6  ;;  %s3457_s22 = scalar_lea.sflag [#allocation5], %s3456_s30 }
 0x4f4   : > { %p3689_p11 = pneg %p3688_p10 }
 0x4f6   : > { %4046 = dma.done.wait (%p3689_p11), %s3457_s22, 16  }
 0x4f7   : > { %4048 = vsyncadd (%p3689_p11), %s3457_s22, 4294967280  ;;  %s6310_s29 = sld [smem:[#allocation20_spill]]  ;;  %s6313_s26 = smov %s4055_s27 }
 0x4f8   : > { %s6311_s23 = sld [smem:[#allocation18_spill]] }
 0x4f9   : > { %s6312_s28 = sld [smem:[#allocation21_spill]] }
 0x4fd   : > { %p32_p12 = scmp.ge.s32.totalorder %s6310_s29, 4  }
 0x4fe   : > { %s6314_s27 = smov %s6311_s23 }
 0x4ff   :  { %34 = sbr.rel (!%p32_p12) target bundleno = 11 (0xb), region = 147 }
 0x504   :  { %3462 = vsyncpa [#allocation4], 1 }
 0x505   :  { %3464 = vsyncpa [#allocation4 + $0x1], 1 }
 0x506   :  { %3465 = vsyncpa [#allocation7], 1 }
 0x507   :  { %3466 = vsyncpa [#allocation10], 1 }
 0x508   :  { %3467 = vsyncpa [#allocation5], 1 }
 0x509   :  { %3469 = vsyncpa [#allocation5 + $0x1], 1 }

</bundles_post_ra>
